<compile_context>
chip_gen: v6e
topology: v6e:2x2x1
jax: 0.10.0
libtpu: 0.0.40
codegen_flags: <defaults>
</compile_context>

<pallas_src>
import math
import functools

import jax
import jax.numpy as jnp
from jax.experimental import pallas as pl
from jax.experimental.pallas import tpu as pltpu


# -----------------------------------------------------------------------------
# Kernel
# -----------------------------------------------------------------------------
def _layernorm(x, g, b, eps=1e-6):
    """LayerNorm over last dim, f32 math; eps matches the reference (1e-6)."""
    mu = jnp.mean(x, axis=-1, keepdims=True)
    var = jnp.mean((x - mu) ** 2, axis=-1, keepdims=True)
    return (x - mu) * jax.lax.rsqrt(var + eps) * g + b


def _gpt_kernel(n_head, n_layer,
                x_ref, pos_ref, pvec_ref,
                wqkv_ref, wp_ref, w1_ref, w2_ref,
                out_ref):
    """Whole GPT stack for one batch element (grid=(B,), layers unrolled)."""
    _, T, C = x_ref.shape
    hd = C // n_head
    Cm = w1_ref.shape[-1]

    # token + positional embedding (embd dropout is identity in eval)
    x = x_ref[0].astype(jnp.float32) + pos_ref[0]

    for l in range(n_layer):              # n_layer is a trace-time constant
        vec = pvec_ref[l]                 # (8, W) f32: coalesced per-layer vectors
        ln1g, ln1b = vec[0:1, :C], vec[1:2, :C]
        ln2g, ln2b = vec[2:3, :C], vec[3:4, :C]
        bqkv = vec[4:5, :3 * C]
        bp = vec[5:6, :C]
        b1 = vec[6:7, :Cm]
        b2 = vec[7:8, :C]

        # ---- attention sub-block: x = x + proj(MHSA(ln1(x))) ----
        h = _layernorm(x, ln1g, ln1b)                                  # (T, C)
        # single fused 2-D QKV matmul; 1/sqrt(hd) pre-folded into Q columns
        qkv = jnp.dot(h.astype(jnp.bfloat16), wqkv_ref[l],
                      preferred_element_type=jnp.float32) + bqkv       # (T, 3C)

        # per-head attention core (hd=8 contractions are inherently per-head);
        # 2-D lane slices / dots only -> robust Mosaic lowering.
        y_heads = []
        for hi in range(n_head):
            q_h = qkv[:, hi * hd:(hi + 1) * hd].astype(jnp.bfloat16)           # (T, hd)
            k_h = qkv[:, C + hi * hd:C + (hi + 1) * hd].astype(jnp.bfloat16)
            v_h = qkv[:, 2 * C + hi * hd:2 * C + (hi + 1) * hd].astype(jnp.bfloat16)
            s = jnp.einsum('td,sd->ts', q_h, k_h,
                           preferred_element_type=jnp.float32)                 # (T, T)
            s = s - jnp.max(s, axis=-1, keepdims=True)
            p = jnp.exp(s)
            p = p * pl.reciprocal(jnp.sum(p, axis=-1, keepdims=True), approx=True)
            y_heads.append(jnp.dot(p.astype(jnp.bfloat16), v_h,
                                   preferred_element_type=jnp.float32))        # (T, hd)
        y = jnp.concatenate(y_heads, axis=-1)                          # (T, C) = concat(heads)
        # single output projection matmul (== concat(heads) @ Wp + bp)
        y = jnp.dot(y.astype(jnp.bfloat16), wp_ref[l],
                    preferred_element_type=jnp.float32) + bp
        x = x + y

        # ---- MLP sub-block: x = x + W2 relu(W1 ln2(x) + b1) + b2 ----
        h2 = _layernorm(x, ln2g, ln2b)
        m = jnp.dot(h2.astype(jnp.bfloat16), w1_ref[l],
                    preferred_element_type=jnp.float32) + b1
        m = jnp.maximum(m, 0.0)
        m = jnp.dot(m.astype(jnp.bfloat16), w2_ref[l],
                    preferred_element_type=jnp.float32) + b2
        x = x + m

    # final LayerNorm (its gamma/beta are packed at slot n_layer of pvec)
    fvec = pvec_ref[n_layer]
    out_ref[0] = _layernorm(x, fvec[0:1, :C], fvec[1:2, :C]).astype(out_ref.dtype)


# -----------------------------------------------------------------------------
# pallas_call wrapper
# -----------------------------------------------------------------------------
def run_gpt(x_tokens, params, *, n_head):
    """x_tokens: (B, T, C) f32 -> (B, T, C) f32 (all layers + final LN fused)."""
    B, T, C = x_tokens.shape
    n_layer = params["wqkv"].shape[0]
    assert C % n_head == 0

    def full_spec(arr):
        nd = arr.ndim
        return pl.BlockSpec(arr.shape, lambda b, _nd=nd: (0,) * _nd)

    in_specs = [
        pl.BlockSpec((1, T, C), lambda b: (b, 0, 0)),   # tokens (per-batch block)
        full_spec(params["pos_emb"]),                   # (1, T, C) f32
        full_spec(params["pvec"]),                      # (L+1, 8, W) f32
        full_spec(params["wqkv"]),                      # (L, C, 3C) bf16
        full_spec(params["wp"]),                        # (L, C, C)  bf16
        full_spec(params["w1"]),                        # (L, C, Cm) bf16
        full_spec(params["w2"]),                        # (L, Cm, C) bf16
    ]

    return pl.pallas_call(
        functools.partial(_gpt_kernel, n_head, n_layer),
        out_shape=jax.ShapeDtypeStruct((B, T, C), x_tokens.dtype),
        grid=(B,),
        in_specs=in_specs,
        out_specs=pl.BlockSpec((1, T, C), lambda b: (b, 0, 0)),
        compiler_params=pltpu.CompilerParams(
            dimension_semantics=("parallel",),
            vmem_limit_bytes=32 * 1024 * 1024),
    )(x_tokens, params["pos_emb"], params["pvec"],
      params["wqkv"], params["wp"], params["w1"], params["w2"])


# -----------------------------------------------------------------------------
# Parameters (matches GPT._init_weights: Linear ~ N(0, 0.02), bias 0,
# LayerNorm weight 1 / bias 0, pos_emb zeros).  f32 master copies are kept for
# the validation reference; the kernel uses bf16 packed weights plus one
# coalesced per-layer vector array.
# -----------------------------------------------------------------------------
def init_params(key, n_embd, n_head, block_exp, n_layer, total_tokens):
    C = n_embd
    Cm = block_exp * C
    hd = C // n_head
    scale = 1.0 / math.sqrt(hd)

    k1, k2, k3, k4, k5, k6 = jax.random.split(key, 6)
    wq = 0.02 * jax.random.normal(k1, (n_layer, C, C), jnp.float32)
    wk = 0.02 * jax.random.normal(k2, (n_layer, C, C), jnp.float32)
    wv = 0.02 * jax.random.normal(k3, (n_layer, C, C), jnp.float32)
    wp = 0.02 * jax.random.normal(k4, (n_layer, C, C), jnp.float32)
    w1 = 0.02 * jax.random.normal(k5, (n_layer, C, Cm), jnp.float32)
    w2 = 0.02 * jax.random.normal(k6, (n_layer, Cm, C), jnp.float32)

    # fused QKV weight (L, C, 3C); attention scale folded into the Q columns
    wqkv = jnp.concatenate([wq * scale, wk, wv], axis=-1).astype(jnp.bfloat16)

    # all small per-layer vectors coalesced into one (L+1, 8, W) f32 array:
    #   rows: 0 ln1_g | 1 ln1_b | 2 ln2_g | 3 ln2_b | 4 bqkv | 5 bp | 6 b1 | 7 b2
    #   slot n_layer holds the final-LN gamma (row 0) / beta (row 1).
    W = max(3 * C, Cm, C)
    W = ((W + 127) // 128) * 128
    pvec = jnp.zeros((n_layer + 1, 8, W), jnp.float32)
    pvec = pvec.at[:n_layer, 0, :C].set(1.0)      # ln1 gamma = 1
    pvec = pvec.at[:n_layer, 2, :C].set(1.0)      # ln2 gamma = 1
    pvec = pvec.at[n_layer, 0, :C].set(1.0)       # ln_f gamma = 1
    # Linear biases init to zero; if ever nonzero, the q-part of bqkv (row 4,
    # lanes [0:C]) must also be scaled by 1/sqrt(hd).

    return {
        "pos_emb": jnp.zeros((1, total_tokens, C), jnp.float32),
        "pvec": pvec,
        "wqkv": wqkv,
        "wp": wp.astype(jnp.bfloat16),
        "w1": w1.astype(jnp.bfloat16),
        "w2": w2.astype(jnp.bfloat16),
        # unmodified f32 masters for the pure-JAX validation reference
        "master": {"wq": wq, "wk": wk, "wv": wv, "wp": wp, "w1": w1, "w2": w2},
    }


# -----------------------------------------------------------------------------
# NCHW <-> token glue (pure layout, matches the reference permutes/views)
# -----------------------------------------------------------------------------
def tokens_from_inputs(cxr_tensor, enh_tensor, *, n_embd, n_views, seq_len):
    bz = cxr_tensor.shape[0]
    h, w = cxr_tensor.shape[2], cxr_tensor.shape[3]
    image_tensor = cxr_tensor.reshape(bz, n_views * seq_len, -1, h, w)
    lidar_tensor = enh_tensor.reshape(bz, seq_len, -1, h, w)
    tok = jnp.concatenate([image_tensor, lidar_tensor], axis=1)   # (B, S, C, h, w)
    tok = jnp.transpose(tok, (0, 1, 3, 4, 2))                     # (B, S, h, w, C)
    return tok.reshape(bz, -1, n_embd)                            # (B, T, C)


def tokens_to_outputs(x, *, bz, n_embd, n_views, seq_len,
                      vert_anchors, horz_anchors, h, w):
    x = x.reshape(bz, (n_views + 1) * seq_len, vert_anchors, horz_anchors, n_embd)
    x = jnp.transpose(x, (0, 1, 4, 2, 3))                         # (B, S, C, h, w)
    image_out = x[:, :n_views * seq_len].reshape(bz * n_views * seq_len, -1, h, w)
    lidar_out = x[:, n_views * seq_len:].reshape(bz * seq_len, -1, h, w)
    return image_out, lidar_out


def gpt_forward(cxr_tensor, enh_tensor, params, *,
                n_embd, n_head, seq_len, n_views, vert_anchors, horz_anchors):
    bz = cxr_tensor.shape[0]
    h, w = cxr_tensor.shape[2], cxr_tensor.shape[3]
    tok = tokens_from_inputs(cxr_tensor, enh_tensor,
                             n_embd=n_embd, n_views=n_views, seq_len=seq_len)
    x = run_gpt(tok, params, n_head=n_head)
    return tokens_to_outputs(x, bz=bz, n_embd=n_embd, n_views=n_views,
                             seq_len=seq_len, vert_anchors=vert_anchors,
                             horz_anchors=horz_anchors, h=h, w=w)


# -----------------------------------------------------------------------------
# Pure-JAX reference: UNMODIFIED f32 weights, standard PyTorch-style layout /
# math (catches packing and layout bugs in the kernel path).
# -----------------------------------------------------------------------------
def gpt_reference(x_tokens, params, *, n_head):
    m = params["master"]
    L = m["wq"].shape[0]
    B, T, C = x_tokens.shape
    hd = C // n_head

    def ln(v, eps=1e-6):      # LayerNorm gamma=1, beta=0 (per _init_weights)
        mu = v.mean(-1, keepdims=True)
        var = ((v - mu) ** 2).mean(-1, keepdims=True)
        return (v - mu) / jnp.sqrt(var + eps)

    x = x_tokens + params["pos_emb"]
    for l in range(L):
        h = ln(x)
        q = (h @ m["wq"][l]).reshape(B, T, n_head, hd).transpose(0, 2, 1, 3)
        k = (h @ m["wk"][l]).reshape(B, T, n_head, hd).transpose(0, 2, 1, 3)
        v = (h @ m["wv"][l]).reshape(B, T, n_head, hd).transpose(0, 2, 1, 3)
        att = (q @ jnp.swapaxes(k, -2, -1)) * (1.0 / math.sqrt(hd))
        att = jax.nn.softmax(att, axis=-1)
        y = (att @ v).transpose(0, 2, 1, 3).reshape(B, T, C)
        x = x + y @ m["wp"][l]
        h2 = ln(x)
        x = x + jnp.maximum(h2 @ m["w1"][l], 0.0) @ m["w2"][l]
    return ln(x)


# -----------------------------------------------------------------------------
if __name__ == "__main__":
    n_embd = 32
    n_head = 4
    block_exp = 4
    n_layer = 2
    vert_anchors = 4
    horz_anchors = 4
    seq_len = 1
    n_views = 1            # config.n_views
    bz = 2
    h, w = vert_anchors, horz_anchors
    total_tokens = (n_views + 1) * seq_len * vert_anchors * horz_anchors  # 32

    key = jax.random.PRNGKey(0)
    k_cxr, k_enh, k_par = jax.random.split(key, 3)

    # cxr: (bz, n_views*seq_len*C, H, W), enh: (bz, seq_len*C, H, W)
    cxr = jax.random.normal(k_cxr, (bz, n_views * seq_len * n_embd, h, w), jnp.float32)
    enh = jax.random.normal(k_enh, (bz, seq_len * n_embd, h, w), jnp.float32)

    params = init_params(k_par, n_embd, n_head, block_exp, n_layer, total_tokens)

    # run the fused Pallas kernel
    tok = tokens_from_inputs(cxr, enh, n_embd=n_embd, n_views=n_views, seq_len=seq_len)
    x_out = run_gpt(tok, params, n_head=n_head)
    jax.block_until_ready(x_out)

    # validate against the unmodified f32 reference (tolerance covers bf16
    # matmul operands + approx softmax reciprocal; expected err ~1e-3)
    x_ref = gpt_reference(tok, params, n_head=n_head)
    max_err = float(jnp.max(jnp.abs(x_out - x_ref)))
    assert max_err < 5e-2, f"kernel vs reference max abs err {max_err}"

    image_out, lidar_out = tokens_to_outputs(
        x_out, bz=bz, n_embd=n_embd, n_views=n_views, seq_len=seq_len,
        vert_anchors=vert_anchors, horz_anchors=horz_anchors, h=h, w=w)
    jax.block_until_ready((image_out, lidar_out))

    assert image_out.shape == (bz * n_views * seq_len, n_embd, h, w)
    assert lidar_out.shape == (bz * seq_len, n_embd, h, w)
    print("KERNEL_OK")
</pallas_src>

<mosaic_0001>
module attributes {stable_mosaic.version = 11 : i64} {
  func.func @_gpt_kernel(%arg0: i32, %arg1: memref<1x32x32xf32, #tpu.memory_space<vmem>>, %arg2: memref<1x32x32xf32, #tpu.memory_space<vmem>>, %arg3: memref<3x8x128xf32, #tpu.memory_space<vmem>>, %arg4: memref<2x32x96xbf16, #tpu.memory_space<vmem>>, %arg5: memref<2x32x32xbf16, #tpu.memory_space<vmem>>, %arg6: memref<2x32x128xbf16, #tpu.memory_space<vmem>>, %arg7: memref<2x128x32xbf16, #tpu.memory_space<vmem>>, %arg8: memref<1x32x32xf32, #tpu.memory_space<vmem>>) attributes {dimension_semantics = [#tpu.dimension_semantics<parallel>], iteration_bounds = array<i64: 2>, scalar_prefetch = 0 : i64, scratch_operands = 0 : i64, tpu.core_type = #tpu.core_type<tc>, window_params = [{transform_indices = @transform_0, window_bounds = array<i64: 1, 32, 32>}, {pipeline_mode = #tpu.pipeline_mode<synchronous>, transform_indices = @transform_1, window_bounds = array<i64: 1, 32, 32>}, {pipeline_mode = #tpu.pipeline_mode<synchronous>, transform_indices = @transform_2, window_bounds = array<i64: 3, 8, 128>}, {pipeline_mode = #tpu.pipeline_mode<synchronous>, transform_indices = @transform_3, window_bounds = array<i64: 2, 32, 96>}, {pipeline_mode = #tpu.pipeline_mode<synchronous>, transform_indices = @transform_4, window_bounds = array<i64: 2, 32, 32>}, {pipeline_mode = #tpu.pipeline_mode<synchronous>, transform_indices = @transform_5, window_bounds = array<i64: 2, 32, 128>}, {pipeline_mode = #tpu.pipeline_mode<synchronous>, transform_indices = @transform_6, window_bounds = array<i64: 2, 128, 32>}, {transform_indices = @transform_7, window_bounds = array<i64: 1, 32, 32>}]} {
    %c0 = arith.constant 0 : index
    %c0_0 = arith.constant 0 : index
    %c0_1 = arith.constant 0 : index
    %0 = vector.load %arg1[%c0, %c0_0, %c0_1] : memref<1x32x32xf32, #tpu.memory_space<vmem>>, vector<1x32x32xf32>
    %1 = vector.shape_cast %0 : vector<1x32x32xf32> to vector<32x32xf32>
    %c0_2 = arith.constant 0 : index
    %c0_3 = arith.constant 0 : index
    %c0_4 = arith.constant 0 : index
    %2 = vector.load %arg2[%c0_2, %c0_3, %c0_4] : memref<1x32x32xf32, #tpu.memory_space<vmem>>, vector<1x32x32xf32>
    %3 = vector.shape_cast %2 : vector<1x32x32xf32> to vector<32x32xf32>
    %4 = arith.addf %1, %3 : vector<32x32xf32>
    %c0_5 = arith.constant 0 : index
    %c0_6 = arith.constant 0 : index
    %c0_7 = arith.constant 0 : index
    %5 = vector.load %arg3[%c0_5, %c0_6, %c0_7] : memref<3x8x128xf32, #tpu.memory_space<vmem>>, vector<1x8x128xf32>
    %6 = vector.shape_cast %5 : vector<1x8x128xf32> to vector<8x128xf32>
    %7 = vector.extract_strided_slice %6 {offsets = [0, 0], sizes = [1, 32], strides = [1, 1]} : vector<8x128xf32> to vector<1x32xf32>
    %8 = vector.extract_strided_slice %6 {offsets = [1, 0], sizes = [1, 32], strides = [1, 1]} : vector<8x128xf32> to vector<1x32xf32>
    %9 = vector.extract_strided_slice %6 {offsets = [2, 0], sizes = [1, 32], strides = [1, 1]} : vector<8x128xf32> to vector<1x32xf32>
    %10 = vector.extract_strided_slice %6 {offsets = [3, 0], sizes = [1, 32], strides = [1, 1]} : vector<8x128xf32> to vector<1x32xf32>
    %11 = vector.extract_strided_slice %6 {offsets = [4, 0], sizes = [1, 96], strides = [1, 1]} : vector<8x128xf32> to vector<1x96xf32>
    %12 = vector.extract_strided_slice %6 {offsets = [5, 0], sizes = [1, 32], strides = [1, 1]} : vector<8x128xf32> to vector<1x32xf32>
    %13 = vector.extract_strided_slice %6 {offsets = [6, 0], sizes = [1, 128], strides = [1, 1]} : vector<8x128xf32> to vector<1x128xf32>
    %14 = vector.extract_strided_slice %6 {offsets = [7, 0], sizes = [1, 32], strides = [1, 1]} : vector<8x128xf32> to vector<1x32xf32>
    %cst = arith.constant dense<0.000000e+00> : vector<32xf32>
    %15 = vector.multi_reduction <add>, %4, %cst [1] : vector<32x32xf32> to vector<32xf32>
    %16 = vector.shape_cast %15 : vector<32xf32> to vector<32x1xf32>
    %cst_8 = arith.constant 3.200000e+01 : f32
    %17 = vector.broadcast %cst_8 : f32 to vector<32x1xf32>
    %18 = arith.divf %16, %17 : vector<32x1xf32>
    %19 = vector.broadcast %18 : vector<32x1xf32> to vector<32x32xf32>
    %20 = arith.subf %4, %19 : vector<32x32xf32>
    %21 = arith.mulf %20, %20 : vector<32x32xf32>
    %cst_9 = arith.constant dense<0.000000e+00> : vector<32xf32>
    %22 = vector.multi_reduction <add>, %21, %cst_9 [1] : vector<32x32xf32> to vector<32xf32>
    %23 = vector.shape_cast %22 : vector<32xf32> to vector<32x1xf32>
    %cst_10 = arith.constant 3.200000e+01 : f32
    %24 = vector.broadcast %cst_10 : f32 to vector<32x1xf32>
    %25 = arith.divf %23, %24 : vector<32x1xf32>
    %26 = vector.broadcast %18 : vector<32x1xf32> to vector<32x32xf32>
    %27 = arith.subf %4, %26 : vector<32x32xf32>
    %cst_11 = arith.constant 9.99999997E-7 : f32
    %28 = vector.broadcast %cst_11 : f32 to vector<32x1xf32>
    %29 = arith.addf %25, %28 : vector<32x1xf32>
    %30 = math.rsqrt %29 : vector<32x1xf32>
    %31 = vector.broadcast %30 : vector<32x1xf32> to vector<32x32xf32>
    %32 = arith.mulf %27, %31 : vector<32x32xf32>
    %33 = vector.broadcast %7 : vector<1x32xf32> to vector<32x32xf32>
    %34 = arith.mulf %32, %33 : vector<32x32xf32>
    %35 = vector.broadcast %8 : vector<1x32xf32> to vector<32x32xf32>
    %36 = arith.addf %34, %35 : vector<32x32xf32>
    %37 = arith.truncf %36 : vector<32x32xf32> to vector<32x32xbf16>
    %c0_12 = arith.constant 0 : index
    %c0_13 = arith.constant 0 : index
    %c0_14 = arith.constant 0 : index
    %38 = vector.load %arg4[%c0_12, %c0_13, %c0_14] : memref<2x32x96xbf16, #tpu.memory_space<vmem>>, vector<1x32x96xbf16>
    %39 = vector.shape_cast %38 : vector<1x32x96xbf16> to vector<32x96xbf16>
    %cst_15 = arith.constant dense<0.000000e+00> : vector<32x96xf32>
    %40 = tpu.matmul %37, %39, %cst_15 {dimension_numbers = #tpu.dot_dimension_numbers<[1], [0], [0], [1], [0, 0, 1, 1], [], []>} : vector<32x32xbf16>, vector<32x96xbf16>, vector<32x96xf32> -> vector<32x96xf32>
    %41 = vector.broadcast %11 : vector<1x96xf32> to vector<32x96xf32>
    %42 = arith.addf %40, %41 : vector<32x96xf32>
    %43 = vector.extract_strided_slice %42 {offsets = [0, 0], sizes = [32, 8], strides = [1, 1]} : vector<32x96xf32> to vector<32x8xf32>
    %44 = arith.truncf %43 : vector<32x8xf32> to vector<32x8xbf16>
    %45 = vector.extract_strided_slice %42 {offsets = [0, 32], sizes = [32, 8], strides = [1, 1]} : vector<32x96xf32> to vector<32x8xf32>
    %46 = arith.truncf %45 : vector<32x8xf32> to vector<32x8xbf16>
    %47 = vector.extract_strided_slice %42 {offsets = [0, 64], sizes = [32, 8], strides = [1, 1]} : vector<32x96xf32> to vector<32x8xf32>
    %48 = arith.truncf %47 : vector<32x8xf32> to vector<32x8xbf16>
    "tpu.trace_start"() <{level = 10 : i32, message = "td,sd->ts"}> : () -> ()
    %cst_16 = arith.constant dense<0.000000e+00> : vector<32x32xf32>
    %49 = tpu.matmul %44, %46, %cst_16 {dimension_numbers = #tpu.dot_dimension_numbers<[1], [1], [0], [0], [0, 0, 1, 0], [], []>} : vector<32x8xbf16>, vector<32x8xbf16>, vector<32x32xf32> -> vector<32x32xf32>
    "tpu.trace_stop"() : () -> ()
    %cst_17 = arith.constant dense<0xFF800000> : vector<32xf32>
    %50 = vector.multi_reduction <maximumf>, %49, %cst_17 [1] : vector<32x32xf32> to vector<32xf32>
    %51 = vector.shape_cast %50 : vector<32xf32> to vector<32x1xf32>
    %52 = vector.broadcast %51 : vector<32x1xf32> to vector<32x32xf32>
    %53 = arith.subf %49, %52 : vector<32x32xf32>
    %54 = math.exp %53 : vector<32x32xf32>
    %cst_18 = arith.constant dense<0.000000e+00> : vector<32xf32>
    %55 = vector.multi_reduction <add>, %54, %cst_18 [1] : vector<32x32xf32> to vector<32xf32>
    %56 = vector.shape_cast %55 : vector<32xf32> to vector<32x1xf32>
    %57 = tpu.reciprocal %56 {approx = true} : vector<32x1xf32> -> vector<32x1xf32>
    %58 = vector.broadcast %57 : vector<32x1xf32> to vector<32x32xf32>
    %59 = arith.mulf %54, %58 : vector<32x32xf32>
    %60 = arith.truncf %59 : vector<32x32xf32> to vector<32x32xbf16>
    %cst_19 = arith.constant dense<0.000000e+00> : vector<32x8xf32>
    %61 = tpu.matmul %60, %48, %cst_19 {dimension_numbers = #tpu.dot_dimension_numbers<[1], [0], [0], [1], [0, 0, 1, 1], [], []>} : vector<32x32xbf16>, vector<32x8xbf16>, vector<32x8xf32> -> vector<32x8xf32>
    %62 = vector.extract_strided_slice %42 {offsets = [0, 8], sizes = [32, 8], strides = [1, 1]} : vector<32x96xf32> to vector<32x8xf32>
    %63 = arith.truncf %62 : vector<32x8xf32> to vector<32x8xbf16>
    %64 = vector.extract_strided_slice %42 {offsets = [0, 40], sizes = [32, 8], strides = [1, 1]} : vector<32x96xf32> to vector<32x8xf32>
    %65 = arith.truncf %64 : vector<32x8xf32> to vector<32x8xbf16>
    %66 = vector.extract_strided_slice %42 {offsets = [0, 72], sizes = [32, 8], strides = [1, 1]} : vector<32x96xf32> to vector<32x8xf32>
    %67 = arith.truncf %66 : vector<32x8xf32> to vector<32x8xbf16>
    "tpu.trace_start"() <{level = 10 : i32, message = "td,sd->ts"}> : () -> ()
    %cst_20 = arith.constant dense<0.000000e+00> : vector<32x32xf32>
    %68 = tpu.matmul %63, %65, %cst_20 {dimension_numbers = #tpu.dot_dimension_numbers<[1], [1], [0], [0], [0, 0, 1, 0], [], []>} : vector<32x8xbf16>, vector<32x8xbf16>, vector<32x32xf32> -> vector<32x32xf32>
    "tpu.trace_stop"() : () -> ()
    %cst_21 = arith.constant dense<0xFF800000> : vector<32xf32>
    %69 = vector.multi_reduction <maximumf>, %68, %cst_21 [1] : vector<32x32xf32> to vector<32xf32>
    %70 = vector.shape_cast %69 : vector<32xf32> to vector<32x1xf32>
    %71 = vector.broadcast %70 : vector<32x1xf32> to vector<32x32xf32>
    %72 = arith.subf %68, %71 : vector<32x32xf32>
    %73 = math.exp %72 : vector<32x32xf32>
    %cst_22 = arith.constant dense<0.000000e+00> : vector<32xf32>
    %74 = vector.multi_reduction <add>, %73, %cst_22 [1] : vector<32x32xf32> to vector<32xf32>
    %75 = vector.shape_cast %74 : vector<32xf32> to vector<32x1xf32>
    %76 = tpu.reciprocal %75 {approx = true} : vector<32x1xf32> -> vector<32x1xf32>
    %77 = vector.broadcast %76 : vector<32x1xf32> to vector<32x32xf32>
    %78 = arith.mulf %73, %77 : vector<32x32xf32>
    %79 = arith.truncf %78 : vector<32x32xf32> to vector<32x32xbf16>
    %cst_23 = arith.constant dense<0.000000e+00> : vector<32x8xf32>
    %80 = tpu.matmul %79, %67, %cst_23 {dimension_numbers = #tpu.dot_dimension_numbers<[1], [0], [0], [1], [0, 0, 1, 1], [], []>} : vector<32x32xbf16>, vector<32x8xbf16>, vector<32x8xf32> -> vector<32x8xf32>
    %81 = vector.extract_strided_slice %42 {offsets = [0, 16], sizes = [32, 8], strides = [1, 1]} : vector<32x96xf32> to vector<32x8xf32>
    %82 = arith.truncf %81 : vector<32x8xf32> to vector<32x8xbf16>
    %83 = vector.extract_strided_slice %42 {offsets = [0, 48], sizes = [32, 8], strides = [1, 1]} : vector<32x96xf32> to vector<32x8xf32>
    %84 = arith.truncf %83 : vector<32x8xf32> to vector<32x8xbf16>
    %85 = vector.extract_strided_slice %42 {offsets = [0, 80], sizes = [32, 8], strides = [1, 1]} : vector<32x96xf32> to vector<32x8xf32>
    %86 = arith.truncf %85 : vector<32x8xf32> to vector<32x8xbf16>
    "tpu.trace_start"() <{level = 10 : i32, message = "td,sd->ts"}> : () -> ()
    %cst_24 = arith.constant dense<0.000000e+00> : vector<32x32xf32>
    %87 = tpu.matmul %82, %84, %cst_24 {dimension_numbers = #tpu.dot_dimension_numbers<[1], [1], [0], [0], [0, 0, 1, 0], [], []>} : vector<32x8xbf16>, vector<32x8xbf16>, vector<32x32xf32> -> vector<32x32xf32>
    "tpu.trace_stop"() : () -> ()
    %cst_25 = arith.constant dense<0xFF800000> : vector<32xf32>
    %88 = vector.multi_reduction <maximumf>, %87, %cst_25 [1] : vector<32x32xf32> to vector<32xf32>
    %89 = vector.shape_cast %88 : vector<32xf32> to vector<32x1xf32>
    %90 = vector.broadcast %89 : vector<32x1xf32> to vector<32x32xf32>
    %91 = arith.subf %87, %90 : vector<32x32xf32>
    %92 = math.exp %91 : vector<32x32xf32>
    %cst_26 = arith.constant dense<0.000000e+00> : vector<32xf32>
    %93 = vector.multi_reduction <add>, %92, %cst_26 [1] : vector<32x32xf32> to vector<32xf32>
    %94 = vector.shape_cast %93 : vector<32xf32> to vector<32x1xf32>
    %95 = tpu.reciprocal %94 {approx = true} : vector<32x1xf32> -> vector<32x1xf32>
    %96 = vector.broadcast %95 : vector<32x1xf32> to vector<32x32xf32>
    %97 = arith.mulf %92, %96 : vector<32x32xf32>
    %98 = arith.truncf %97 : vector<32x32xf32> to vector<32x32xbf16>
    %cst_27 = arith.constant dense<0.000000e+00> : vector<32x8xf32>
    %99 = tpu.matmul %98, %86, %cst_27 {dimension_numbers = #tpu.dot_dimension_numbers<[1], [0], [0], [1], [0, 0, 1, 1], [], []>} : vector<32x32xbf16>, vector<32x8xbf16>, vector<32x8xf32> -> vector<32x8xf32>
    %100 = vector.extract_strided_slice %42 {offsets = [0, 24], sizes = [32, 8], strides = [1, 1]} : vector<32x96xf32> to vector<32x8xf32>
    %101 = arith.truncf %100 : vector<32x8xf32> to vector<32x8xbf16>
    %102 = vector.extract_strided_slice %42 {offsets = [0, 56], sizes = [32, 8], strides = [1, 1]} : vector<32x96xf32> to vector<32x8xf32>
    %103 = arith.truncf %102 : vector<32x8xf32> to vector<32x8xbf16>
    %104 = vector.extract_strided_slice %42 {offsets = [0, 88], sizes = [32, 8], strides = [1, 1]} : vector<32x96xf32> to vector<32x8xf32>
    %105 = arith.truncf %104 : vector<32x8xf32> to vector<32x8xbf16>
    "tpu.trace_start"() <{level = 10 : i32, message = "td,sd->ts"}> : () -> ()
    %cst_28 = arith.constant dense<0.000000e+00> : vector<32x32xf32>
    %106 = tpu.matmul %101, %103, %cst_28 {dimension_numbers = #tpu.dot_dimension_numbers<[1], [1], [0], [0], [0, 0, 1, 0], [], []>} : vector<32x8xbf16>, vector<32x8xbf16>, vector<32x32xf32> -> vector<32x32xf32>
    "tpu.trace_stop"() : () -> ()
    %cst_29 = arith.constant dense<0xFF800000> : vector<32xf32>
    %107 = vector.multi_reduction <maximumf>, %106, %cst_29 [1] : vector<32x32xf32> to vector<32xf32>
    %108 = vector.shape_cast %107 : vector<32xf32> to vector<32x1xf32>
    %109 = vector.broadcast %108 : vector<32x1xf32> to vector<32x32xf32>
    %110 = arith.subf %106, %109 : vector<32x32xf32>
    %111 = math.exp %110 : vector<32x32xf32>
    %cst_30 = arith.constant dense<0.000000e+00> : vector<32xf32>
    %112 = vector.multi_reduction <add>, %111, %cst_30 [1] : vector<32x32xf32> to vector<32xf32>
    %113 = vector.shape_cast %112 : vector<32xf32> to vector<32x1xf32>
    %114 = tpu.reciprocal %113 {approx = true} : vector<32x1xf32> -> vector<32x1xf32>
    %115 = vector.broadcast %114 : vector<32x1xf32> to vector<32x32xf32>
    %116 = arith.mulf %111, %115 : vector<32x32xf32>
    %117 = arith.truncf %116 : vector<32x32xf32> to vector<32x32xbf16>
    %cst_31 = arith.constant dense<0.000000e+00> : vector<32x8xf32>
    %118 = tpu.matmul %117, %105, %cst_31 {dimension_numbers = #tpu.dot_dimension_numbers<[1], [0], [0], [1], [0, 0, 1, 1], [], []>} : vector<32x32xbf16>, vector<32x8xbf16>, vector<32x8xf32> -> vector<32x8xf32>
    %119 = tpu.concatenate %61, %80, %99, %118 in 1 : vector<32x8xf32>, vector<32x8xf32>, vector<32x8xf32>, vector<32x8xf32> -> vector<32x32xf32>
    %120 = arith.truncf %119 : vector<32x32xf32> to vector<32x32xbf16>
    %c0_32 = arith.constant 0 : index
    %c0_33 = arith.constant 0 : index
    %c0_34 = arith.constant 0 : index
    %121 = vector.load %arg5[%c0_32, %c0_33, %c0_34] : memref<2x32x32xbf16, #tpu.memory_space<vmem>>, vector<1x32x32xbf16>
    %122 = vector.shape_cast %121 : vector<1x32x32xbf16> to vector<32x32xbf16>
    %cst_35 = arith.constant dense<0.000000e+00> : vector<32x32xf32>
    %123 = tpu.matmul %120, %122, %cst_35 {dimension_numbers = #tpu.dot_dimension_numbers<[1], [0], [0], [1], [0, 0, 1, 1], [], []>} : vector<32x32xbf16>, vector<32x32xbf16>, vector<32x32xf32> -> vector<32x32xf32>
    %124 = vector.broadcast %12 : vector<1x32xf32> to vector<32x32xf32>
    %125 = arith.addf %123, %124 : vector<32x32xf32>
    %126 = arith.addf %4, %125 : vector<32x32xf32>
    %cst_36 = arith.constant dense<0.000000e+00> : vector<32xf32>
    %127 = vector.multi_reduction <add>, %126, %cst_36 [1] : vector<32x32xf32> to vector<32xf32>
    %128 = vector.shape_cast %127 : vector<32xf32> to vector<32x1xf32>
    %cst_37 = arith.constant 3.200000e+01 : f32
    %129 = vector.broadcast %cst_37 : f32 to vector<32x1xf32>
    %130 = arith.divf %128, %129 : vector<32x1xf32>
    %131 = vector.broadcast %130 : vector<32x1xf32> to vector<32x32xf32>
    %132 = arith.subf %126, %131 : vector<32x32xf32>
    %133 = arith.mulf %132, %132 : vector<32x32xf32>
    %cst_38 = arith.constant dense<0.000000e+00> : vector<32xf32>
    %134 = vector.multi_reduction <add>, %133, %cst_38 [1] : vector<32x32xf32> to vector<32xf32>
    %135 = vector.shape_cast %134 : vector<32xf32> to vector<32x1xf32>
    %cst_39 = arith.constant 3.200000e+01 : f32
    %136 = vector.broadcast %cst_39 : f32 to vector<32x1xf32>
    %137 = arith.divf %135, %136 : vector<32x1xf32>
    %138 = vector.broadcast %130 : vector<32x1xf32> to vector<32x32xf32>
    %139 = arith.subf %126, %138 : vector<32x32xf32>
    %cst_40 = arith.constant 9.99999997E-7 : f32
    %140 = vector.broadcast %cst_40 : f32 to vector<32x1xf32>
    %141 = arith.addf %137, %140 : vector<32x1xf32>
    %142 = math.rsqrt %141 : vector<32x1xf32>
    %143 = vector.broadcast %142 : vector<32x1xf32> to vector<32x32xf32>
    %144 = arith.mulf %139, %143 : vector<32x32xf32>
    %145 = vector.broadcast %9 : vector<1x32xf32> to vector<32x32xf32>
    %146 = arith.mulf %144, %145 : vector<32x32xf32>
    %147 = vector.broadcast %10 : vector<1x32xf32> to vector<32x32xf32>
    %148 = arith.addf %146, %147 : vector<32x32xf32>
    %149 = arith.truncf %148 : vector<32x32xf32> to vector<32x32xbf16>
    %c0_41 = arith.constant 0 : index
    %c0_42 = arith.constant 0 : index
    %c0_43 = arith.constant 0 : index
    %150 = vector.load %arg6[%c0_41, %c0_42, %c0_43] : memref<2x32x128xbf16, #tpu.memory_space<vmem>>, vector<1x32x128xbf16>
    %151 = vector.shape_cast %150 : vector<1x32x128xbf16> to vector<32x128xbf16>
    %cst_44 = arith.constant dense<0.000000e+00> : vector<32x128xf32>
    %152 = tpu.matmul %149, %151, %cst_44 {dimension_numbers = #tpu.dot_dimension_numbers<[1], [0], [0], [1], [0, 0, 1, 1], [], []>} : vector<32x32xbf16>, vector<32x128xbf16>, vector<32x128xf32> -> vector<32x128xf32>
    %153 = vector.broadcast %13 : vector<1x128xf32> to vector<32x128xf32>
    %154 = arith.addf %152, %153 : vector<32x128xf32>
    %cst_45 = arith.constant 0.000000e+00 : f32
    %155 = vector.broadcast %cst_45 : f32 to vector<32x128xf32>
    %156 = arith.maximumf %154, %155 : vector<32x128xf32>
    %157 = arith.truncf %156 : vector<32x128xf32> to vector<32x128xbf16>
    %c0_46 = arith.constant 0 : index
    %c0_47 = arith.constant 0 : index
    %c0_48 = arith.constant 0 : index
    %158 = vector.load %arg7[%c0_46, %c0_47, %c0_48] : memref<2x128x32xbf16, #tpu.memory_space<vmem>>, vector<1x128x32xbf16>
    %159 = vector.shape_cast %158 : vector<1x128x32xbf16> to vector<128x32xbf16>
    %cst_49 = arith.constant dense<0.000000e+00> : vector<32x32xf32>
    %160 = tpu.matmul %157, %159, %cst_49 {dimension_numbers = #tpu.dot_dimension_numbers<[1], [0], [0], [1], [0, 0, 1, 1], [], []>} : vector<32x128xbf16>, vector<128x32xbf16>, vector<32x32xf32> -> vector<32x32xf32>
    %161 = vector.broadcast %14 : vector<1x32xf32> to vector<32x32xf32>
    %162 = arith.addf %160, %161 : vector<32x32xf32>
    %163 = arith.addf %126, %162 : vector<32x32xf32>
    %c1 = arith.constant 1 : index
    %c0_50 = arith.constant 0 : index
    %c0_51 = arith.constant 0 : index
    %164 = vector.load %arg3[%c1, %c0_50, %c0_51] : memref<3x8x128xf32, #tpu.memory_space<vmem>>, vector<1x8x128xf32>
    %165 = vector.shape_cast %164 : vector<1x8x128xf32> to vector<8x128xf32>
    %166 = vector.extract_strided_slice %165 {offsets = [0, 0], sizes = [1, 32], strides = [1, 1]} : vector<8x128xf32> to vector<1x32xf32>
    %167 = vector.extract_strided_slice %165 {offsets = [1, 0], sizes = [1, 32], strides = [1, 1]} : vector<8x128xf32> to vector<1x32xf32>
    %168 = vector.extract_strided_slice %165 {offsets = [2, 0], sizes = [1, 32], strides = [1, 1]} : vector<8x128xf32> to vector<1x32xf32>
    %169 = vector.extract_strided_slice %165 {offsets = [3, 0], sizes = [1, 32], strides = [1, 1]} : vector<8x128xf32> to vector<1x32xf32>
    %170 = vector.extract_strided_slice %165 {offsets = [4, 0], sizes = [1, 96], strides = [1, 1]} : vector<8x128xf32> to vector<1x96xf32>
    %171 = vector.extract_strided_slice %165 {offsets = [5, 0], sizes = [1, 32], strides = [1, 1]} : vector<8x128xf32> to vector<1x32xf32>
    %172 = vector.extract_strided_slice %165 {offsets = [6, 0], sizes = [1, 128], strides = [1, 1]} : vector<8x128xf32> to vector<1x128xf32>
    %173 = vector.extract_strided_slice %165 {offsets = [7, 0], sizes = [1, 32], strides = [1, 1]} : vector<8x128xf32> to vector<1x32xf32>
    %cst_52 = arith.constant dense<0.000000e+00> : vector<32xf32>
    %174 = vector.multi_reduction <add>, %163, %cst_52 [1] : vector<32x32xf32> to vector<32xf32>
    %175 = vector.shape_cast %174 : vector<32xf32> to vector<32x1xf32>
    %cst_53 = arith.constant 3.200000e+01 : f32
    %176 = vector.broadcast %cst_53 : f32 to vector<32x1xf32>
    %177 = arith.divf %175, %176 : vector<32x1xf32>
    %178 = vector.broadcast %177 : vector<32x1xf32> to vector<32x32xf32>
    %179 = arith.subf %163, %178 : vector<32x32xf32>
    %180 = arith.mulf %179, %179 : vector<32x32xf32>
    %cst_54 = arith.constant dense<0.000000e+00> : vector<32xf32>
    %181 = vector.multi_reduction <add>, %180, %cst_54 [1] : vector<32x32xf32> to vector<32xf32>
    %182 = vector.shape_cast %181 : vector<32xf32> to vector<32x1xf32>
    %cst_55 = arith.constant 3.200000e+01 : f32
    %183 = vector.broadcast %cst_55 : f32 to vector<32x1xf32>
    %184 = arith.divf %182, %183 : vector<32x1xf32>
    %185 = vector.broadcast %177 : vector<32x1xf32> to vector<32x32xf32>
    %186 = arith.subf %163, %185 : vector<32x32xf32>
    %cst_56 = arith.constant 9.99999997E-7 : f32
    %187 = vector.broadcast %cst_56 : f32 to vector<32x1xf32>
    %188 = arith.addf %184, %187 : vector<32x1xf32>
    %189 = math.rsqrt %188 : vector<32x1xf32>
    %190 = vector.broadcast %189 : vector<32x1xf32> to vector<32x32xf32>
    %191 = arith.mulf %186, %190 : vector<32x32xf32>
    %192 = vector.broadcast %166 : vector<1x32xf32> to vector<32x32xf32>
    %193 = arith.mulf %191, %192 : vector<32x32xf32>
    %194 = vector.broadcast %167 : vector<1x32xf32> to vector<32x32xf32>
    %195 = arith.addf %193, %194 : vector<32x32xf32>
    %196 = arith.truncf %195 : vector<32x32xf32> to vector<32x32xbf16>
    %c1_57 = arith.constant 1 : index
    %c0_58 = arith.constant 0 : index
    %c0_59 = arith.constant 0 : index
    %197 = vector.load %arg4[%c1_57, %c0_58, %c0_59] : memref<2x32x96xbf16, #tpu.memory_space<vmem>>, vector<1x32x96xbf16>
    %198 = vector.shape_cast %197 : vector<1x32x96xbf16> to vector<32x96xbf16>
    %cst_60 = arith.constant dense<0.000000e+00> : vector<32x96xf32>
    %199 = tpu.matmul %196, %198, %cst_60 {dimension_numbers = #tpu.dot_dimension_numbers<[1], [0], [0], [1], [0, 0, 1, 1], [], []>} : vector<32x32xbf16>, vector<32x96xbf16>, vector<32x96xf32> -> vector<32x96xf32>
    %200 = vector.broadcast %170 : vector<1x96xf32> to vector<32x96xf32>
    %201 = arith.addf %199, %200 : vector<32x96xf32>
    %202 = vector.extract_strided_slice %201 {offsets = [0, 0], sizes = [32, 8], strides = [1, 1]} : vector<32x96xf32> to vector<32x8xf32>
    %203 = arith.truncf %202 : vector<32x8xf32> to vector<32x8xbf16>
    %204 = vector.extract_strided_slice %201 {offsets = [0, 32], sizes = [32, 8], strides = [1, 1]} : vector<32x96xf32> to vector<32x8xf32>
    %205 = arith.truncf %204 : vector<32x8xf32> to vector<32x8xbf16>
    %206 = vector.extract_strided_slice %201 {offsets = [0, 64], sizes = [32, 8], strides = [1, 1]} : vector<32x96xf32> to vector<32x8xf32>
    %207 = arith.truncf %206 : vector<32x8xf32> to vector<32x8xbf16>
    "tpu.trace_start"() <{level = 10 : i32, message = "td,sd->ts"}> : () -> ()
    %cst_61 = arith.constant dense<0.000000e+00> : vector<32x32xf32>
    %208 = tpu.matmul %203, %205, %cst_61 {dimension_numbers = #tpu.dot_dimension_numbers<[1], [1], [0], [0], [0, 0, 1, 0], [], []>} : vector<32x8xbf16>, vector<32x8xbf16>, vector<32x32xf32> -> vector<32x32xf32>
    "tpu.trace_stop"() : () -> ()
    %cst_62 = arith.constant dense<0xFF800000> : vector<32xf32>
    %209 = vector.multi_reduction <maximumf>, %208, %cst_62 [1] : vector<32x32xf32> to vector<32xf32>
    %210 = vector.shape_cast %209 : vector<32xf32> to vector<32x1xf32>
    %211 = vector.broadcast %210 : vector<32x1xf32> to vector<32x32xf32>
    %212 = arith.subf %208, %211 : vector<32x32xf32>
    %213 = math.exp %212 : vector<32x32xf32>
    %cst_63 = arith.constant dense<0.000000e+00> : vector<32xf32>
    %214 = vector.multi_reduction <add>, %213, %cst_63 [1] : vector<32x32xf32> to vector<32xf32>
    %215 = vector.shape_cast %214 : vector<32xf32> to vector<32x1xf32>
    %216 = tpu.reciprocal %215 {approx = true} : vector<32x1xf32> -> vector<32x1xf32>
    %217 = vector.broadcast %216 : vector<32x1xf32> to vector<32x32xf32>
    %218 = arith.mulf %213, %217 : vector<32x32xf32>
    %219 = arith.truncf %218 : vector<32x32xf32> to vector<32x32xbf16>
    %cst_64 = arith.constant dense<0.000000e+00> : vector<32x8xf32>
    %220 = tpu.matmul %219, %207, %cst_64 {dimension_numbers = #tpu.dot_dimension_numbers<[1], [0], [0], [1], [0, 0, 1, 1], [], []>} : vector<32x32xbf16>, vector<32x8xbf16>, vector<32x8xf32> -> vector<32x8xf32>
    %221 = vector.extract_strided_slice %201 {offsets = [0, 8], sizes = [32, 8], strides = [1, 1]} : vector<32x96xf32> to vector<32x8xf32>
    %222 = arith.truncf %221 : vector<32x8xf32> to vector<32x8xbf16>
    %223 = vector.extract_strided_slice %201 {offsets = [0, 40], sizes = [32, 8], strides = [1, 1]} : vector<32x96xf32> to vector<32x8xf32>
    %224 = arith.truncf %223 : vector<32x8xf32> to vector<32x8xbf16>
    %225 = vector.extract_strided_slice %201 {offsets = [0, 72], sizes = [32, 8], strides = [1, 1]} : vector<32x96xf32> to vector<32x8xf32>
    %226 = arith.truncf %225 : vector<32x8xf32> to vector<32x8xbf16>
    "tpu.trace_start"() <{level = 10 : i32, message = "td,sd->ts"}> : () -> ()
    %cst_65 = arith.constant dense<0.000000e+00> : vector<32x32xf32>
    %227 = tpu.matmul %222, %224, %cst_65 {dimension_numbers = #tpu.dot_dimension_numbers<[1], [1], [0], [0], [0, 0, 1, 0], [], []>} : vector<32x8xbf16>, vector<32x8xbf16>, vector<32x32xf32> -> vector<32x32xf32>
    "tpu.trace_stop"() : () -> ()
    %cst_66 = arith.constant dense<0xFF800000> : vector<32xf32>
    %228 = vector.multi_reduction <maximumf>, %227, %cst_66 [1] : vector<32x32xf32> to vector<32xf32>
    %229 = vector.shape_cast %228 : vector<32xf32> to vector<32x1xf32>
    %230 = vector.broadcast %229 : vector<32x1xf32> to vector<32x32xf32>
    %231 = arith.subf %227, %230 : vector<32x32xf32>
    %232 = math.exp %231 : vector<32x32xf32>
    %cst_67 = arith.constant dense<0.000000e+00> : vector<32xf32>
    %233 = vector.multi_reduction <add>, %232, %cst_67 [1] : vector<32x32xf32> to vector<32xf32>
    %234 = vector.shape_cast %233 : vector<32xf32> to vector<32x1xf32>
    %235 = tpu.reciprocal %234 {approx = true} : vector<32x1xf32> -> vector<32x1xf32>
    %236 = vector.broadcast %235 : vector<32x1xf32> to vector<32x32xf32>
    %237 = arith.mulf %232, %236 : vector<32x32xf32>
    %238 = arith.truncf %237 : vector<32x32xf32> to vector<32x32xbf16>
    %cst_68 = arith.constant dense<0.000000e+00> : vector<32x8xf32>
    %239 = tpu.matmul %238, %226, %cst_68 {dimension_numbers = #tpu.dot_dimension_numbers<[1], [0], [0], [1], [0, 0, 1, 1], [], []>} : vector<32x32xbf16>, vector<32x8xbf16>, vector<32x8xf32> -> vector<32x8xf32>
    %240 = vector.extract_strided_slice %201 {offsets = [0, 16], sizes = [32, 8], strides = [1, 1]} : vector<32x96xf32> to vector<32x8xf32>
    %241 = arith.truncf %240 : vector<32x8xf32> to vector<32x8xbf16>
    %242 = vector.extract_strided_slice %201 {offsets = [0, 48], sizes = [32, 8], strides = [1, 1]} : vector<32x96xf32> to vector<32x8xf32>
    %243 = arith.truncf %242 : vector<32x8xf32> to vector<32x8xbf16>
    %244 = vector.extract_strided_slice %201 {offsets = [0, 80], sizes = [32, 8], strides = [1, 1]} : vector<32x96xf32> to vector<32x8xf32>
    %245 = arith.truncf %244 : vector<32x8xf32> to vector<32x8xbf16>
    "tpu.trace_start"() <{level = 10 : i32, message = "td,sd->ts"}> : () -> ()
    %cst_69 = arith.constant dense<0.000000e+00> : vector<32x32xf32>
    %246 = tpu.matmul %241, %243, %cst_69 {dimension_numbers = #tpu.dot_dimension_numbers<[1], [1], [0], [0], [0, 0, 1, 0], [], []>} : vector<32x8xbf16>, vector<32x8xbf16>, vector<32x32xf32> -> vector<32x32xf32>
    "tpu.trace_stop"() : () -> ()
    %cst_70 = arith.constant dense<0xFF800000> : vector<32xf32>
    %247 = vector.multi_reduction <maximumf>, %246, %cst_70 [1] : vector<32x32xf32> to vector<32xf32>
    %248 = vector.shape_cast %247 : vector<32xf32> to vector<32x1xf32>
    %249 = vector.broadcast %248 : vector<32x1xf32> to vector<32x32xf32>
    %250 = arith.subf %246, %249 : vector<32x32xf32>
    %251 = math.exp %250 : vector<32x32xf32>
    %cst_71 = arith.constant dense<0.000000e+00> : vector<32xf32>
    %252 = vector.multi_reduction <add>, %251, %cst_71 [1] : vector<32x32xf32> to vector<32xf32>
    %253 = vector.shape_cast %252 : vector<32xf32> to vector<32x1xf32>
    %254 = tpu.reciprocal %253 {approx = true} : vector<32x1xf32> -> vector<32x1xf32>
    %255 = vector.broadcast %254 : vector<32x1xf32> to vector<32x32xf32>
    %256 = arith.mulf %251, %255 : vector<32x32xf32>
    %257 = arith.truncf %256 : vector<32x32xf32> to vector<32x32xbf16>
    %cst_72 = arith.constant dense<0.000000e+00> : vector<32x8xf32>
    %258 = tpu.matmul %257, %245, %cst_72 {dimension_numbers = #tpu.dot_dimension_numbers<[1], [0], [0], [1], [0, 0, 1, 1], [], []>} : vector<32x32xbf16>, vector<32x8xbf16>, vector<32x8xf32> -> vector<32x8xf32>
    %259 = vector.extract_strided_slice %201 {offsets = [0, 24], sizes = [32, 8], strides = [1, 1]} : vector<32x96xf32> to vector<32x8xf32>
    %260 = arith.truncf %259 : vector<32x8xf32> to vector<32x8xbf16>
    %261 = vector.extract_strided_slice %201 {offsets = [0, 56], sizes = [32, 8], strides = [1, 1]} : vector<32x96xf32> to vector<32x8xf32>
    %262 = arith.truncf %261 : vector<32x8xf32> to vector<32x8xbf16>
    %263 = vector.extract_strided_slice %201 {offsets = [0, 88], sizes = [32, 8], strides = [1, 1]} : vector<32x96xf32> to vector<32x8xf32>
    %264 = arith.truncf %263 : vector<32x8xf32> to vector<32x8xbf16>
    "tpu.trace_start"() <{level = 10 : i32, message = "td,sd->ts"}> : () -> ()
    %cst_73 = arith.constant dense<0.000000e+00> : vector<32x32xf32>
    %265 = tpu.matmul %260, %262, %cst_73 {dimension_numbers = #tpu.dot_dimension_numbers<[1], [1], [0], [0], [0, 0, 1, 0], [], []>} : vector<32x8xbf16>, vector<32x8xbf16>, vector<32x32xf32> -> vector<32x32xf32>
    "tpu.trace_stop"() : () -> ()
    %cst_74 = arith.constant dense<0xFF800000> : vector<32xf32>
    %266 = vector.multi_reduction <maximumf>, %265, %cst_74 [1] : vector<32x32xf32> to vector<32xf32>
    %267 = vector.shape_cast %266 : vector<32xf32> to vector<32x1xf32>
    %268 = vector.broadcast %267 : vector<32x1xf32> to vector<32x32xf32>
    %269 = arith.subf %265, %268 : vector<32x32xf32>
    %270 = math.exp %269 : vector<32x32xf32>
    %cst_75 = arith.constant dense<0.000000e+00> : vector<32xf32>
    %271 = vector.multi_reduction <add>, %270, %cst_75 [1] : vector<32x32xf32> to vector<32xf32>
    %272 = vector.shape_cast %271 : vector<32xf32> to vector<32x1xf32>
    %273 = tpu.reciprocal %272 {approx = true} : vector<32x1xf32> -> vector<32x1xf32>
    %274 = vector.broadcast %273 : vector<32x1xf32> to vector<32x32xf32>
    %275 = arith.mulf %270, %274 : vector<32x32xf32>
    %276 = arith.truncf %275 : vector<32x32xf32> to vector<32x32xbf16>
    %cst_76 = arith.constant dense<0.000000e+00> : vector<32x8xf32>
    %277 = tpu.matmul %276, %264, %cst_76 {dimension_numbers = #tpu.dot_dimension_numbers<[1], [0], [0], [1], [0, 0, 1, 1], [], []>} : vector<32x32xbf16>, vector<32x8xbf16>, vector<32x8xf32> -> vector<32x8xf32>
    %278 = tpu.concatenate %220, %239, %258, %277 in 1 : vector<32x8xf32>, vector<32x8xf32>, vector<32x8xf32>, vector<32x8xf32> -> vector<32x32xf32>
    %279 = arith.truncf %278 : vector<32x32xf32> to vector<32x32xbf16>
    %c1_77 = arith.constant 1 : index
    %c0_78 = arith.constant 0 : index
    %c0_79 = arith.constant 0 : index
    %280 = vector.load %arg5[%c1_77, %c0_78, %c0_79] : memref<2x32x32xbf16, #tpu.memory_space<vmem>>, vector<1x32x32xbf16>
    %281 = vector.shape_cast %280 : vector<1x32x32xbf16> to vector<32x32xbf16>
    %cst_80 = arith.constant dense<0.000000e+00> : vector<32x32xf32>
    %282 = tpu.matmul %279, %281, %cst_80 {dimension_numbers = #tpu.dot_dimension_numbers<[1], [0], [0], [1], [0, 0, 1, 1], [], []>} : vector<32x32xbf16>, vector<32x32xbf16>, vector<32x32xf32> -> vector<32x32xf32>
    %283 = vector.broadcast %171 : vector<1x32xf32> to vector<32x32xf32>
    %284 = arith.addf %282, %283 : vector<32x32xf32>
    %285 = arith.addf %163, %284 : vector<32x32xf32>
    %cst_81 = arith.constant dense<0.000000e+00> : vector<32xf32>
    %286 = vector.multi_reduction <add>, %285, %cst_81 [1] : vector<32x32xf32> to vector<32xf32>
    %287 = vector.shape_cast %286 : vector<32xf32> to vector<32x1xf32>
    %cst_82 = arith.constant 3.200000e+01 : f32
    %288 = vector.broadcast %cst_82 : f32 to vector<32x1xf32>
    %289 = arith.divf %287, %288 : vector<32x1xf32>
    %290 = vector.broadcast %289 : vector<32x1xf32> to vector<32x32xf32>
    %291 = arith.subf %285, %290 : vector<32x32xf32>
    %292 = arith.mulf %291, %291 : vector<32x32xf32>
    %cst_83 = arith.constant dense<0.000000e+00> : vector<32xf32>
    %293 = vector.multi_reduction <add>, %292, %cst_83 [1] : vector<32x32xf32> to vector<32xf32>
    %294 = vector.shape_cast %293 : vector<32xf32> to vector<32x1xf32>
    %cst_84 = arith.constant 3.200000e+01 : f32
    %295 = vector.broadcast %cst_84 : f32 to vector<32x1xf32>
    %296 = arith.divf %294, %295 : vector<32x1xf32>
    %297 = vector.broadcast %289 : vector<32x1xf32> to vector<32x32xf32>
    %298 = arith.subf %285, %297 : vector<32x32xf32>
    %cst_85 = arith.constant 9.99999997E-7 : f32
    %299 = vector.broadcast %cst_85 : f32 to vector<32x1xf32>
    %300 = arith.addf %296, %299 : vector<32x1xf32>
    %301 = math.rsqrt %300 : vector<32x1xf32>
    %302 = vector.broadcast %301 : vector<32x1xf32> to vector<32x32xf32>
    %303 = arith.mulf %298, %302 : vector<32x32xf32>
    %304 = vector.broadcast %168 : vector<1x32xf32> to vector<32x32xf32>
    %305 = arith.mulf %303, %304 : vector<32x32xf32>
    %306 = vector.broadcast %169 : vector<1x32xf32> to vector<32x32xf32>
    %307 = arith.addf %305, %306 : vector<32x32xf32>
    %308 = arith.truncf %307 : vector<32x32xf32> to vector<32x32xbf16>
    %c1_86 = arith.constant 1 : index
    %c0_87 = arith.constant 0 : index
    %c0_88 = arith.constant 0 : index
    %309 = vector.load %arg6[%c1_86, %c0_87, %c0_88] : memref<2x32x128xbf16, #tpu.memory_space<vmem>>, vector<1x32x128xbf16>
    %310 = vector.shape_cast %309 : vector<1x32x128xbf16> to vector<32x128xbf16>
    %cst_89 = arith.constant dense<0.000000e+00> : vector<32x128xf32>
    %311 = tpu.matmul %308, %310, %cst_89 {dimension_numbers = #tpu.dot_dimension_numbers<[1], [0], [0], [1], [0, 0, 1, 1], [], []>} : vector<32x32xbf16>, vector<32x128xbf16>, vector<32x128xf32> -> vector<32x128xf32>
    %312 = vector.broadcast %172 : vector<1x128xf32> to vector<32x128xf32>
    %313 = arith.addf %311, %312 : vector<32x128xf32>
    %cst_90 = arith.constant 0.000000e+00 : f32
    %314 = vector.broadcast %cst_90 : f32 to vector<32x128xf32>
    %315 = arith.maximumf %313, %314 : vector<32x128xf32>
    %316 = arith.truncf %315 : vector<32x128xf32> to vector<32x128xbf16>
    %c1_91 = arith.constant 1 : index
    %c0_92 = arith.constant 0 : index
    %c0_93 = arith.constant 0 : index
    %317 = vector.load %arg7[%c1_91, %c0_92, %c0_93] : memref<2x128x32xbf16, #tpu.memory_space<vmem>>, vector<1x128x32xbf16>
    %318 = vector.shape_cast %317 : vector<1x128x32xbf16> to vector<128x32xbf16>
    %cst_94 = arith.constant dense<0.000000e+00> : vector<32x32xf32>
    %319 = tpu.matmul %316, %318, %cst_94 {dimension_numbers = #tpu.dot_dimension_numbers<[1], [0], [0], [1], [0, 0, 1, 1], [], []>} : vector<32x128xbf16>, vector<128x32xbf16>, vector<32x32xf32> -> vector<32x32xf32>
    %320 = vector.broadcast %173 : vector<1x32xf32> to vector<32x32xf32>
    %321 = arith.addf %319, %320 : vector<32x32xf32>
    %322 = arith.addf %285, %321 : vector<32x32xf32>
    %c2 = arith.constant 2 : index
    %c0_95 = arith.constant 0 : index
    %c0_96 = arith.constant 0 : index
    %323 = vector.load %arg3[%c2, %c0_95, %c0_96] : memref<3x8x128xf32, #tpu.memory_space<vmem>>, vector<1x8x128xf32>
    %324 = vector.shape_cast %323 : vector<1x8x128xf32> to vector<8x128xf32>
    %325 = vector.extract_strided_slice %324 {offsets = [0, 0], sizes = [1, 32], strides = [1, 1]} : vector<8x128xf32> to vector<1x32xf32>
    %326 = vector.extract_strided_slice %324 {offsets = [1, 0], sizes = [1, 32], strides = [1, 1]} : vector<8x128xf32> to vector<1x32xf32>
    %cst_97 = arith.constant dense<0.000000e+00> : vector<32xf32>
    %327 = vector.multi_reduction <add>, %322, %cst_97 [1] : vector<32x32xf32> to vector<32xf32>
    %328 = vector.shape_cast %327 : vector<32xf32> to vector<32x1xf32>
    %cst_98 = arith.constant 3.200000e+01 : f32
    %329 = vector.broadcast %cst_98 : f32 to vector<32x1xf32>
    %330 = arith.divf %328, %329 : vector<32x1xf32>
    %331 = vector.broadcast %330 : vector<32x1xf32> to vector<32x32xf32>
    %332 = arith.subf %322, %331 : vector<32x32xf32>
    %333 = arith.mulf %332, %332 : vector<32x32xf32>
    %cst_99 = arith.constant dense<0.000000e+00> : vector<32xf32>
    %334 = vector.multi_reduction <add>, %333, %cst_99 [1] : vector<32x32xf32> to vector<32xf32>
    %335 = vector.shape_cast %334 : vector<32xf32> to vector<32x1xf32>
    %cst_100 = arith.constant 3.200000e+01 : f32
    %336 = vector.broadcast %cst_100 : f32 to vector<32x1xf32>
    %337 = arith.divf %335, %336 : vector<32x1xf32>
    %338 = vector.broadcast %330 : vector<32x1xf32> to vector<32x32xf32>
    %339 = arith.subf %322, %338 : vector<32x32xf32>
    %cst_101 = arith.constant 9.99999997E-7 : f32
    %340 = vector.broadcast %cst_101 : f32 to vector<32x1xf32>
    %341 = arith.addf %337, %340 : vector<32x1xf32>
    %342 = math.rsqrt %341 : vector<32x1xf32>
    %343 = vector.broadcast %342 : vector<32x1xf32> to vector<32x32xf32>
    %344 = arith.mulf %339, %343 : vector<32x32xf32>
    %345 = vector.broadcast %325 : vector<1x32xf32> to vector<32x32xf32>
    %346 = arith.mulf %344, %345 : vector<32x32xf32>
    %347 = vector.broadcast %326 : vector<1x32xf32> to vector<32x32xf32>
    %348 = arith.addf %346, %347 : vector<32x32xf32>
    %c0_102 = arith.constant 0 : index
    %c0_103 = arith.constant 0 : index
    %c0_104 = arith.constant 0 : index
    %349 = vector.load %arg8[%c0_102, %c0_103, %c0_104] : memref<1x32x32xf32, #tpu.memory_space<vmem>>, vector<1x32x32xf32>
    %350 = vector.shape_cast %349 : vector<1x32x32xf32> to vector<32x32xf32>
    %351 = vector.shape_cast %348 : vector<32x32xf32> to vector<1x32x32xf32>
    tpu.vector_store %arg8[%c0_102, %c0_103, %c0_104], %351 {strides = array<i32>} : memref<1x32x32xf32, #tpu.memory_space<vmem>>, vector<1x32x32xf32>,
    return
  }
  func.func @transform_0(%arg0: i32) -> (i32, i32, i32) {
    %c0_i32 = arith.constant 0 : i32
    %c0_i32_0 = arith.constant 0 : i32
    %c0_i32_1 = arith.constant 0 : i32
    return %arg0, %c0_i32, %c0_i32_0 : i32, i32, i32
  }
  func.func @transform_1(%arg0: i32) -> (i32, i32, i32) {
    %c0_i32 = arith.constant 0 : i32
    %c0_i32_0 = arith.constant 0 : i32
    %c0_i32_1 = arith.constant 0 : i32
    %c0_i32_2 = arith.constant 0 : i32
    return %c0_i32, %c0_i32_0, %c0_i32_1 : i32, i32, i32
  }
  func.func @transform_2(%arg0: i32) -> (i32, i32, i32) {
    %c0_i32 = arith.constant 0 : i32
    %c0_i32_0 = arith.constant 0 : i32
    %c0_i32_1 = arith.constant 0 : i32
    %c0_i32_2 = arith.constant 0 : i32
    return %c0_i32, %c0_i32_0, %c0_i32_1 : i32, i32, i32
  }
  func.func @transform_3(%arg0: i32) -> (i32, i32, i32) {
    %c0_i32 = arith.constant 0 : i32
    %c0_i32_0 = arith.constant 0 : i32
    %c0_i32_1 = arith.constant 0 : i32
    %c0_i32_2 = arith.constant 0 : i32
    return %c0_i32, %c0_i32_0, %c0_i32_1 : i32, i32, i32
  }
  func.func @transform_4(%arg0: i32) -> (i32, i32, i32) {
    %c0_i32 = arith.constant 0 : i32
    %c0_i32_0 = arith.constant 0 : i32
    %c0_i32_1 = arith.constant 0 : i32
    %c0_i32_2 = arith.constant 0 : i32
    return %c0_i32, %c0_i32_0, %c0_i32_1 : i32, i32, i32
  }
  func.func @transform_5(%arg0: i32) -> (i32, i32, i32) {
    %c0_i32 = arith.constant 0 : i32
    %c0_i32_0 = arith.constant 0 : i32
    %c0_i32_1 = arith.constant 0 : i32
    %c0_i32_2 = arith.constant 0 : i32
    return %c0_i32, %c0_i32_0, %c0_i32_1 : i32, i32, i32
  }
  func.func @transform_6(%arg0: i32) -> (i32, i32, i32) {
    %c0_i32 = arith.constant 0 : i32
    %c0_i32_0 = arith.constant 0 : i32
    %c0_i32_1 = arith.constant 0 : i32
    %c0_i32_2 = arith.constant 0 : i32
    return %c0_i32, %c0_i32_0, %c0_i32_1 : i32, i32, i32
  }
  func.func @transform_7(%arg0: i32) -> (i32, i32, i32) {
    %c0_i32 = arith.constant 0 : i32
    %c0_i32_0 = arith.constant 0 : i32
    %c0_i32_1 = arith.constant 0 : i32
    return %arg0, %c0_i32, %c0_i32_0 : i32, i32, i32
  }
}

</mosaic_0001>

<bundles_post_ra>
// kernel: tpu_custom_call.1
= control target key start
LH: loop header
LB: loop body
LE: loop exit
PB: predicated region body
PF: predicated region fallthrough
CT: control target
= control target key end

     0   :  { %12 = vsyncpa [#allocation3], 0  ;;  %s4792_s0 = inlined_call_operand.vmem [shape: f32[2,32,32], index: 0, kind: input, shape index: {}]   ;;  %s4793_s1 = inlined_call_operand.vmem [shape: f32[1,32,32], index: 1, kind: input, shape index: {}]   ;;  %s4794_s2 = inlined_call_operand.hbm [shape: f32[3,8,128], index: 2, kind: input, shape index: {}]   ;;  %s4795_s3 = inlined_call_operand.vmem [shape: bf16[2,32,96], index: 3, kind: input, shape index: {}]   ;;  %s4796_s4 = inlined_call_operand.vmem [shape: bf16[2,32,32], index: 4, kind: input, shape index: {}]   ;;  %s4797_s5 = inlined_call_operand.hbm [shape: bf16[2,32,128], index: 5, kind: input, shape index: {}]   ;;  %s4798_s6 = inlined_call_operand.vmem [shape: bf16[2,128,32], index: 6, kind: input, shape index: {}]   ;;  %s4799_s7 = inlined_call_operand.hbm [shape: f32[2,32,32], index: 7, kind: output, shape index: {}]  }
   0x1   :  { %13 = vsyncpa [#allocation6], 0 }
   0x2   :  { %14 = vsyncpa [#allocation4], 0 }
   0x3   :  { %16 = vsyncpa [#allocation4 + $0x1], 0  ;;  %s4003_s24 = smov 0   ;;  %s4005_s25 = smov 0  }
   0x4   :  { %s4007_s26 = smov 0   ;;  %s4009_s27 = smov 0  }
   0x5 LB: > { %s4024_s28 = sadd.s32 4294967295, %s3939_s27   ;;  %s3028_s29 = sadd.s32 4294967294, %s3939_s27   ;;  %s3939_s27 = sphi %s4009_s27, %s4837_s27   ;;  %s3935_s26 = sphi %s4007_s26, %s4836_s26   ;;  %s3931_s25 = sphi %s4005_s25, %s4835_s25   ;;  %s3927_s24 = sphi %s4003_s24, %s4834_s24  }
   0x6   : > { %s4028_s30 = sadd.s32 1, %s3939_s27   ;;  %s181_s8 = sadd.s32 1, %s3935_s26 }
   0x7   : > { %s178_s9 = ssub.s32 %s3939_s27, %s4028_s30  ;;  %p191_p0 = scmp.ne.s32.totalorder %s3935_s26, %s3931_s25 }
   0x8   : > { %p179_p1 = scmp.eq.s32.totalorder %s178_s9, 0  ;;  %p192_p2 = scmp.eq.s32.totalorder %s4024_s28, 1 }
   0x9   : > { %p197_p3 = scmp.ne.s32.totalorder %s3931_s25, %s3927_s24  ;;  %p198_p4 = scmp.eq.s32.totalorder %s3028_s29, 1 }
   0xa   : > { %s4039_s10 = scalar_select %p179_p1, %s3935_s26, %s181_s8  }
   0xb   : > { %p4041_p5 = por %p192_p2, %p191_p0  ;;  %p4045_p6 = por %p198_p4, %p197_p3 }
   0xc   : > { %p3029_p7 = scmp.ge.s32.totalorder %s3939_s27, 1  ;;  %p205_p8 = scmp.lt.s32.totalorder %s3939_s27, 3 }
   0xd   : > { %s4818_s12 = scalar_select %p4045_p6, 1, 0 }
   0xe   : > { %p4800_p9 = scmp.eq.s32.totalorder %s4024_s28, 0  ;;  %p4052_p10 = pnand %p3029_p7, %p205_p8 }
   0xf   : > { %s3941_s14 = smov [#allocation2]   ;;  %s3942_s17 = smov [#allocation5]  }
  0x10   : > { %s220_s15 = sshll.u32 %s3941_s14, 4  ;;  %p3492_p11 = pneg %p4052_p10  ;;  %s221_s15 = int_to_ptr.vmem [resolvable:$true] %s220_s15 }
  0x11   : > { %s239_s18 = sshll.u32 %s3942_s17, 4  ;;  %s3830_s19 = scalar_lea.vmem %s221_s15, 384  ;;  %s240_s18 = int_to_ptr.vmem [resolvable:$true] %s239_s18 }
  0x12   : > { %p4060_p12 = pnand %p4800_p9, %p3492_p11  ;;  %p3831_p0 = scmp.ne.s32.totalorder %s221_s15, %s3830_s19 }
  0x13   : > { %p3838_p3 = scmp.lt.s32.totalorder %s221_s15, %s221_s15  ;;  %p3839_p4 = scmp.lt.s32.totalorder %s3830_s19, %s3830_s19 }
  0x14   : > { %p3821_p13 = pneg %p4060_p12 }
  0x15   : > { %p3840_p7 = por %p3839_p4, %p3838_p3 }
  0x16   : > { %p3833_p1 = pnand %p3831_p0, %p3821_p13 }
  0x18   : > { %p3834_p2 = pneg %p3833_p1 }
  0x1a   : > { %p3841_p8 = pnand %p3840_p7, %p3834_p2 }
  0x1c   : > { %3844 = shalt.err (!%p3841_p8)
}
  0x1d   : > { %s3943_s20 = smov 128   ;;  %s3944_s21 = smov 8  }
  0x1e   : > { %3495 = dma.hbm_to_vmem [thread:$0]  (!%p4060_p12), %s4794_s2, 384, %s221_s15, [#allocation3], %s3943_s20, %s3943_s20, %s3944_s21  }
  0x1f   : > { %s3856_s29 = scalar_lea.vmem %s240_s18, 512  ;;  %p3864_p9 = scmp.lt.s32.totalorder %s240_s18, %s240_s18 }
  0x20   : > { %p3857_p11 = scmp.ne.s32.totalorder %s240_s18, %s3856_s29  ;;  %p3865_p6 = scmp.lt.s32.totalorder %s3856_s29, %s3856_s29 }
  0x22   : > { %p3859_p0 = pnand %p3857_p11, %p3821_p13  ;;  %p3866_p3 = por %p3865_p6, %p3864_p9 }
  0x24   : > { %p3860_p1 = pneg %p3859_p0 }
  0x26   : > { %p3867_p2 = pnand %p3866_p3, %p3860_p1 }
  0x28   : > { %3870 = shalt.err (!%p3867_p2)
}
  0x29   : > { %s3945_s8 = smov 64   ;;  %s3946_s9 = smov 4  }
  0x2a   : > { %3498 = dma.hbm_to_vmem [thread:$0]  (!%p4060_p12), %s4797_s5, 512, %s240_s18, [#allocation6], %s3945_s8, %s3945_s8, %s3946_s9  }
  0x2b   : > { %266 = sbr.rel (%p4052_p10) target bundleno = 7452 (0x1d1c), region = 48  ;;  %p4821_p4 = scmp.eq.s32.totalorder (!%p4052_p10), %s4024_s28, 0 }
  0x30   : > { %3914 = dma.done.wait (%p4821_p4), [#allocation3], 384   ;;  %p4822_p13 = pmov %p4821_p4 }
  0x31   : > { %p4823_p6 = pmov %p4821_p4 }
  0x32   : > { %3916 = vsyncadd (%p4822_p13), [#allocation3], 4294966912 }
  0x33   : > { %3918 = dma.done.wait (%p4823_p6), [#allocation6], 512   ;;  %p4824_p9 = pmov %p4821_p4 }
  0x34   : > { %p302_p7 = scmp.lt.s32.totalorder %s4024_s28, 1  ;;  %v312_v1 = vld [vmem:[%s4793_s1] sm:$0xff]  ;;  %vm321_vm0 = vcmask 261120   ;;  %v314_v4 = vld [vmem:[%s4793_s1 + $0x10] sm:$0xff]  ;;  %v313_v6 = vld [vmem:[%s4793_s1 + $0x8] sm:$0xff]  ;;  %v375_v47 = vlaneseq  ;;  %vm476_vm1 = vcmask 64512  }
  0x35   : > { %3920 = vsyncadd (%p4824_p9), [#allocation6], 4294966784  ;;  %v315_v10 = vld [vmem:[%s4793_s1 + $0x18] sm:$0xff]  ;;  %v3621_v36 = vld [vmem:[%s4795_s3 + $0x8] sm:$0xff]   ;;  %s3947_s13 = smov 96   ;;  %s3949_s20 = smov 88  }
  0x36   : > { %s303_s15 = scalar_select %p302_p7, %s4024_s28, 1  ;;  %v3622_v37 = vld [vmem:[%s4795_s3] sm:$0xff]   ;;  %3250 = vmatprep.subr.bf16.mxu0 %v3621_v36  ;;  %v4139_v51 = vshrl.u32 %v375_v47, 7  ;;  %vm1225_vm2 = vcmask 130048   ;;  %vm1230_vm3 = vcmask 195584  }
  0x37   : > { %3251 = vmatpush3.bf16.msra.mxu0 %v3621_v36  ;;  %v4144_v53 = vld [vmem:[#allocation2] sm:$0xff]  ;;  %s3950_s21 = smov 56   ;;  %s3951_s22 = smov 80  }
  0x38   : > { %s3140_s16 = sshll.u32 %s303_s15, 5  ;;  %3252 = vmatprep.subr.bf16.mxu0 %v3622_v37  ;;  %v4142_v52 = vsub.s32 0, %v4139_v51  ;;  %v4149_v57 = vsub.s32 1, %v4139_v51  ;;  %s4815_s23 = smov 112  }
  0x39   : > { %s306_s19 = scalar_lea.vmem %s4792_s0, %s3140_s16  ;;  %s3953_s29 = smov 64  }
  0x3a   : > { %v308_v0 = vld [vmem:[%s306_s19] sm:$0xff]  ;;  %v310_v2 = vld [vmem:[%s306_s19 + $0x10] sm:$0xff]  ;;  %v309_v5 = vld [vmem:[%s306_s19 + $0x8] sm:$0xff]  ;;  %v378_v56 = vrot.slane %v4144_v53, %v4142_v52  ;;  %v386_v62 = vrot.slane %v4144_v53, %v4149_v57  ;;  %s4813_s8 = smov 48   ;;  %s4811_s9 = smov 72  }
  0x3b   : > { %v4100_v3 = vadd.f32 %v312_v1, %v308_v0  ;;  %v4108_v7 = vadd.f32 %v314_v4, %v310_v2  ;;  %v4110_v8 = vadd.f32 %v313_v6, %v309_v5  ;;  %v311_v9 = vld [vmem:[%s306_s19 + $0x18] sm:$0xff]  ;;  %3253 = vmatpush3.bf16.msra.mxu0 %v3622_v37  ;;  %s3948_s19 = smov 120   ;;  %s4807_s14 = smov 104  }
  0x3c   : > { %v4117_v12 = vadd.f32 %v315_v10, %v311_v9  ;;  %s4805_s17 = smov 40   ;;  %s4803_s15 = smov 8  }
  0x3d   : > { %v322_v11 = vsel %vm321_vm0, %v4100_v3, 0.0  ;;  %v328_v13 = vsel %vm321_vm0, %v4108_v7, 0.0  ;;  %v325_v14 = vsel %vm321_vm0, %v4110_v8, 0.0  ;;  %s4801_s16 = smov 16  }
  0x3e   : > { %323 = vadd.xlane.f32.xlu0 %v322_v11  ;;  %329 = vadd.xlane.f32.xlu1 %v328_v13  ;;  %v331_v15 = vsel %vm321_vm0, %v4117_v12, 0.0 }
  0x42   : > { %326 = vadd.xlane.f32.xlu0 %v325_v14  ;;  %332 = vadd.xlane.f32.xlu1 %v331_v15  ;;  %v399_v15 = vsub.s32 4, %v4139_v51 }
  0xc7   : > { %v324_v16 = vpop.xlane.xlu0 %323  ;;  %v330_v18 = vpop.xlane.xlu1 %329 }
  0xc8   : > { %v335_v17 = vmul.f32 0.03125, %v324_v16  ;;  %v337_v19 = vmul.f32 0.03125, %v330_v18 }
  0xca   : > { %v339_v20 = vsub.f32 %v4100_v3, %v335_v17  ;;  %v341_v21 = vsub.f32 %v4108_v7, %v337_v19  ;;  %v400_v17 = vrot.slane %v4144_v53, %v399_v15 }
  0xcb   : > { %v327_v22 = vpop.xlane.xlu0 %326  ;;  %v333_v24 = vpop.xlane.xlu1 %332 }
  0xcc   : > { %v336_v23 = vmul.f32 0.03125, %v327_v22  ;;  %v343_v25 = vmul.f32 %v339_v20, %v339_v20  ;;  %v338_v26 = vmul.f32 0.03125, %v333_v24  ;;  %v345_v27 = vmul.f32 %v341_v21, %v341_v21 }
  0xce   : > { %v340_v28 = vsub.f32 %v4110_v8, %v336_v23  ;;  %v347_v29 = vsel %vm321_vm0, %v343_v25, 0.0  ;;  %v342_v30 = vsub.f32 %v4117_v12, %v338_v26  ;;  %v353_v31 = vsel %vm321_vm0, %v345_v27, 0.0 }
  0xcf   : > { %348 = vadd.xlane.f32.xlu0 %v347_v29 }
  0xd0   : > { %v344_v32 = vmul.f32 %v340_v28, %v340_v28  ;;  %v346_v33 = vmul.f32 %v342_v30, %v342_v30 }
  0xd2   : > { %v350_v34 = vsel %vm321_vm0, %v344_v32, 0.0  ;;  %v356_v35 = vsel %vm321_vm0, %v346_v33, 0.0 }
  0xd3   : > { %354 = vadd.xlane.f32.xlu0 %v353_v31  ;;  %351 = vadd.xlane.f32.xlu1 %v350_v34 }
  0xd7   : > { %357 = vadd.xlane.f32.xlu1 %v356_v35 }
 0x158   : > { %v349_v38 = vpop.xlane.xlu0 %348 }
 0x159   : > { %v359_v39 = vmul.f32 0.03125, %v349_v38 }
 0x15b   : > { %v363_v40 = vadd.f32 1e-06, %v359_v39 }
 0x15c   : > { %v352_v41 = vpop.xlane.xlu1 %351  ;;  %v355_v42 = vpop.xlane.xlu0 %354 }
 0x15d   : > { %3649 = vrsqrt.f32 %v363_v40  ;;  %v360_v43 = vmul.f32 0.03125, %v352_v41  ;;  %v361_v44 = vmul.f32 0.03125, %v355_v42 }
 0x15f   : > { %v364_v45 = vadd.f32 1e-06, %v360_v43  ;;  %v365_v46 = vadd.f32 1e-06, %v361_v44 }
 0x160   : > { %v358_v48 = vpop.xlane.xlu1 %357 }
 0x161   : > { %3651 = vrsqrt.f32 %v364_v45  ;;  %v362_v49 = vmul.f32 0.03125, %v358_v48 }
 0x162   : > { %3653 = vrsqrt.f32 %v365_v46 }
 0x163   : > { %v366_v50 = vadd.f32 1e-06, %v362_v49 }
 0x165   : > { %3655 = vrsqrt.f32 %v366_v50 }
 0x16a   : > { %v3650_v54 = vpop.eup %3649 }
 0x16b   : > { %v371_v55 = vmul.f32 %v3650_v54, %v339_v20 }
 0x16d   : > { %v379_v61 = vmul.f32 %v378_v56, %v371_v55 }
 0x16e   : > { %v3652_v58 = vpop.eup %3651 }
 0x16f   : > { %v3654_v59 = vpop.eup %3653  ;;  %v372_v60 = vmul.f32 %v3652_v58, %v340_v28  ;;  %v387_v2 = vadd.f32 %v386_v62, %v379_v61 }
 0x170   : > { %v373_v63 = vmul.f32 %v3654_v59, %v341_v21 }
 0x171   : > { %v380_v0 = vmul.f32 %v378_v56, %v372_v60 }
 0x172   : > { %v3656_v1 = vpop.eup %3655  ;;  %v381_v6 = vmul.f32 %v378_v56, %v373_v63 }
 0x173   : > { %v388_v4 = vadd.f32 %v386_v62, %v380_v0  ;;  %v374_v5 = vmul.f32 %v3656_v1, %v342_v30 }
 0x174   : > { %v389_v11 = vadd.f32 %v386_v62, %v381_v6 }
 0x175   : > { %v391_v9 = vpack.c.bf16 %v388_v4, %v387_v2  ;;  %v382_v10 = vmul.f32 %v378_v56, %v374_v5 }
 0x177   : > { %3254 = vmatprep.mubr.msk.bf16.mxu0 %vm321_vm0, %v391_v9  ;;  %v390_v13 = vadd.f32 %v386_v62, %v382_v10 }
 0x179   : > { %v392_v14 = vpack.c.bf16 %v390_v13, %v389_v11 }
 0x17b   : > { %3255 = vmatmul.mubr.msk.bf16.vlgmr.msra.gmra.mxu0 %vm321_vm0, %v392_v14 }
 0x23b   : > { %v3256_v16 = vpop.f32.mrf.mxu0 }
 0x23c   : > { %v462_v20 = vadd.f32 %v3256_v16, %v400_v17 }
 0x23d   : > { %v453_v18 = vpop.f32.mrf.mxu0 }
 0x23e   : > { %v454_v23 = vadd.f32 %v453_v18, %v400_v17 }
 0x23f   : > { %v3257_v19 = vpop.f32.mrf.mxu0 }
 0x240   : > { %v465_v21 = vadd.f32 %v3257_v19, %v400_v17 }
 0x241   : > { %v456_v22 = vpop.f32.mrf.mxu0 }
 0x242   : > { %v4159_v24 = vpack.c.bf16 %v465_v21, %v462_v20  ;;  %v457_v25 = vadd.f32 %v456_v22, %v400_v17 }
 0x244   : > { %v4161_v26 = vpack.c.bf16 %v457_v25, %v454_v23  ;;  %474 = vrot.lane.b32.xlu0 %v4159_v24, %s3947_s13 }
 0x246   : > { %472 = vrot.lane.b32.xlu1 %v4161_v26, %s3947_s13  ;;  %3262 = vmatprep.mubr.msk.bf16.mxu1 %vm476_vm1, %v4161_v26 }
 0x248   : > { %645 = vrot.lane.b32.xlu0 %v4161_v26, %s3948_s19 }
 0x24a   : > { %651 = vrot.lane.b32.xlu1 %v4159_v24, %s3949_s20 }
 0x24e   : > { %649 = vrot.lane.b32.xlu1 %v4161_v26, %s3949_s20 }
 0x252   : > { %647 = vrot.lane.b32.xlu1 %v4159_v24, %s3948_s19 }
 0x2b6   : > { %v475_v27 = vpop.permute.xlu0 %474 }
 0x2b7   : > { %3466 = vmatprep.subr.msk.bf16.mxu1 %vm476_vm1, %v475_v27  ;;  %v487_v28 = vsel %vm476_vm1, %v475_v27, 0 }
 0x2b8   : > { %3259 = vmatpush3.bf16.xpose.msra.mxu1 %v487_v28  ;;  %v473_v29 = vpop.permute.xlu1 %472 }
 0x2b9   : > { %3467 = vmatprep.subr.msk.bf16.mxu1 %vm476_vm1, %v473_v29  ;;  %v484_v30 = vsel %vm476_vm1, %v473_v29, 0 }
 0x2ba   : > { %v646_v32 = vpop.permute.xlu0 %645 }
 0x2bc   : > { %v652_v31 = vpop.permute.xlu1 %651 }
 0x2bd   : > { %v663_v33 = vsel %vm476_vm1, %v652_v31, 0 }
 0x2c0   : > { %3261 = vmatpush3.bf16.xpose.msra.mxu1 %v484_v30  ;;  %v650_v34 = vpop.permute.xlu1 %649 }
 0x2c1   : > { %3468 = vmatprep.subr.msk.bf16.mxu1 %vm476_vm1, %v652_v31  ;;  %v660_v35 = vsel %vm476_vm1, %v650_v34, 0 }
 0x2c4   : > { %v648_v36 = vpop.permute.xlu1 %647 }
 0x2c7   : > { %3263 = vmatmul.mubr.msk.bf16.vlgmr.msra.gmra.mxu1 %vm476_vm1, %v4159_v24 }
 0x2c8   : > { %3275 = vmatpush3.bf16.xpose.msra.mxu1 %v663_v33  ;;  %3278 = vmatprep.mubr.msk.bf16.mxu1 %vm476_vm1, %v646_v32 }
 0x2c9   : > { %3469 = vmatprep.subr.msk.bf16.mxu1 %vm476_vm1, %v650_v34 }
 0x2d0   : > { %3277 = vmatpush3.bf16.xpose.msra.mxu1 %v660_v35 }
 0x2d7   : > { %3279 = vmatmul.mubr.msk.bf16.vlgmr.msra.gmra.mxu1 %vm476_vm1, %v648_v36 }
 0x387   : > { %v4189_v37 = vpop.f32.mrf.mxu1 }
 0x388   : > { %v544_v14 = vsel %vm321_vm0, %v4189_v37, -inf }
 0x389   : > { %v4191_v38 = vpop.f32.mrf.mxu1 }
 0x38a   : > { %v538_v13 = vsel %vm321_vm0, %v4191_v38, -inf }
 0x38b   : > { %v4193_v39 = vpop.f32.mrf.mxu1 }
 0x38c   : > { %v547_v16 = vsel %vm321_vm0, %v4193_v39, -inf }
 0x38d   : > { %v4195_v40 = vpop.f32.mrf.mxu1 }
 0x38e   : > { %v541_v17 = vsel %vm321_vm0, %v4195_v40, -inf }
 0x397   : > { %v3280_v41 = vpop.f32.mrf.mxu1 }
 0x398   : > { %v720_v46 = vsel %vm321_vm0, %v3280_v41, -inf }
 0x399   : > { %v699_v42 = vpop.f32.mrf.mxu1 }
 0x39a   : > { %v714_v43 = vsel %vm321_vm0, %v699_v42, -inf }
 0x39b   : > { %715 = vmax.xlane.f32.xlu0 %v714_v43  ;;  %v3281_v44 = vpop.f32.mrf.mxu1 }
 0x39c   : > { %v723_v48 = vsel %vm321_vm0, %v3281_v44, -inf }
 0x39d   : > { %v702_v45 = vpop.f32.mrf.mxu1 }
 0x39e   : > { %v717_v47 = vsel %vm321_vm0, %v702_v45, -inf }
 0x39f   : > { %721 = vmax.xlane.f32.xlu0 %v720_v46  ;;  %718 = vmax.xlane.f32.xlu1 %v717_v47 }
 0x3a3   : > { %724 = vmax.xlane.f32.xlu0 %v723_v48 }
 0x3b0   : > { %760 = vrot.lane.b32.xlu1 %v4161_v26, %s3950_s21 }
 0x424   : > { %v716_v49 = vpop.xlane.xlu0 %715 }
 0x425   : > { %v726_v50 = vsub.f32 %v699_v42, %v716_v49 }
 0x427   : > { %v730_v58 = vmul.f32 1.442695, %v726_v50 }
 0x428   : > { %v722_v54 = vpop.xlane.xlu0 %721  ;;  %v719_v55 = vpop.xlane.xlu1 %718 }
 0x429   : > { %v728_v56 = vsub.f32 %v3280_v41, %v722_v54  ;;  %v727_v60 = vsub.f32 %v702_v45, %v719_v55 }
 0x42b   : > { %v734_v59 = vmul.f32 1.442695, %v728_v56  ;;  %v732_v63 = vmul.f32 1.442695, %v727_v60 }
 0x42c   : > { %v725_v61 = vpop.xlane.xlu0 %724  ;;  %v761_v18 = vpop.permute.xlu1 %760 }
 0x42d   : > { %3657 = vpow2.f32 %v734_v59  ;;  %v729_v62 = vsub.f32 %v3281_v44, %v725_v61 }
 0x42e   : > { %3659 = vpow2.f32 %v730_v58 }
 0x42f   : > { %v736_v0 = vmul.f32 1.442695, %v729_v62 }
 0x431   : > { %3661 = vpow2.f32 %v736_v0 }
 0x432   : > { %3663 = vpow2.f32 %v732_v63 }
 0x43a   : > { %v3658_v1 = vpop.eup %3657 }
 0x43b   : > { %v744_v2 = vsel %vm321_vm0, %v3658_v1, 0.0  ;;  %v3660_v4 = vpop.eup %3659 }
 0x43c   : > { %745 = vadd.xlane.f32.xlu0 %v744_v2  ;;  %v738_v6 = vsel %vm321_vm0, %v3660_v4, 0.0 }
 0x43e   : > { %v3662_v5 = vpop.eup %3661 }
 0x43f   : > { %v747_v9 = vsel %vm321_vm0, %v3662_v5, 0.0  ;;  %v3664_v10 = vpop.eup %3663 }
 0x440   : > { %739 = vadd.xlane.f32.xlu0 %v738_v6  ;;  %748 = vadd.xlane.f32.xlu1 %v747_v9  ;;  %v741_v11 = vsel %vm321_vm0, %v3664_v10, 0.0 }
 0x444   : > { %742 = vadd.xlane.f32.xlu1 %v741_v11 }
 0x455   : > { %827 = vrot.lane.b32.xlu1 %v4159_v24, %s3951_s22 }
 0x456   : > { %762 = vrot.lane.b32.xlu0 %v4159_v24, %s3950_s21 }
 0x459   : > { %825 = vrot.lane.b32.xlu1 %v4161_v26, %s3951_s22 }
 0x45a   : > { %821 = vrot.lane.b32.xlu0 %v4161_v26, %s4815_s23 }
 0x45d   : > { %823 = vrot.lane.b32.xlu1 %v4159_v24, %s4815_s23 }
 0x479   : > { %539 = vmax.xlane.f32.xlu0 %v538_v13 }
 0x47d   : > { %545 = vmax.xlane.f32.xlu0 %v544_v14 }
 0x481   : > { %548 = vmax.xlane.f32.xlu0 %v547_v16  ;;  %542 = vmax.xlane.f32.xlu1 %v541_v17 }
 0x4c5   : > { %v746_v19 = vpop.xlane.xlu0 %745 }
 0x4c9   : > { %v740_v20 = vpop.xlane.xlu0 %739  ;;  %v749_v21 = vpop.xlane.xlu1 %748 }
 0x4ca   : > { %3665 = vrcp.f32 %v749_v21 }
 0x4cb   : > { %3667 = vrcp.f32 %v740_v20 }
 0x4cc   : > { %3669 = vrcp.f32 %v746_v19 }
 0x4cd   : > { %v763_v22 = vpop.permute.xlu0 %762  ;;  %v743_v23 = vpop.xlane.xlu1 %742 }
 0x4ce   : > { %3671 = vrcp.f32 %v743_v23  ;;  %3282 = vmatprep.subr.bf16.mxu1 %v763_v22 }
 0x4cf   : > { %3283 = vmatpush3.bf16.msra.mxu1 %v763_v22 }
 0x4d0   : > { %3284 = vmatprep.subr.bf16.mxu1 %v761_v18 }
 0x4d1   : > { %v828_v25 = vpop.permute.xlu1 %827  ;;  %v822_v41 = vpop.permute.xlu0 %821 }
 0x4d2   : > { %v839_v42 = vsel %vm476_vm1, %v828_v25, 0 }
 0x4d3   : > { %3285 = vmatpush3.bf16.msra.mxu1 %v761_v18 }
 0x4d4   : > { %3470 = vmatprep.subr.msk.bf16.mxu1 %vm476_vm1, %v828_v25 }
 0x4d5   : > { %v826_v43 = vpop.permute.xlu1 %825 }
 0x4d6   : > { %v836_v44 = vsel %vm476_vm1, %v826_v43, 0 }
 0x4d7   : > { %v3666_v27 = vpop.eup %3665 }
 0x4d8   : > { %v3668_v28 = vpop.eup %3667  ;;  %v757_v31 = vmul.f32 %v3666_v27, %v3662_v5 }
 0x4d9   : > { %v3670_v29 = vpop.eup %3669  ;;  %v754_v32 = vmul.f32 %v3668_v28, %v3660_v4  ;;  %v824_v45 = vpop.permute.xlu1 %823 }
 0x4da   : > { %v756_v34 = vmul.f32 %v3670_v29, %v3658_v1 }
 0x4db   : > { %v3672_v30 = vpop.eup %3671 }
 0x4dc   : > { %v755_v33 = vmul.f32 %v3672_v30, %v3664_v10  ;;  %v759_v36 = vpack.c.bf16 %v757_v31, %v756_v34 }
 0x4de   : > { %v758_v35 = vpack.c.bf16 %v755_v33, %v754_v32 }
 0x4e0   : > { %3286 = vmatprep.mubr.msk.bf16.mxu1 %vm321_vm0, %v758_v35 }
 0x4e1   : > { %3287 = vmatmul.mubr.msk.bf16.vlgmr.msra.gmra.mxu1 %vm321_vm0, %v759_v36 }
 0x4e2   : > { %3291 = vmatpush3.bf16.xpose.msra.mxu1 %v839_v42  ;;  %3294 = vmatprep.mubr.msk.bf16.mxu1 %vm476_vm1, %v822_v41 }
 0x4e3   : > { %3471 = vmatprep.subr.msk.bf16.mxu1 %vm476_vm1, %v826_v43 }
 0x4ea   : > { %3293 = vmatpush3.bf16.xpose.msra.mxu1 %v836_v44 }
 0x4f1   : > { %3295 = vmatmul.mubr.msk.bf16.vlgmr.msra.gmra.mxu1 %vm476_vm1, %v824_v45 }
 0x502   : > { %v540_v46 = vpop.xlane.xlu0 %539 }
 0x503   : > { %v550_v50 = vsub.f32 %v4191_v38, %v540_v46 }
 0x505   : > { %v554_v60 = vmul.f32 1.442695, %v550_v50 }
 0x506   : > { %v546_v48 = vpop.xlane.xlu0 %545 }
 0x507   : > { %v552_v58 = vsub.f32 %v4189_v37, %v546_v48  ;;  %3673 = vpow2.f32 %v554_v60 }
 0x509   : > { %v558_v0 = vmul.f32 1.442695, %v552_v58 }
 0x50a   : > { %v543_v54 = vpop.xlane.xlu1 %542  ;;  %v549_v63 = vpop.xlane.xlu0 %548 }
 0x50b   : > { %v551_v61 = vsub.f32 %v4195_v40, %v543_v54  ;;  %v553_v38 = vsub.f32 %v4193_v39, %v549_v63  ;;  %3675 = vpow2.f32 %v558_v0 }
 0x50d   : > { %v556_v1 = vmul.f32 1.442695, %v551_v61  ;;  %v560_v2 = vmul.f32 1.442695, %v553_v38 }
 0x50f   : > { %3677 = vpow2.f32 %v556_v1 }
 0x510   : > { %3679 = vpow2.f32 %v560_v2 }
 0x514   : > { %v4252_v11 = vpop.eup %3673 }
 0x515   : > { %v562_v13 = vsel %vm321_vm0, %v4252_v11, 0.0 }
 0x518   : > { %v4254_v39 = vpop.eup %3675 }
 0x519   : > { %v568_v17 = vsel %vm321_vm0, %v4254_v39, 0.0 }
 0x51c   : > { %v3678_v16 = vpop.eup %3677 }
 0x51d   : > { %v565_v18 = vsel %vm321_vm0, %v3678_v16, 0.0  ;;  %v3680_v19 = vpop.eup %3679 }
 0x51e   : > { %v571_v20 = vsel %vm321_vm0, %v3680_v19, 0.0 }
 0x5a1   : > { %v4233_v47 = vpop.f32.mrf.mxu1 }
 0x5a3   : > { %v4235_v49 = vpop.f32.mrf.mxu1 }
 0x5a5   : > { %v4238_v55 = vpop.f32.mrf.mxu1 }
 0x5a6   : > { %v3566_v56 = vpack.i.bf16 %v4238_v55, %v4233_v47 }
 0x5a7   : > { %v4243_v59 = vpop.f32.mrf.mxu1 }
 0x5a8   : > { %v3561_v62 = vpack.i.bf16 %v4243_v59, %v4235_v49 }
 0x5b1   : > { %v3296_v4 = vpop.f32.mrf.mxu1 }
 0x5b2   : > { %v896_v9 = vsel %vm321_vm0, %v3296_v4, -inf }
 0x5b3   : > { %v875_v5 = vpop.f32.mrf.mxu1 }
 0x5b4   : > { %v890_v37 = vsel %vm321_vm0, %v875_v5, -inf }
 0x5b5   : > { %891 = vmax.xlane.f32.xlu0 %v890_v37  ;;  %v3297_v6 = vpop.f32.mrf.mxu1 }
 0x5b6   : > { %v899_v14 = vsel %vm321_vm0, %v3297_v6, -inf }
 0x5b7   : > { %v878_v40 = vpop.f32.mrf.mxu1 }
 0x5b8   : > { %v893_v10 = vsel %vm321_vm0, %v878_v40, -inf }
 0x5b9   : > { %897 = vmax.xlane.f32.xlu0 %v896_v9  ;;  %894 = vmax.xlane.f32.xlu1 %v893_v10 }
 0x5bd   : > { %563 = vadd.xlane.f32.xlu0 %v562_v13  ;;  %900 = vmax.xlane.f32.xlu1 %v899_v14 }
 0x5c1   : > { %569 = vadd.xlane.f32.xlu0 %v568_v17  ;;  %566 = vadd.xlane.f32.xlu1 %v565_v18 }
 0x5c5   : > { %572 = vadd.xlane.f32.xlu1 %v571_v20 }
 0x5d6   : > { %584 = vrot.lane.b32.xlu1 %v4161_v26, %s3953_s29 }
 0x5d7   : > { %586 = vrot.lane.b32.xlu0 %v4159_v24, %s3953_s29 }
 0x5da   : > { %938 = vrot.lane.b32.xlu1 %v4159_v24, %s4813_s8 }
 0x63e   : > { %v892_v21 = vpop.xlane.xlu0 %891 }
 0x63f   : > { %v902_v22 = vsub.f32 %v875_v5, %v892_v21 }
 0x641   : > { %v906_v29 = vmul.f32 1.442695, %v902_v22 }
 0x642   : > { %v898_v23 = vpop.xlane.xlu0 %897  ;;  %v895_v25 = vpop.xlane.xlu1 %894 }
 0x643   : > { %v904_v27 = vsub.f32 %v3296_v4, %v898_v23  ;;  %v903_v28 = vsub.f32 %v878_v40, %v895_v25 }
 0x645   : > { %v910_v30 = vmul.f32 1.442695, %v904_v27  ;;  %v908_v31 = vmul.f32 1.442695, %v903_v28 }
 0x646   : > { %v564_v32 = vpop.xlane.xlu0 %563  ;;  %v901_v33 = vpop.xlane.xlu1 %900 }
 0x647   : > { %3681 = vpow2.f32 %v910_v30  ;;  %v905_v34 = vsub.f32 %v3297_v6, %v901_v33 }
 0x648   : > { %3683 = vpow2.f32 %v906_v29 }
 0x649   : > { %3685 = vpow2.f32 %v908_v31  ;;  %v912_v35 = vmul.f32 1.442695, %v905_v34 }
 0x64a   : > { %3687 = vrcp.f32 %v564_v32  ;;  %v570_v36 = vpop.xlane.xlu0 %569  ;;  %v567_v41 = vpop.xlane.xlu1 %566 }
 0x64b   : > { %3689 = vpow2.f32 %v912_v35 }
 0x64c   : > { %3691 = vrcp.f32 %v570_v36 }
 0x64d   : > { %3693 = vrcp.f32 %v567_v41 }
 0x64e   : > { %v587_v42 = vpop.permute.xlu0 %586  ;;  %v573_v43 = vpop.xlane.xlu1 %572 }
 0x64f   : > { %3695 = vrcp.f32 %v573_v43  ;;  %3266 = vmatprep.subr.bf16.mxu0 %v587_v42 }
 0x650   : > { %3267 = vmatpush3.bf16.msra.mxu0 %v587_v42 }
 0x652   : > { %v585_v44 = vpop.permute.xlu1 %584 }
 0x653   : > { %3268 = vmatprep.subr.bf16.mxu0 %v585_v44 }
 0x654   : > { %v3682_v45 = vpop.eup %3681  ;;  %3269 = vmatpush3.bf16.msra.mxu0 %v585_v44 }
 0x655   : > { %v3684_v46 = vpop.eup %3683  ;;  %v920_v48 = vsel %vm321_vm0, %v3682_v45, 0.0 }
 0x656   : > { %v3686_v50 = vpop.eup %3685  ;;  %921 = vadd.xlane.f32.xlu0 %v920_v48  ;;  %v939_v54 = vpop.permute.xlu1 %938  ;;  %v914_v63 = vsel %vm321_vm0, %v3684_v46, 0.0 }
 0x657   : > { %v3688_v58 = vpop.eup %3687  ;;  %3298 = vmatprep.subr.bf16.mxu0 %v939_v54  ;;  %v917_v37 = vsel %vm321_vm0, %v3686_v50, 0.0 }
 0x658   : > { %v3690_v60 = vpop.eup %3689  ;;  %v578_v1 = vmul.f32 %v3688_v58, %v4252_v11 }
 0x659   : > { %v3692_v61 = vpop.eup %3691  ;;  %v923_v0 = vsel %vm321_vm0, %v3690_v60, 0.0 }
 0x65a   : > { %v3694_v38 = vpop.eup %3693  ;;  %915 = vadd.xlane.f32.xlu0 %v914_v63  ;;  %924 = vadd.xlane.f32.xlu1 %v923_v0  ;;  %v580_v6 = vmul.f32 %v3692_v61, %v4254_v39 }
 0x65b   : > { %v579_v2 = vmul.f32 %v3694_v38, %v3678_v16 }
 0x65c   : > { %v3696_v4 = vpop.eup %3695 }
 0x65d   : > { %v582_v5 = vpack.c.bf16 %v579_v2, %v578_v1  ;;  %v581_v40 = vmul.f32 %v3696_v4, %v3680_v19 }
 0x65e   : > { %918 = vadd.xlane.f32.xlu1 %v917_v37 }
 0x65f   : > { %3270 = vmatprep.mubr.msk.bf16.mxu0 %vm321_vm0, %v582_v5  ;;  %v583_v9 = vpack.c.bf16 %v581_v40, %v580_v6 }
 0x661   : > { %3271 = vmatmul.mubr.msk.bf16.vlgmr.msra.gmra.mxu0 %vm321_vm0, %v583_v9 }
 0x662   : > { %3299 = vmatpush3.bf16.msra.mxu0 %v939_v54 }
 0x66f   : > { %936 = vrot.lane.b32.xlu1 %v4161_v26, %s4813_s8 }
 0x670   : > { %1003 = vrot.lane.b32.xlu0 %v4159_v24, %s4811_s9 }
 0x673   : > { %1001 = vrot.lane.b32.xlu1 %v4161_v26, %s4811_s9  ;;  %s4831_s9 = smov 16  }
 0x674   : > { %997 = vrot.lane.b32.xlu0 %v4161_v26, %s4807_s14 }
 0x677   : > { %999 = vrot.lane.b32.xlu1 %v4159_v24, %s4807_s14  ;;  %s4809_s14 = smov 24  }
 0x6df   : > { %v922_v10 = vpop.xlane.xlu0 %921 }
 0x6e3   : > { %v916_v11 = vpop.xlane.xlu0 %915  ;;  %v925_v39 = vpop.xlane.xlu1 %924 }
 0x6e4   : > { %3697 = vrcp.f32 %v925_v39 }
 0x6e5   : > { %3699 = vrcp.f32 %v916_v11 }
 0x6e6   : > { %3701 = vrcp.f32 %v922_v10 }
 0x6e7   : > { %v919_v13 = vpop.xlane.xlu1 %918  ;;  %v1004_v16 = vpop.permute.xlu0 %1003 }
 0x6e8   : > { %3703 = vrcp.f32 %v919_v13  ;;  %v1015_v30 = vsel %vm476_vm1, %v1004_v16, 0 }
 0x6eb   : > { %v937_v14 = vpop.permute.xlu1 %936  ;;  %v998_v29 = vpop.permute.xlu0 %997 }
 0x6ec   : > { %3300 = vmatprep.subr.bf16.mxu0 %v937_v14 }
 0x6ed   : > { %3301 = vmatpush3.bf16.msra.mxu0 %v937_v14 }
 0x6ee   : > { %3472 = vmatprep.subr.msk.bf16.mxu0 %vm476_vm1, %v1004_v16 }
 0x6ef   : > { %v1002_v31 = vpop.permute.xlu1 %1001 }
 0x6f0   : > { %v1012_v32 = vsel %vm476_vm1, %v1002_v31, 0 }
 0x6f1   : > { %v3698_v17 = vpop.eup %3697 }
 0x6f2   : > { %v3700_v18 = vpop.eup %3699  ;;  %v933_v21 = vmul.f32 %v3698_v17, %v3690_v60 }
 0x6f3   : > { %v3702_v19 = vpop.eup %3701  ;;  %v930_v22 = vmul.f32 %v3700_v18, %v3684_v46  ;;  %v1000_v33 = vpop.permute.xlu1 %999 }
 0x6f4   : > { %v932_v25 = vmul.f32 %v3702_v19, %v3682_v45 }
 0x6f5   : > { %v3704_v20 = vpop.eup %3703 }
 0x6f6   : > { %v931_v23 = vmul.f32 %v3704_v20, %v3686_v50  ;;  %v935_v28 = vpack.c.bf16 %v933_v21, %v932_v25 }
 0x6f8   : > { %v934_v27 = vpack.c.bf16 %v931_v23, %v930_v22 }
 0x6fa   : > { %3302 = vmatprep.mubr.msk.bf16.mxu0 %vm321_vm0, %v934_v27 }
 0x6fb   : > { %3303 = vmatmul.mubr.msk.bf16.vlgmr.msra.gmra.mxu0 %vm321_vm0, %v935_v28 }
 0x6fc   : > { %3307 = vmatpush3.bf16.xpose.msra.mxu0 %v1015_v30  ;;  %3310 = vmatprep.mubr.msk.bf16.mxu0 %vm476_vm1, %v998_v29 }
 0x6fd   : > { %3473 = vmatprep.subr.msk.bf16.mxu0 %vm476_vm1, %v1002_v31 }
 0x704   : > { %3309 = vmatpush3.bf16.xpose.msra.mxu0 %v1012_v32 }
 0x70b   : > { %3311 = vmatmul.mubr.msk.bf16.vlgmr.msra.gmra.mxu0 %vm476_vm1, %v1000_v33  ;;  %v3623_v33 = vld [vmem:[%s4796_s4 + $0x8] sm:$0xff]  }
 0x721   : > { %v4295_v34 = vpop.f32.mrf.mxu0 }
 0x723   : > { %v4297_v35 = vpop.f32.mrf.mxu0 }
 0x725   : > { %v4299_v36 = vpop.f32.mrf.mxu0 }
 0x727   : > { %v4301_v41 = vpop.f32.mrf.mxu0 }
 0x7bb   : > { %v3304_v42 = vpop.f32.mrf.mxu0 }
 0x7bd   : > { %v982_v43 = vpop.f32.mrf.mxu0 }
 0x7bf   : > { %v3305_v44 = vpop.f32.mrf.mxu0 }
 0x7c0   : > { %v3576_v45 = vpack.i.bf16 %v3305_v44, %v3304_v42  ;;  %v3624_v42 = vld [vmem:[%s4796_s4] sm:$0xff]  }
 0x7c1   : > { %v985_v46 = vpop.f32.mrf.mxu0 }
 0x7c2   : > { %v3571_v48 = vpack.i.bf16 %v985_v46, %v982_v43 }
 0x7cb   : > { %v3312_v50 = vpop.f32.mrf.mxu0 }
 0x7cc   : > { %v1072_v63 = vsel %vm321_vm0, %v3312_v50, -inf }
 0x7cd   : > { %v1051_v54 = vpop.f32.mrf.mxu0 }
 0x7ce   : > { %v1066_v58 = vsel %vm321_vm0, %v1051_v54, -inf }
 0x7cf   : > { %1067 = vmax.xlane.f32.xlu0 %v1066_v58  ;;  %v3313_v60 = vpop.f32.mrf.mxu0 }
 0x7d0   : > { %v1075_v38 = vsel %vm321_vm0, %v3313_v60, -inf }
 0x7d1   : > { %v1054_v61 = vpop.f32.mrf.mxu0 }
 0x7d2   : > { %v1069_v0 = vsel %vm321_vm0, %v1054_v61, -inf }
 0x7d3   : > { %1073 = vmax.xlane.f32.xlu0 %v1072_v63  ;;  %1070 = vmax.xlane.f32.xlu1 %v1069_v0 }
 0x7d7   : > { %1076 = vmax.xlane.f32.xlu0 %v1075_v38 }
 0x858   : > { %v1068_v1 = vpop.xlane.xlu0 %1067 }
 0x859   : > { %v1078_v2 = vsub.f32 %v1051_v54, %v1068_v1 }
 0x85b   : > { %v1082_v6 = vmul.f32 1.442695, %v1078_v2 }
 0x85c   : > { %v1074_v4 = vpop.xlane.xlu0 %1073  ;;  %v1071_v5 = vpop.xlane.xlu1 %1070 }
 0x85d   : > { %v1080_v37 = vsub.f32 %v3312_v50, %v1074_v4  ;;  %v1079_v9 = vsub.f32 %v1054_v61, %v1071_v5 }
 0x85f   : > { %v1086_v40 = vmul.f32 1.442695, %v1080_v37  ;;  %v1084_v39 = vmul.f32 1.442695, %v1079_v9 }
 0x860   : > { %v1077_v10 = vpop.xlane.xlu0 %1076 }
 0x861   : > { %3705 = vpow2.f32 %v1086_v40  ;;  %v1081_v11 = vsub.f32 %v3313_v60, %v1077_v10 }
 0x862   : > { %3707 = vpow2.f32 %v1082_v6 }
 0x863   : > { %v1088_v13 = vmul.f32 1.442695, %v1081_v11 }
 0x865   : > { %3709 = vpow2.f32 %v1088_v13 }
 0x866   : > { %3711 = vpow2.f32 %v1084_v39 }
 0x86e   : > { %v3706_v14 = vpop.eup %3705 }
 0x86f   : > { %v1096_v16 = vsel %vm321_vm0, %v3706_v14, 0.0  ;;  %v3708_v17 = vpop.eup %3707 }
 0x870   : > { %1097 = vadd.xlane.f32.xlu0 %v1096_v16  ;;  %v1090_v19 = vsel %vm321_vm0, %v3708_v17, 0.0 }
 0x872   : > { %v3710_v18 = vpop.eup %3709 }
 0x873   : > { %v1099_v20 = vsel %vm321_vm0, %v3710_v18, 0.0  ;;  %v3712_v21 = vpop.eup %3711 }
 0x874   : > { %1091 = vadd.xlane.f32.xlu0 %v1090_v19  ;;  %1100 = vadd.xlane.f32.xlu1 %v1099_v20  ;;  %v1093_v22 = vsel %vm321_vm0, %v3712_v21, 0.0 }
 0x878   : > { %1094 = vadd.xlane.f32.xlu1 %v1093_v22 }
 0x889   : > { %1112 = vrot.lane.b32.xlu1 %v4161_v26, %s4805_s17 }
 0x88a   : > { %1114 = vrot.lane.b32.xlu0 %v4159_v24, %s4805_s17 }
 0x88d   : > { %3562 = vrot.lane.b32.xlu1 %v3561_v62, %s4803_s15 }
 0x88e   : > { %3572 = vrot.lane.b32.xlu0 %v3571_v48, %s4801_s16 }
 0x891   : > { %3567 = vrot.lane.b32.xlu1 %v3566_v56, %s4803_s15  ;;  %s4832_s15 = smov 24  }
 0x895   : > { %3577 = vrot.lane.b32.xlu1 %v3576_v45, %s4801_s16 }
 0x8f9   : > { %v1098_v26 = vpop.xlane.xlu0 %1097 }
 0x8fd   : > { %v1092_v23 = vpop.xlane.xlu0 %1091  ;;  %v1101_v25 = vpop.xlane.xlu1 %1100 }
 0x8fe   : > { %3713 = vrcp.f32 %v1101_v25 }
 0x8ff   : > { %3715 = vrcp.f32 %v1092_v23  ;;  %v1243_v23 = vsub.s32 5, %v4139_v51 }
 0x900   : > { %3717 = vrcp.f32 %v1098_v26 }
 0x901   : > { %v1115_v24 = vpop.permute.xlu0 %1114  ;;  %v1095_v27 = vpop.xlane.xlu1 %1094  ;;  %v1244_v25 = vrot.slane %v4144_v53, %v1243_v23 }
 0x902   : > { %3719 = vrcp.f32 %v1095_v27  ;;  %3314 = vmatprep.subr.bf16.mxu1 %v1115_v24 }
 0x903   : > { %3315 = vmatpush3.bf16.msra.mxu1 %v1115_v24 }
 0x905   : > { %v1113_v49 = vpop.permute.xlu1 %1112  ;;  %v3573_v0 = vpop.permute.xlu0 %3572 }
 0x906   : > { %3316 = vmatprep.subr.bf16.mxu1 %v1113_v49  ;;  %v3575_v10 = vunpack.i.h.bf16 %v3573_v0  ;;  %v3574_v11 = vunpack.i.l.bf16 %v3573_v0 }
 0x907   : > { %3317 = vmatpush3.bf16.msra.mxu1 %v1113_v49 }
 0x908   : > { %3322 = vmatprep.subr.bf16.mxu1 %v3623_v33 }
 0x909   : > { %v3563_v54 = vpop.permute.xlu1 %3562 }
 0x90a   : > { %v3565_v60 = vunpack.i.h.bf16 %v3563_v54  ;;  %v3564_v63 = vunpack.i.l.bf16 %v3563_v54 }
 0x90b   : > { %v3714_v59 = vpop.eup %3713 }
 0x90c   : > { %v3716_v62 = vpop.eup %3715  ;;  %v1109_v56 = vmul.f32 %v3714_v59, %v3710_v18  ;;  %v1222_v5 = vsel %vm476_vm1, %v4301_v41, %v3565_v60  ;;  %v1221_v6 = vsel %vm476_vm1, %v4297_v35, %v3564_v63 }
 0x90d   : > { %v3718_v47 = vpop.eup %3717  ;;  %v1106_v28 = vmul.f32 %v3716_v62, %v3708_v17  ;;  %v3568_v58 = vpop.permute.xlu1 %3567  ;;  %v1226_v20 = vsel %vm1225_vm2, %v1221_v6, %v3574_v11  ;;  %v3627_v6 = vld [vmem:[%s4798_s6 + $0x38] sm:$0xff]  }
 0x90e   : > { %v1108_v30 = vmul.f32 %v3718_v47, %v3706_v14  ;;  %v3570_v38 = vunpack.i.h.bf16 %v3568_v58  ;;  %v3569_v1 = vunpack.i.l.bf16 %v3568_v58  ;;  %v3631_v11 = vld [vmem:[%s4798_s6 + $0x18] sm:$0xff]  }
 0x90f   : > { %v3720_v55 = vpop.eup %3719 }
 0x910   : > { %v1107_v29 = vmul.f32 %v3720_v55, %v3712_v21  ;;  %v1111_v32 = vpack.c.bf16 %v1109_v56, %v1108_v30  ;;  %v1224_v39 = vsel %vm476_vm1, %v4299_v36, %v3570_v38  ;;  %v1223_v13 = vsel %vm476_vm1, %v4295_v34, %v3569_v1 }
 0x911   : > { %v3578_v61 = vpop.permute.xlu1 %3577  ;;  %v1227_v21 = vsel %vm1225_vm2, %v1222_v5, %v3575_v10  ;;  %v3625_v5 = vld [vmem:[#allocation5 + $0x8] sm:$0xff]  }
 0x912   : > { %v1110_v31 = vpack.c.bf16 %v1107_v29, %v1106_v28  ;;  %v3580_v2 = vunpack.i.h.bf16 %v3578_v61  ;;  %v3579_v4 = vunpack.i.l.bf16 %v3578_v61  ;;  %3330 = vmatprep.subr.bf16.mxu0 %v3625_v5  ;;  %v3630_v10 = vld [vmem:[%s4798_s6 + $0x20] sm:$0xff]  }
 0x913   : > { %3331 = vmatpush3.bf16.msra.mxu0 %v3625_v5 }
 0x914   : > { %3318 = vmatprep.mubr.msk.bf16.mxu1 %vm321_vm0, %v1110_v31  ;;  %v1228_v16 = vsel %vm1225_vm2, %v1223_v13, %v3579_v4  ;;  %v1229_v41 = vsel %vm1225_vm2, %v1224_v39, %v3580_v2 }
 0x915   : > { %3319 = vmatmul.mubr.msk.bf16.vlgmr.msra.gmra.mxu1 %vm321_vm0, %v1111_v32 }
 0x916   : > { %3323 = vmatpush3.bf16.msra.mxu1 %v3623_v33 }
 0x917   : > { %3324 = vmatprep.subr.bf16.mxu1 %v3624_v42 }
 0x91a   : > { %3325 = vmatpush3.bf16.msra.mxu1 %v3624_v42 }
 0x91b   : > { %3338 = vmatprep.subr.bf16.mxu1 %v3627_v6 }
 0x9d5   : > { %v3320_v43 = vpop.f32.mrf.mxu1 }
 0x9d7   : > { %v1158_v44 = vpop.f32.mrf.mxu1 }
 0x9d9   : > { %v3321_v45 = vpop.f32.mrf.mxu1 }
 0x9da   : > { %v3586_v46 = vpack.i.bf16 %v3321_v45, %v3320_v43 }
 0x9db   : > { %v1161_v48 = vpop.f32.mrf.mxu1 }
 0x9dc   : > { %v3581_v50 = vpack.i.bf16 %v1161_v48, %v1158_v44  ;;  %3587 = vrot.lane.b32.xlu1 %v3586_v46, %s4809_s14 }
 0x9de   : > { %3582 = vrot.lane.b32.xlu0 %v3581_v50, %s4809_s14 }
 0xa4e   : > { %v3588_v37 = vpop.permute.xlu1 %3587 }
 0xa4f   : > { %v3590_v40 = vunpack.i.h.bf16 %v3588_v37  ;;  %v3589_v9 = vunpack.i.l.bf16 %v3588_v37  ;;  %v3626_v37 = vld [vmem:[#allocation5] sm:$0xff]  }
 0xa50   : > { %v3583_v14 = vpop.permute.xlu0 %3582  ;;  %3332 = vmatprep.subr.bf16.mxu0 %v3626_v37 }
 0xa51   : > { %v3585_v17 = vunpack.i.h.bf16 %v3583_v14  ;;  %v3584_v18 = vunpack.i.l.bf16 %v3583_v14  ;;  %v1233_v35 = vsel %vm1230_vm3, %v1228_v16, %v3589_v9  ;;  %v1234_v19 = vsel %vm1230_vm3, %v1229_v41, %v3590_v40  ;;  %3333 = vmatpush3.bf16.msra.mxu0 %v3626_v37  ;;  %v3628_v40 = vld [vmem:[%s4798_s6 + $0x30] sm:$0xff]   ;;  %v3629_v9 = vld [vmem:[%s4798_s6 + $0x28] sm:$0xff]  }
 0xa52   : > { %v1236_v26 = vpack.c.bf16 %v1234_v19, %v1233_v35 }
 0xa53   : > { %v1231_v36 = vsel %vm1230_vm3, %v1226_v20, %v3584_v18  ;;  %v1232_v22 = vsel %vm1230_vm3, %v1227_v21, %v3585_v17 }
 0xa54   : > { %v1235_v34 = vpack.c.bf16 %v1232_v22, %v1231_v36  ;;  %v1370_v22 = vsub.s32 2, %v4139_v51 }
 0xa56   : > { %3326 = vmatprep.mubr.msk.bf16.mxu1 %vm321_vm0, %v1235_v34 }
 0xa57   : > { %3327 = vmatmul.mubr.msk.bf16.vlgmr.msra.gmra.mxu1 %vm321_vm0, %v1236_v26 }
 0xa58   : > { %3339 = vmatpush3.bf16.msra.mxu1 %v3627_v6 }
 0xa59   : > { %3340 = vmatprep.subr.bf16.mxu1 %v3628_v40 }
 0xa5c   : > { %3341 = vmatpush3.bf16.msra.mxu1 %v3628_v40 }
 0xa5d   : > { %3342 = vmatprep.subr.bf16.mxu1 %v3629_v9 }
 0xa60   : > { %3343 = vmatpush3.bf16.msra.mxu1 %v3629_v9 }
 0xa61   : > { %3344 = vmatprep.subr.bf16.mxu1 %v3630_v10 }
 0xa64   : > { %3345 = vmatpush3.bf16.msra.mxu1 %v3630_v10 }
 0xa65   : > { %3346 = vmatprep.subr.bf16.mxu1 %v3631_v11 }
 0xa68   : > { %3347 = vmatpush3.bf16.msra.mxu1 %v3631_v11  ;;  %v1485_v11 = vsub.s32 7, %v4139_v51 }
 0xb17   : > { %v3328_v24 = vpop.f32.mrf.mxu1 }
 0xb18   : > { %v1306_v49 = vadd.f32 %v3328_v24, %v1244_v25 }
 0xb19   : > { %v1297_v27 = vpop.f32.mrf.mxu1 }
 0xb1a   : > { %v1298_v59 = vadd.f32 %v1297_v27, %v1244_v25  ;;  %v4361_v56 = vadd.f32 %v1306_v49, %v4108_v7  ;;  %v1378_v27 = vsub.s32 3, %v4139_v51 }
 0xb1b   : > { %v3329_v62 = vpop.f32.mrf.mxu1 }
 0xb1c   : > { %v4358_v47 = vadd.f32 %v1298_v59, %v4100_v3  ;;  %v1309_v28 = vadd.f32 %v3329_v62, %v1244_v25  ;;  %v1322_v32 = vsel %vm321_vm0, %v4361_v56, 0.0 }
 0xb1d   : > { %v1300_v55 = vpop.f32.mrf.mxu1 }
 0xb1e   : > { %v1301_v29 = vadd.f32 %v1300_v55, %v1244_v25  ;;  %v1316_v30 = vsel %vm321_vm0, %v4358_v47, 0.0  ;;  %v4369_v31 = vadd.f32 %v1309_v28, %v4117_v12  ;;  %v3817_v25 = vld [vmem:[#allocation2] sm:$0xff] }
 0xb1f   : > { %1317 = vadd.xlane.f32.xlu0 %v1316_v30  ;;  %v1371_v24 = vrot.slane %v3817_v25, %v1370_v22  ;;  %v1379_v28 = vrot.slane %v3817_v25, %v1378_v27 }
 0xb20   : > { %v4366_v53 = vadd.f32 %v1301_v29, %v4110_v8  ;;  %v1325_v7 = vsel %vm321_vm0, %v4369_v31, 0.0 }
 0xb22   : > { %v1319_v3 = vsel %vm321_vm0, %v4366_v53, 0.0 }
 0xb23   : > { %1320 = vadd.xlane.f32.xlu1 %v1319_v3  ;;  %1323 = vadd.xlane.f32.xlu0 %v1322_v32 }
 0xb27   : > { %1326 = vadd.xlane.f32.xlu0 %v1325_v7 }
 0xba8   : > { %v1318_v33 = vpop.xlane.xlu0 %1317 }
 0xba9   : > { %v1328_v42 = vmul.f32 0.03125, %v1318_v33 }
 0xbab   : > { %v1332_v8 = vsub.f32 %v4358_v47, %v1328_v42 }
 0xbac   : > { %v1321_v43 = vpop.xlane.xlu1 %1320  ;;  %v1324_v44 = vpop.xlane.xlu0 %1323 }
 0xbad   : > { %v1329_v12 = vmul.f32 0.03125, %v1321_v43  ;;  %v1330_v45 = vmul.f32 0.03125, %v1324_v44  ;;  %v1336_v46 = vmul.f32 %v1332_v8, %v1332_v8 }
 0xbaf   : > { %v1333_v48 = vsub.f32 %v4366_v53, %v1329_v12  ;;  %v4380_v50 = vsub.f32 %v4361_v56, %v1330_v45  ;;  %v1340_v54 = vsel %vm321_vm0, %v1336_v46, 0.0  ;;  %v3632_v46 = vld [vmem:[%s4798_s6 + $0x10] sm:$0xff]  }
 0xbb0   : > { %1341 = vadd.xlane.f32.xlu0 %v1340_v54  ;;  %v1327_v58 = vpop.xlane.xlu0 %1326  ;;  %3348 = vmatprep.subr.bf16.mxu1 %v3632_v46  ;;  %v1392_v54 = vsub.s32 6, %v4139_v51 }
 0xbb1   : > { %v1331_v60 = vmul.f32 0.03125, %v1327_v58  ;;  %v1337_v61 = vmul.f32 %v1333_v48, %v1333_v48  ;;  %v1338_v63 = vmul.f32 %v4380_v50, %v4380_v50  ;;  %3349 = vmatpush3.bf16.msra.mxu1 %v3632_v46  ;;  %v3635_v46 = vld [vmem:[%s4795_s3 + $0x18] sm:$0xff]  }
 0xbb2   : > { %3358 = vmatprep.subr.bf16.mxu0 %v3635_v46 }
 0xbb3   : > { %v1335_v0 = vsub.f32 %v4369_v31, %v1331_v60  ;;  %v1343_v38 = vsel %vm321_vm0, %v1337_v61, 0.0  ;;  %v1346_v1 = vsel %vm321_vm0, %v1338_v63, 0.0  ;;  %v1393_v60 = vrot.slane %v3817_v25, %v1392_v54 }
 0xbb4   : > { %1344 = vadd.xlane.f32.xlu1 %v1343_v38  ;;  %1347 = vadd.xlane.f32.xlu0 %v1346_v1 }
 0xbb5   : > { %v1339_v2 = vmul.f32 %v1335_v0, %v1335_v0 }
 0xbb7   : > { %v1349_v4 = vsel %vm321_vm0, %v1339_v2, 0.0 }
 0xbb8   : > { %1350 = vadd.xlane.f32.xlu1 %v1349_v4 }
 0xc39   : > { %v1342_v39 = vpop.xlane.xlu0 %1341 }
 0xc3a   : > { %v1352_v13 = vmul.f32 0.03125, %v1342_v39  ;;  %v1486_v39 = vrot.slane %v3817_v25, %v1485_v11 }
 0xc3c   : > { %v1356_v14 = vadd.f32 1e-06, %v1352_v13 }
 0xc3d   : > { %v1345_v16 = vpop.xlane.xlu1 %1344  ;;  %v1348_v41 = vpop.xlane.xlu0 %1347 }
 0xc3e   : > { %3721 = vrsqrt.f32 %v1356_v14  ;;  %v1353_v17 = vmul.f32 0.03125, %v1345_v16  ;;  %v1354_v18 = vmul.f32 0.03125, %v1348_v41 }
 0xc40   : > { %v1357_v35 = vadd.f32 1e-06, %v1353_v17  ;;  %v1358_v19 = vadd.f32 1e-06, %v1354_v18 }
 0xc41   : > { %v1351_v20 = vpop.xlane.xlu1 %1350 }
 0xc42   : > { %3723 = vrsqrt.f32 %v1357_v35  ;;  %v1355_v21 = vmul.f32 0.03125, %v1351_v20 }
 0xc43   : > { %3725 = vrsqrt.f32 %v1358_v19 }
 0xc44   : > { %v1359_v36 = vadd.f32 1e-06, %v1355_v21 }
 0xc46   : > { %3727 = vrsqrt.f32 %v1359_v36 }
 0xc4b   : > { %v3722_v34 = vpop.eup %3721 }
 0xc4c   : > { %v1364_v26 = vmul.f32 %v3722_v34, %v1332_v8 }
 0xc4e   : > { %v1372_v55 = vmul.f32 %v1371_v24, %v1364_v26 }
 0xc4f   : > { %v3724_v49 = vpop.eup %3723 }
 0xc50   : > { %v3726_v59 = vpop.eup %3725  ;;  %v1365_v62 = vmul.f32 %v3724_v49, %v1333_v48  ;;  %v1380_v7 = vadd.f32 %v1379_v28, %v1372_v55  ;;  %v3633_v48 = vld [vmem:[%s4798_s6 + $0x8] sm:$0xff]  }
 0xc51   : > { %v1366_v29 = vmul.f32 %v3726_v59, %v4380_v50  ;;  %3350 = vmatprep.subr.bf16.mxu1 %v3633_v48  ;;  %v3634_v50 = vld [vmem:[%s4798_s6] sm:$0xff]  }
 0xc52   : > { %v1373_v30 = vmul.f32 %v1371_v24, %v1365_v62  ;;  %3351 = vmatpush3.bf16.msra.mxu1 %v3633_v48  ;;  %v3636_v48 = vld [vmem:[%s4795_s3 + $0x10] sm:$0xff]  }
 0xc53   : > { %v3728_v3 = vpop.eup %3727  ;;  %v1374_v42 = vmul.f32 %v1371_v24, %v1366_v29  ;;  %3352 = vmatprep.subr.bf16.mxu1 %v3634_v50 }
 0xc54   : > { %v1367_v32 = vmul.f32 %v3728_v3, %v1335_v0  ;;  %v1381_v33 = vadd.f32 %v1379_v28, %v1373_v30 }
 0xc55   : > { %v1382_v44 = vadd.f32 %v1379_v28, %v1374_v42 }
 0xc56   : > { %v1384_v8 = vpack.c.bf16 %v1381_v33, %v1380_v7  ;;  %v1375_v43 = vmul.f32 %v1371_v24, %v1367_v32  ;;  %3353 = vmatpush3.bf16.msra.mxu1 %v3634_v50 }
 0xc58   : > { %3334 = vmatprep.mubr.msk.bf16.mxu0 %vm321_vm0, %v1384_v8  ;;  %v1383_v12 = vadd.f32 %v1379_v28, %v1375_v43 }
 0xc5a   : > { %v1385_v45 = vpack.c.bf16 %v1383_v12, %v1382_v44 }
 0xc5c   : > { %3335 = vmatmul.mubr.msk.bf16.vlgmr.msra.gmra.mxu0 %vm321_vm0, %v1385_v45 }
 0xc5d   : > { %3359 = vmatpush3.bf16.msra.mxu0 %v3635_v46 }
 0xc5e   : > { %3360 = vmatprep.subr.bf16.mxu0 %v3636_v48 }
 0xc61   : > { %3361 = vmatpush3.bf16.msra.mxu0 %v3636_v48 }
 0xd1c   : > { %v3336_v58 = vpop.f32.mrf.mxu0 }
 0xd1d   : > { %v1455_v1 = vadd.f32 %v3336_v58, %v1393_v60 }
 0xd1e   : > { %v1446_v61 = vpop.f32.mrf.mxu0 }
 0xd1f   : > { %v1447_v0 = vadd.f32 %v1446_v61, %v1393_v60  ;;  %v1463_v40 = vmax.f32 %v1455_v1, 0.0 }
 0xd20   : > { %v3337_v63 = vpop.f32.mrf.mxu0 }
 0xd21   : > { %v1458_v38 = vadd.f32 %v3337_v63, %v1393_v60  ;;  %v1461_v37 = vmax.f32 %v1447_v0, 0.0 }
 0xd22   : > { %v1449_v2 = vpop.f32.mrf.mxu0 }
 0xd23   : > { %v1450_v4 = vadd.f32 %v1449_v2, %v1393_v60  ;;  %v1464_v5 = vmax.f32 %v1458_v38, 0.0 }
 0xd25   : > { %v1462_v6 = vmax.f32 %v1450_v4, 0.0  ;;  %v1466_v10 = vpack.c.bf16 %v1464_v5, %v1463_v40 }
 0xd27   : > { %v1465_v9 = vpack.c.bf16 %v1462_v6, %v1461_v37  ;;  %v4462_v6 = vld [vmem:[#allocation2 + $0x8] sm:$0xff] }
 0xd29   : > { %3354 = vmatprep.mubr.bf16.mxu1 %v1465_v9 }
 0xd2a   : > { %3355 = vmatmul.mubr.bf16.vlgmr.msra.gmra.mxu1 %v1466_v10  ;;  %v1645_v10 = vrot.slane %v4462_v6, %v4142_v52 }
 0xdea   : > { %v3356_v13 = vpop.f32.mrf.mxu1 }
 0xdeb   : > { %v1578_v16 = vadd.f32 %v3356_v13, %v1486_v39 }
 0xdec   : > { %v1569_v14 = vpop.f32.mrf.mxu1 }
 0xded   : > { %v1570_v41 = vadd.f32 %v1569_v14, %v1486_v39  ;;  %v4432_v19 = vadd.f32 %v1578_v16, %v4361_v56 }
 0xdee   : > { %v3357_v17 = vpop.f32.mrf.mxu1 }
 0xdef   : > { %v4429_v18 = vadd.f32 %v1570_v41, %v4358_v47  ;;  %v1581_v20 = vadd.f32 %v3357_v17, %v1486_v39  ;;  %v1596_v25 = vsel %vm321_vm0, %v4432_v19, 0.0  ;;  %v1653_v41 = vrot.slane %v4462_v6, %v4149_v57 }
 0xdf0   : > { %v1572_v35 = vpop.f32.mrf.mxu1 }
 0xdf1   : > { %v1573_v21 = vadd.f32 %v1572_v35, %v1486_v39  ;;  %v1590_v36 = vsel %vm321_vm0, %v4429_v18, 0.0  ;;  %v4440_v26 = vadd.f32 %v1581_v20, %v4369_v31 }
 0xdf2   : > { %1591 = vadd.xlane.f32.xlu0 %v1590_v36 }
 0xdf3   : > { %v4437_v34 = vadd.f32 %v1573_v21, %v4366_v53  ;;  %v1599_v56 = vsel %vm321_vm0, %v4440_v26, 0.0 }
 0xdf5   : > { %v1593_v47 = vsel %vm321_vm0, %v4437_v34, 0.0 }
 0xdf6   : > { %1594 = vadd.xlane.f32.xlu1 %v1593_v47  ;;  %1597 = vadd.xlane.f32.xlu0 %v1596_v25 }
 0xdfa   : > { %1600 = vadd.xlane.f32.xlu1 %v1599_v56 }
 0xe7b   : > { %v1592_v24 = vpop.xlane.xlu0 %1591 }
 0xe7c   : > { %v1602_v49 = vmul.f32 0.03125, %v1592_v24 }
 0xe7e   : > { %v1606_v53 = vsub.f32 %v4429_v18, %v1602_v49 }
 0xe7f   : > { %v1595_v59 = vpop.xlane.xlu1 %1594  ;;  %v1598_v62 = vpop.xlane.xlu0 %1597 }
 0xe80   : > { %v1603_v31 = vmul.f32 0.03125, %v1595_v59  ;;  %v1604_v55 = vmul.f32 0.03125, %v1598_v62  ;;  %v1610_v28 = vmul.f32 %v1606_v53, %v1606_v53 }
 0xe82   : > { %v1607_v29 = vsub.f32 %v4437_v34, %v1603_v31  ;;  %v1608_v30 = vsub.f32 %v4432_v19, %v1604_v55  ;;  %v1614_v3 = vsel %vm321_vm0, %v1610_v28, 0.0  ;;  %v1668_v31 = vrot.slane %v4462_v6, %v399_v15 }
 0xe83   : > { %v1601_v32 = vpop.xlane.xlu1 %1600  ;;  %1615 = vadd.xlane.f32.xlu0 %v1614_v3 }
 0xe84   : > { %v1605_v7 = vmul.f32 0.03125, %v1601_v32  ;;  %v1611_v33 = vmul.f32 %v1607_v29, %v1607_v29  ;;  %v1612_v42 = vmul.f32 %v1608_v30, %v1608_v30 }
 0xe86   : > { %v1609_v8 = vsub.f32 %v4440_v26, %v1605_v7  ;;  %v1617_v43 = vsel %vm321_vm0, %v1611_v33, 0.0  ;;  %v1620_v44 = vsel %vm321_vm0, %v1612_v42, 0.0 }
 0xe87   : > { %1618 = vadd.xlane.f32.xlu1 %v1617_v43  ;;  %1621 = vadd.xlane.f32.xlu0 %v1620_v44 }
 0xe88   : > { %v1613_v12 = vmul.f32 %v1609_v8, %v1609_v8 }
 0xe8a   : > { %v1623_v45 = vsel %vm321_vm0, %v1613_v12, 0.0 }
 0xe8b   : > { %1624 = vadd.xlane.f32.xlu1 %v1623_v45 }
 0xf0c   : > { %v1616_v50 = vpop.xlane.xlu0 %1615 }
 0xf0d   : > { %v1626_v58 = vmul.f32 0.03125, %v1616_v50 }
 0xf0f   : > { %v1630_v60 = vadd.f32 1e-06, %v1626_v58 }
 0xf10   : > { %v1619_v61 = vpop.xlane.xlu1 %1618  ;;  %v1622_v63 = vpop.xlane.xlu0 %1621 }
 0xf11   : > { %3729 = vrsqrt.f32 %v1630_v60  ;;  %v1627_v0 = vmul.f32 0.03125, %v1619_v61  ;;  %v1628_v38 = vmul.f32 0.03125, %v1622_v63 }
 0xf13   : > { %v1631_v1 = vadd.f32 1e-06, %v1627_v0  ;;  %v1632_v2 = vadd.f32 1e-06, %v1628_v38 }
 0xf14   : > { %v1625_v4 = vpop.xlane.xlu1 %1624 }
 0xf15   : > { %3731 = vrsqrt.f32 %v1631_v1  ;;  %v1629_v5 = vmul.f32 0.03125, %v1625_v4 }
 0xf16   : > { %3733 = vrsqrt.f32 %v1632_v2 }
 0xf17   : > { %v1633_v37 = vadd.f32 1e-06, %v1629_v5 }
 0xf19   : > { %3735 = vrsqrt.f32 %v1633_v37 }
 0xf1e   : > { %v3730_v40 = vpop.eup %3729 }
 0xf1f   : > { %v1638_v9 = vmul.f32 %v3730_v40, %v1606_v53 }
 0xf21   : > { %v1646_v16 = vmul.f32 %v1645_v10, %v1638_v9 }
 0xf22   : > { %v3732_v39 = vpop.eup %3731 }
 0xf23   : > { %v3734_v13 = vpop.eup %3733  ;;  %v1639_v14 = vmul.f32 %v3732_v39, %v1607_v29  ;;  %v1654_v36 = vadd.f32 %v1653_v41, %v1646_v16 }
 0xf24   : > { %v1640_v17 = vmul.f32 %v3734_v13, %v1608_v30 }
 0xf25   : > { %v1647_v35 = vmul.f32 %v1645_v10, %v1639_v14 }
 0xf26   : > { %v3736_v20 = vpop.eup %3735  ;;  %v1648_v25 = vmul.f32 %v1645_v10, %v1640_v17 }
 0xf27   : > { %v1641_v21 = vmul.f32 %v3736_v20, %v1609_v8  ;;  %v1655_v47 = vadd.f32 %v1653_v41, %v1647_v35 }
 0xf28   : > { %v1656_v49 = vadd.f32 %v1653_v41, %v1648_v25 }
 0xf29   : > { %v1658_v56 = vpack.c.bf16 %v1655_v47, %v1654_v36  ;;  %v1649_v24 = vmul.f32 %v1645_v10, %v1641_v21 }
 0xf2b   : > { %3362 = vmatprep.mubr.msk.bf16.mxu0 %vm321_vm0, %v1658_v56  ;;  %v1657_v53 = vadd.f32 %v1653_v41, %v1649_v24 }
 0xf2d   : > { %v1659_v59 = vpack.c.bf16 %v1657_v53, %v1656_v49 }
 0xf2f   : > { %3363 = vmatmul.mubr.msk.bf16.vlgmr.msra.gmra.mxu0 %vm321_vm0, %v1659_v59 }
 0xfef   : > { %v3364_v62 = vpop.f32.mrf.mxu0 }
 0xff0   : > { %v1730_v29 = vadd.f32 %v3364_v62, %v1668_v31 }
 0xff1   : > { %v1721_v55 = vpop.f32.mrf.mxu0 }
 0xff2   : > { %v1722_v32 = vadd.f32 %v1721_v55, %v1668_v31 }
 0xff3   : > { %v3365_v28 = vpop.f32.mrf.mxu0 }
 0xff4   : > { %v1733_v30 = vadd.f32 %v3365_v28, %v1668_v31 }
 0xff5   : > { %v1724_v3 = vpop.f32.mrf.mxu0 }
 0xff6   : > { %v4473_v7 = vpack.c.bf16 %v1733_v30, %v1730_v29  ;;  %v1725_v33 = vadd.f32 %v1724_v3, %v1668_v31 }
 0xff8   : > { %v4475_v42 = vpack.c.bf16 %v1725_v33, %v1722_v32  ;;  %1742 = vrot.lane.b32.xlu0 %v4473_v7, %s3947_s13 }
 0xffa   : > { %1740 = vrot.lane.b32.xlu1 %v4475_v42, %s3947_s13  ;;  %3370 = vmatprep.mubr.msk.bf16.mxu0 %vm476_vm1, %v4475_v42  ;;  %s4825_s13 = smov 112  }
 0xffc   : > { %1912 = vrot.lane.b32.xlu0 %v4475_v42, %s3948_s19 }
 0xffe   : > { %1918 = vrot.lane.b32.xlu1 %v4473_v7, %s3949_s20 }
0x1002   : > { %1916 = vrot.lane.b32.xlu1 %v4475_v42, %s3949_s20  ;;  %s4827_s20 = smov 72  }
0x1006   : > { %1914 = vrot.lane.b32.xlu1 %v4473_v7, %s3948_s19  ;;  %s4826_s19 = smov 48  }
0x106a   : > { %v1743_v15 = vpop.permute.xlu0 %1742 }
0x106b   : > { %v1754_v8 = vsel %vm476_vm1, %v1743_v15, 0  ;;  %3474 = vmatprep.subr.msk.bf16.mxu0 %vm476_vm1, %v1743_v15 }
0x106c   : > { %3367 = vmatpush3.bf16.xpose.msra.mxu0 %v1754_v8  ;;  %v1741_v43 = vpop.permute.xlu1 %1740 }
0x106d   : > { %3475 = vmatprep.subr.msk.bf16.mxu0 %vm476_vm1, %v1741_v43  ;;  %v1751_v46 = vsel %vm476_vm1, %v1741_v43, 0 }
0x106e   : > { %v1913_v44 = vpop.permute.xlu0 %1912 }
0x106f   : > { %3386 = vmatprep.mubr.msk.bf16.mxu1 %vm476_vm1, %v1913_v44 }
0x1070   : > { %v1919_v12 = vpop.permute.xlu1 %1918 }
0x1071   : > { %v1930_v45 = vsel %vm476_vm1, %v1919_v12, 0  ;;  %3476 = vmatprep.subr.msk.bf16.mxu1 %vm476_vm1, %v1919_v12 }
0x1072   : > { %3383 = vmatpush3.bf16.xpose.msra.mxu1 %v1930_v45 }
0x1074   : > { %3369 = vmatpush3.bf16.xpose.msra.mxu0 %v1751_v46  ;;  %v1917_v48 = vpop.permute.xlu1 %1916 }
0x1075   : > { %3477 = vmatprep.subr.msk.bf16.mxu1 %vm476_vm1, %v1917_v48  ;;  %v1927_v50 = vsel %vm476_vm1, %v1917_v48, 0 }
0x1078   : > { %v1915_v58 = vpop.permute.xlu1 %1914 }
0x107a   : > { %3385 = vmatpush3.bf16.xpose.msra.mxu1 %v1927_v50 }
0x107b   : > { %3371 = vmatmul.mubr.msk.bf16.vlgmr.msra.gmra.mxu0 %vm476_vm1, %v4473_v7 }
0x1081   : > { %3387 = vmatmul.mubr.msk.bf16.vlgmr.msra.gmra.mxu1 %vm476_vm1, %v1915_v58 }
0x113b   : > { %v3372_v60 = vpop.f32.mrf.mxu0 }
0x113c   : > { %v1811_v2 = vsel %vm321_vm0, %v3372_v60, -inf }
0x113d   : > { %v1790_v61 = vpop.f32.mrf.mxu0 }
0x113e   : > { %v1805_v63 = vsel %vm321_vm0, %v1790_v61, -inf }
0x113f   : > { %1806 = vmax.xlane.f32.xlu0 %v1805_v63  ;;  %v3373_v0 = vpop.f32.mrf.mxu0 }
0x1140   : > { %v1814_v40 = vsel %vm321_vm0, %v3373_v0, -inf }
0x1141   : > { %v1793_v38 = vpop.f32.mrf.mxu0  ;;  %v3388_v1 = vpop.f32.mrf.mxu1 }
0x1142   : > { %v1808_v4 = vsel %vm321_vm0, %v1793_v38, -inf  ;;  %v1987_v14 = vsel %vm321_vm0, %v3388_v1, -inf }
0x1143   : > { %v4506_v5 = vpop.f32.mrf.mxu1  ;;  %1812 = vmax.xlane.f32.xlu0 %v1811_v2  ;;  %1809 = vmax.xlane.f32.xlu1 %v1808_v4 }
0x1144   : > { %v1981_v39 = vsel %vm321_vm0, %v4506_v5, -inf }
0x1145   : > { %v3389_v37 = vpop.f32.mrf.mxu1 }
0x1146   : > { %v1990_v13 = vsel %vm321_vm0, %v3389_v37, -inf }
0x1147   : > { %v1969_v9 = vpop.f32.mrf.mxu1  ;;  %1815 = vmax.xlane.f32.xlu0 %v1814_v40 }
0x1148   : > { %v1984_v10 = vsel %vm321_vm0, %v1969_v9, -inf }
0x1149   : > { %1985 = vmax.xlane.f32.xlu1 %v1984_v10 }
0x114b   : > { %1982 = vmax.xlane.f32.xlu0 %v1981_v39 }
0x114d   : > { %1991 = vmax.xlane.f32.xlu1 %v1990_v13 }
0x114f   : > { %1988 = vmax.xlane.f32.xlu0 %v1987_v14 }
0x115e   : > { %1851 = vrot.lane.b32.xlu1 %v4475_v42, %s3953_s29 }
0x1162   : > { %2029 = vrot.lane.b32.xlu1 %v4473_v7, %s3950_s21 }
0x11c8   : > { %v1807_v16 = vpop.xlane.xlu0 %1806 }
0x11c9   : > { %v1817_v53 = vsub.f32 %v1790_v61, %v1807_v16 }
0x11cb   : > { %v1821_v30 = vmul.f32 1.442695, %v1817_v53 }
0x11cc   : > { %v1813_v41 = vpop.xlane.xlu0 %1812  ;;  %v1810_v35 = vpop.xlane.xlu1 %1809 }
0x11cd   : > { %v1819_v17 = vsub.f32 %v3372_v60, %v1813_v41  ;;  %v1818_v56 = vsub.f32 %v1793_v38, %v1810_v35 }
0x11cf   : > { %v1825_v20 = vmul.f32 1.442695, %v1819_v17  ;;  %v1823_v62 = vmul.f32 1.442695, %v1818_v56 }
0x11d0   : > { %v1816_v21 = vpop.xlane.xlu0 %1815 }
0x11d1   : > { %3737 = vpow2.f32 %v1825_v20  ;;  %v1820_v36 = vsub.f32 %v3373_v0, %v1816_v21 }
0x11d2   : > { %v1986_v47 = vpop.xlane.xlu1 %1985 }
0x11d3   : > { %v1827_v25 = vmul.f32 1.442695, %v1820_v36  ;;  %v1994_v55 = vsub.f32 %v1969_v9, %v1986_v47 }
0x11d4   : > { %v1983_v24 = vpop.xlane.xlu0 %1982 }
0x11d5   : > { %3739 = vpow2.f32 %v1827_v25  ;;  %v1999_v32 = vmul.f32 1.442695, %v1994_v55  ;;  %v1993_v0 = vsub.f32 %v4506_v5, %v1983_v24 }
0x11d6   : > { %v1992_v49 = vpop.xlane.xlu1 %1991 }
0x11d7   : > { %v1996_v59 = vsub.f32 %v3389_v37, %v1992_v49  ;;  %v1997_v38 = vmul.f32 1.442695, %v1993_v0 }
0x11d8   : > { %v1989_v31 = vpop.xlane.xlu0 %1988 }
0x11d9   : > { %v2003_v28 = vmul.f32 1.442695, %v1996_v59  ;;  %v1995_v29 = vsub.f32 %v3388_v1, %v1989_v31 }
0x11da   : > { %v1852_v4 = vpop.permute.xlu1 %1851 }
0x11db   : > { %3741 = vpow2.f32 %v2003_v28  ;;  %v2001_v3 = vmul.f32 1.442695, %v1995_v29 }
0x11dc   : > { %3743 = vpow2.f32 %v1823_v62 }
0x11dd   : > { %3745 = vpow2.f32 %v2001_v3 }
0x11de   : > { %v3738_v33 = vpop.eup %3737  ;;  %3747 = vpow2.f32 %v1821_v30  ;;  %v2030_v37 = vpop.permute.xlu1 %2029 }
0x11df   : > { %v1835_v15 = vsel %vm321_vm0, %v3738_v33, 0.0  ;;  %3749 = vpow2.f32 %v1999_v32 }
0x11e0   : > { %1836 = vadd.xlane.f32.xlu0 %v1835_v15  ;;  %3751 = vpow2.f32 %v1997_v38 }
0x11e2   : > { %v3740_v8 = vpop.eup %3739 }
0x11e3   : > { %v1838_v43 = vsel %vm321_vm0, %v3740_v8, 0.0 }
0x11e4   : > { %1839 = vadd.xlane.f32.xlu1 %v1838_v43 }
0x11e8   : > { %v4520_v44 = vpop.eup %3741 }
0x11e9   : > { %v3744_v12 = vpop.eup %3743  ;;  %v2014_v45 = vsel %vm321_vm0, %v4520_v44, 0.0 }
0x11ea   : > { %v4524_v46 = vpop.eup %3745  ;;  %2015 = vadd.xlane.f32.xlu1 %v2014_v45  ;;  %v1832_v58 = vsel %vm321_vm0, %v3744_v12, 0.0 }
0x11eb   : > { %v2011_v48 = vsel %vm321_vm0, %v4524_v46, 0.0  ;;  %v3748_v50 = vpop.eup %3747 }
0x11ec   : > { %2012 = vadd.xlane.f32.xlu0 %v2011_v48  ;;  %v4529_v60 = vpop.eup %3749  ;;  %v1829_v61 = vsel %vm321_vm0, %v3748_v50, 0.0 }
0x11ed   : > { %v2008_v63 = vsel %vm321_vm0, %v4529_v60, 0.0  ;;  %v3752_v1 = vpop.eup %3751 }
0x11ee   : > { %1833 = vadd.xlane.f32.xlu1 %v1832_v58  ;;  %v2005_v2 = vsel %vm321_vm0, %v3752_v1, 0.0 }
0x11f0   : > { %1830 = vadd.xlane.f32.xlu0 %v1829_v61 }
0x11f2   : > { %2009 = vadd.xlane.f32.xlu1 %v2008_v63 }
0x1203   : > { %2027 = vrot.lane.b32.xlu1 %v4475_v42, %s3950_s21  ;;  %s4828_s21 = smov 104  }
0x1206   : > { %1853 = vrot.lane.b32.xlu0 %v4473_v7, %s3953_s29  ;;  %s4830_s29 = smov 8  }
0x1207   : > { %2092 = vrot.lane.b32.xlu1 %v4475_v42, %s3951_s22 }
0x120b   : > { %2090 = vrot.lane.b32.xlu1 %v4473_v7, %s4825_s13 }
0x1225   : > { %2006 = vadd.xlane.f32.xlu0 %v2005_v2 }
0x123b   : > { %2094 = vrot.lane.b32.xlu0 %v4473_v7, %s3951_s22  ;;  %s4829_s22 = smov 40  }
0x123f   : > { %2088 = vrot.lane.b32.xlu0 %v4475_v42, %s4825_s13 }
0x1269   : > { %v1837_v9 = vpop.xlane.xlu0 %1836 }
0x126d   : > { %v1840_v40 = vpop.xlane.xlu1 %1839 }
0x126e   : > { %3753 = vrcp.f32 %v1840_v40 }
0x1273   : > { %v2016_v10 = vpop.xlane.xlu1 %2015 }
0x1275   : > { %v2013_v39 = vpop.xlane.xlu0 %2012 }
0x1277   : > { %v1834_v5 = vpop.xlane.xlu1 %1833 }
0x1278   : > { %3755 = vrcp.f32 %v1834_v5 }
0x1279   : > { %3757 = vrcp.f32 %v1837_v9  ;;  %v1831_v13 = vpop.xlane.xlu0 %1830 }
0x127a   : > { %3759 = vrcp.f32 %v1831_v13 }
0x127b   : > { %v3754_v16 = vpop.eup %3753  ;;  %v2010_v21 = vpop.xlane.xlu1 %2009  ;;  %3761 = vrcp.f32 %v2013_v39 }
0x127c   : > { %v1848_v20 = vmul.f32 %v3754_v16, %v3740_v8  ;;  %3763 = vrcp.f32 %v2010_v21 }
0x127d   : > { %v1854_v14 = vpop.permute.xlu0 %1853  ;;  %3765 = vrcp.f32 %v2016_v10 }
0x127e   : > { %3374 = vmatprep.subr.bf16.mxu0 %v1854_v14 }
0x127f   : > { %3375 = vmatpush3.bf16.msra.mxu0 %v1854_v14  ;;  %v2028_v49 = vpop.permute.xlu1 %2027 }
0x1280   : > { %3376 = vmatprep.subr.bf16.mxu0 %v1852_v4 }
0x1283   : > { %3377 = vmatpush3.bf16.msra.mxu0 %v1852_v4 }
0x1284   : > { %3390 = vmatprep.subr.bf16.mxu0 %v2030_v37 }
0x1285   : > { %v3756_v41 = vpop.eup %3755 }
0x1286   : > { %v3758_v17 = vpop.eup %3757  ;;  %v1846_v47 = vmul.f32 %v3756_v41, %v3744_v12  ;;  %v2093_v12 = vpop.permute.xlu1 %2092 }
0x1287   : > { %v3760_v35 = vpop.eup %3759  ;;  %v1847_v25 = vmul.f32 %v3758_v17, %v3738_v33  ;;  %v2103_v45 = vsel %vm476_vm1, %v2093_v12, 0 }
0x1288   : > { %v1845_v36 = vmul.f32 %v3760_v35, %v3748_v50  ;;  %v3762_v62 = vpop.eup %3761 }
0x1289   : > { %v1850_v24 = vpack.c.bf16 %v1848_v20, %v1847_v25  ;;  %v3764_v31 = vpop.eup %3763  ;;  %v2023_v29 = vmul.f32 %v3762_v62, %v4524_v46 }
0x128a   : > { %v1849_v56 = vpack.c.bf16 %v1846_v47, %v1845_v36  ;;  %v3766_v55 = vpop.eup %3765  ;;  %v2022_v3 = vmul.f32 %v3764_v31, %v4529_v60  ;;  %v2091_v46 = vpop.permute.xlu1 %2090 }
0x128b   : > { %v2024_v32 = vmul.f32 %v3766_v55, %v4520_v44 }
0x128c   : > { %3378 = vmatprep.mubr.msk.bf16.mxu0 %vm321_vm0, %v1849_v56 }
0x128d   : > { %3379 = vmatmul.mubr.msk.bf16.vlgmr.msra.gmra.mxu0 %vm321_vm0, %v1850_v24  ;;  %v2026_v15 = vpack.c.bf16 %v2024_v32, %v2023_v29 }
0x128e   : > { %3391 = vmatpush3.bf16.msra.mxu0 %v2030_v37 }
0x128f   : > { %3392 = vmatprep.subr.bf16.mxu0 %v2028_v49 }
0x1292   : > { %3393 = vmatpush3.bf16.msra.mxu0 %v2028_v49 }
0x12ae   : > { %v2007_v53 = vpop.xlane.xlu0 %2006 }
0x12af   : > { %3767 = vrcp.f32 %v2007_v53 }
0x12b2   : > { %v2095_v59 = vpop.permute.xlu0 %2094 }
0x12b3   : > { %3478 = vmatprep.subr.msk.bf16.mxu0 %vm476_vm1, %v2095_v59  ;;  %v2106_v8 = vsel %vm476_vm1, %v2095_v59, 0 }
0x12b6   : > { %v2089_v43 = vpop.permute.xlu0 %2088 }
0x12bc   : > { %v3768_v28 = vpop.eup %3767 }
0x12bd   : > { %v2021_v30 = vmul.f32 %v3768_v28, %v3752_v1 }
0x12bf   : > { %v2025_v33 = vpack.c.bf16 %v2022_v3, %v2021_v30 }
0x12c1   : > { %3394 = vmatprep.mubr.msk.bf16.mxu0 %vm321_vm0, %v2025_v33 }
0x12c2   : > { %3395 = vmatmul.mubr.msk.bf16.vlgmr.msra.gmra.mxu0 %vm321_vm0, %v2026_v15 }
0x12c3   : > { %3399 = vmatpush3.bf16.xpose.msra.mxu0 %v2106_v8  ;;  %3402 = vmatprep.mubr.msk.bf16.mxu0 %vm476_vm1, %v2089_v43 }
0x12c4   : > { %3479 = vmatprep.subr.msk.bf16.mxu0 %vm476_vm1, %v2093_v12 }
0x12cb   : > { %3401 = vmatpush3.bf16.xpose.msra.mxu0 %v2103_v45 }
0x12d2   : > { %3403 = vmatmul.mubr.msk.bf16.vlgmr.msra.gmra.mxu0 %vm476_vm1, %v2091_v46 }
0x134d   : > { %v4561_v44 = vpop.f32.mrf.mxu0 }
0x134f   : > { %v4563_v48 = vpop.f32.mrf.mxu0 }
0x1351   : > { %v4565_v50 = vpop.f32.mrf.mxu0 }
0x1353   : > { %v4567_v58 = vpop.f32.mrf.mxu0 }
0x1382   : > { %v4569_v60 = vpop.f32.mrf.mxu0 }
0x1384   : > { %v4571_v61 = vpop.f32.mrf.mxu0 }
0x1386   : > { %v4573_v63 = vpop.f32.mrf.mxu0 }
0x1387   : > { %v3596_v0 = vpack.i.bf16 %v4573_v63, %v4569_v60 }
0x1388   : > { %v4577_v38 = vpop.f32.mrf.mxu0 }
0x1389   : > { %v3591_v1 = vpack.i.bf16 %v4577_v38, %v4571_v61 }
0x1392   : > { %v3404_v2 = vpop.f32.mrf.mxu0 }
0x1393   : > { %v2163_v10 = vsel %vm321_vm0, %v3404_v2, -inf }
0x1394   : > { %v2142_v4 = vpop.f32.mrf.mxu0 }
0x1395   : > { %v2157_v37 = vsel %vm321_vm0, %v2142_v4, -inf }
0x1396   : > { %2158 = vmax.xlane.f32.xlu0 %v2157_v37  ;;  %v3405_v40 = vpop.f32.mrf.mxu0 }
0x1397   : > { %v2166_v5 = vsel %vm321_vm0, %v3405_v40, -inf }
0x1398   : > { %v2145_v9 = vpop.f32.mrf.mxu0 }
0x1399   : > { %v2160_v39 = vsel %vm321_vm0, %v2145_v9, -inf }
0x139a   : > { %2164 = vmax.xlane.f32.xlu0 %v2163_v10  ;;  %2161 = vmax.xlane.f32.xlu1 %v2160_v39 }
0x139e   : > { %2167 = vmax.xlane.f32.xlu0 %v2166_v5 }
0x13ab   : > { %2203 = vrot.lane.b32.xlu1 %v4475_v42, %s4826_s19 }
0x141f   : > { %v2159_v13 = vpop.xlane.xlu0 %2158 }
0x1420   : > { %v2169_v14 = vsub.f32 %v2142_v4, %v2159_v13 }
0x1422   : > { %v2173_v35 = vmul.f32 1.442695, %v2169_v14 }
0x1423   : > { %v2165_v16 = vpop.xlane.xlu0 %2164  ;;  %v2162_v41 = vpop.xlane.xlu1 %2161 }
0x1424   : > { %v2171_v17 = vsub.f32 %v3404_v2, %v2165_v16  ;;  %v2170_v21 = vsub.f32 %v2145_v9, %v2162_v41 }
0x1426   : > { %v2177_v20 = vmul.f32 1.442695, %v2171_v17  ;;  %v2175_v25 = vmul.f32 1.442695, %v2170_v21 }
0x1427   : > { %v2168_v36 = vpop.xlane.xlu0 %2167  ;;  %v2204_v29 = vpop.permute.xlu1 %2203 }
0x1428   : > { %3769 = vpow2.f32 %v2177_v20  ;;  %v2172_v47 = vsub.f32 %v3405_v40, %v2168_v36 }
0x1429   : > { %3771 = vpow2.f32 %v2173_v35 }
0x142a   : > { %v2179_v56 = vmul.f32 1.442695, %v2172_v47 }
0x142c   : > { %3773 = vpow2.f32 %v2179_v56 }
0x142d   : > { %3775 = vpow2.f32 %v2175_v25 }
0x1435   : > { %v3770_v24 = vpop.eup %3769 }
0x1436   : > { %v2187_v49 = vsel %vm321_vm0, %v3770_v24, 0.0  ;;  %v3772_v53 = vpop.eup %3771 }
0x1437   : > { %2188 = vadd.xlane.f32.xlu0 %v2187_v49  ;;  %v2181_v62 = vsel %vm321_vm0, %v3772_v53, 0.0 }
0x1439   : > { %v3774_v59 = vpop.eup %3773 }
0x143a   : > { %v2190_v31 = vsel %vm321_vm0, %v3774_v59, 0.0  ;;  %v3776_v55 = vpop.eup %3775 }
0x143b   : > { %2182 = vadd.xlane.f32.xlu0 %v2181_v62  ;;  %2191 = vadd.xlane.f32.xlu1 %v2190_v31  ;;  %v2184_v28 = vsel %vm321_vm0, %v3776_v55, 0.0 }
0x143f   : > { %2185 = vadd.xlane.f32.xlu1 %v2184_v28 }
0x1450   : > { %2270 = vrot.lane.b32.xlu1 %v4473_v7, %s4827_s20 }
0x1451   : > { %2205 = vrot.lane.b32.xlu0 %v4473_v7, %s4826_s19  ;;  %s299_s19 = sand.u32 1, %s3931_s25  }
0x1454   : > { %2268 = vrot.lane.b32.xlu1 %v4475_v42, %s4827_s20  ;;  %s3036_s20 = sshll.u32 %s299_s19, 5 }
0x1455   : > { %2264 = vrot.lane.b32.xlu0 %v4475_v42, %s4828_s21 }
0x1458   : > { %2266 = vrot.lane.b32.xlu1 %v4473_v7, %s4828_s21  ;;  %s301_s21 = scalar_lea.vmem [#allocation7], %s3036_s20 }
0x14c0   : > { %v2189_v30 = vpop.xlane.xlu0 %2188 }
0x14c4   : > { %v2183_v3 = vpop.xlane.xlu0 %2182  ;;  %v2192_v32 = vpop.xlane.xlu1 %2191 }
0x14c5   : > { %3777 = vrcp.f32 %v2192_v32 }
0x14c6   : > { %3779 = vrcp.f32 %v2183_v3 }
0x14c7   : > { %3781 = vrcp.f32 %v2189_v30 }
0x14c8   : > { %v2206_v33 = vpop.permute.xlu0 %2205  ;;  %v2186_v15 = vpop.xlane.xlu1 %2185 }
0x14c9   : > { %3783 = vrcp.f32 %v2186_v15  ;;  %3406 = vmatprep.subr.bf16.mxu1 %v2206_v33 }
0x14ca   : > { %3407 = vmatpush3.bf16.msra.mxu1 %v2206_v33 }
0x14cb   : > { %3408 = vmatprep.subr.bf16.mxu1 %v2204_v29 }
0x14cc   : > { %v2271_v8 = vpop.permute.xlu1 %2270  ;;  %v2265_v39 = vpop.permute.xlu0 %2264 }
0x14cd   : > { %v2282_v5 = vsel %vm476_vm1, %v2271_v8, 0 }
0x14ce   : > { %3409 = vmatpush3.bf16.msra.mxu1 %v2204_v29 }
0x14cf   : > { %3480 = vmatprep.subr.msk.bf16.mxu1 %vm476_vm1, %v2271_v8 }
0x14d0   : > { %v2269_v13 = vpop.permute.xlu1 %2268 }
0x14d1   : > { %v2279_v14 = vsel %vm476_vm1, %v2269_v13, 0 }
0x14d2   : > { %v3778_v43 = vpop.eup %3777 }
0x14d3   : > { %v3780_v12 = vpop.eup %3779  ;;  %v2200_v2 = vmul.f32 %v3778_v43, %v3774_v59 }
0x14d4   : > { %v3782_v45 = vpop.eup %3781  ;;  %v2197_v4 = vmul.f32 %v3780_v12, %v3772_v53  ;;  %v2267_v16 = vpop.permute.xlu1 %2266 }
0x14d5   : > { %v2199_v40 = vmul.f32 %v3782_v45, %v3770_v24 }
0x14d6   : > { %v3784_v46 = vpop.eup %3783 }
0x14d7   : > { %v2198_v37 = vmul.f32 %v3784_v46, %v3776_v55  ;;  %v2202_v10 = vpack.c.bf16 %v2200_v2, %v2199_v40 }
0x14d9   : > { %v2201_v9 = vpack.c.bf16 %v2198_v37, %v2197_v4 }
0x14db   : > { %3410 = vmatprep.mubr.msk.bf16.mxu1 %vm321_vm0, %v2201_v9 }
0x14dc   : > { %3411 = vmatmul.mubr.msk.bf16.vlgmr.msra.gmra.mxu1 %vm321_vm0, %v2202_v10 }
0x14dd   : > { %3415 = vmatpush3.bf16.xpose.msra.mxu1 %v2282_v5  ;;  %3418 = vmatprep.mubr.msk.bf16.mxu1 %vm476_vm1, %v2265_v39 }
0x14de   : > { %3481 = vmatprep.subr.msk.bf16.mxu1 %vm476_vm1, %v2269_v13 }
0x14e5   : > { %3417 = vmatpush3.bf16.xpose.msra.mxu1 %v2279_v14 }
0x14ec   : > { %3419 = vmatmul.mubr.msk.bf16.vlgmr.msra.gmra.mxu1 %vm476_vm1, %v2267_v16 }
0x159c   : > { %v3412_v41 = vpop.f32.mrf.mxu1 }
0x159e   : > { %v2249_v17 = vpop.f32.mrf.mxu1 }
0x15a0   : > { %v3413_v35 = vpop.f32.mrf.mxu1 }
0x15a1   : > { %v3606_v20 = vpack.i.bf16 %v3413_v35, %v3412_v41 }
0x15a2   : > { %v2252_v21 = vpop.f32.mrf.mxu1 }
0x15a3   : > { %v3601_v36 = vpack.i.bf16 %v2252_v21, %v2249_v17  ;;  %v3638_v21 = vld [vmem:[%s4796_s4 + $0x10] sm:$0xff]  }
0x15ac   : > { %v3420_v47 = vpop.f32.mrf.mxu1 }
0x15ad   : > { %v2339_v53 = vsel %vm321_vm0, %v3420_v47, -inf }
0x15ae   : > { %v2318_v25 = vpop.f32.mrf.mxu1 }
0x15af   : > { %v2333_v56 = vsel %vm321_vm0, %v2318_v25, -inf }
0x15b0   : > { %2334 = vmax.xlane.f32.xlu0 %v2333_v56  ;;  %v3421_v24 = vpop.f32.mrf.mxu1 }
0x15b1   : > { %v2342_v62 = vsel %vm321_vm0, %v3421_v24, -inf }
0x15b2   : > { %v2321_v49 = vpop.f32.mrf.mxu1 }
0x15b3   : > { %v2336_v59 = vsel %vm321_vm0, %v2321_v49, -inf }
0x15b4   : > { %2340 = vmax.xlane.f32.xlu0 %v2339_v53  ;;  %2337 = vmax.xlane.f32.xlu1 %v2336_v59 }
0x15b8   : > { %2343 = vmax.xlane.f32.xlu0 %v2342_v62 }
0x1639   : > { %v2335_v31 = vpop.xlane.xlu0 %2334 }
0x163a   : > { %v2345_v55 = vsub.f32 %v2318_v25, %v2335_v31 }
0x163c   : > { %v2349_v3 = vmul.f32 1.442695, %v2345_v55 }
0x163d   : > { %v2341_v28 = vpop.xlane.xlu0 %2340  ;;  %v2338_v29 = vpop.xlane.xlu1 %2337 }
0x163e   : > { %v2347_v30 = vsub.f32 %v3420_v47, %v2341_v28  ;;  %v2346_v33 = vsub.f32 %v2321_v49, %v2338_v29 }
0x1640   : > { %v2353_v32 = vmul.f32 1.442695, %v2347_v30  ;;  %v2351_v43 = vmul.f32 1.442695, %v2346_v33 }
0x1641   : > { %v2344_v15 = vpop.xlane.xlu0 %2343 }
0x1642   : > { %3785 = vpow2.f32 %v2353_v32  ;;  %v2348_v8 = vsub.f32 %v3421_v24, %v2344_v15 }
0x1643   : > { %3787 = vpow2.f32 %v2349_v3 }
0x1644   : > { %v2355_v12 = vmul.f32 1.442695, %v2348_v8 }
0x1646   : > { %3789 = vpow2.f32 %v2355_v12 }
0x1647   : > { %3791 = vpow2.f32 %v2351_v43 }
0x164f   : > { %v3786_v45 = vpop.eup %3785 }
0x1650   : > { %v2363_v46 = vsel %vm321_vm0, %v3786_v45, 0.0  ;;  %v3788_v2 = vpop.eup %3787 }
0x1651   : > { %2364 = vadd.xlane.f32.xlu0 %v2363_v46  ;;  %v2357_v37 = vsel %vm321_vm0, %v3788_v2, 0.0 }
0x1653   : > { %v3790_v4 = vpop.eup %3789 }
0x1654   : > { %v2366_v40 = vsel %vm321_vm0, %v3790_v4, 0.0  ;;  %v3792_v9 = vpop.eup %3791 }
0x1655   : > { %2358 = vadd.xlane.f32.xlu0 %v2357_v37  ;;  %2367 = vadd.xlane.f32.xlu1 %v2366_v40  ;;  %v2360_v10 = vsel %vm321_vm0, %v3792_v9, 0.0 }
0x1659   : > { %2361 = vadd.xlane.f32.xlu1 %v2360_v10 }
0x166a   : > { %2379 = vrot.lane.b32.xlu1 %v4475_v42, %s4829_s22 }
0x166b   : > { %2381 = vrot.lane.b32.xlu0 %v4473_v7, %s4829_s22  ;;  %s3141_s22 = sshll.u32 %s4024_s28, 9  ;;  %s4751_s28 = scalar_lea.sflag [#allocation4], %s299_s19 }
0x166c   : > { %s4746_s18 = scalar_lea.hbm %s4799_s7, %s3141_s22 }
0x166e   : > { %3592 = vrot.lane.b32.xlu1 %v3591_v1, %s4830_s29 }
0x166f   : > { %3602 = vrot.lane.b32.xlu0 %v3601_v36, %s4831_s9 }
0x1672   : > { %3597 = vrot.lane.b32.xlu1 %v3596_v0, %s4830_s29 }
0x1676   : > { %3607 = vrot.lane.b32.xlu1 %v3606_v20, %s4831_s9  ;;  %v3637_v20 = vld [vmem:[%s4796_s4 + $0x18] sm:$0xff]   ;;  %s2944_s9 = sshll.u32 %s301_s21, 4  ;;  %s4748_s9 = int_to_ptr.vmem [resolvable:$true] %s2944_s9 }
0x1677   : > { %s3871_s17 = scalar_lea.vmem %s4748_s9, 512 }
0x1678   : > { %p3872_p10 = scmp.ne.s32.totalorder %s4748_s9, %s3871_s17 }
0x167a   : > { %p3873_p12 = pnand %p3872_p10, %p4041_p5 }
0x167c   : > { %p3874_p8 = pneg %p3873_p12 }
0x16da   : > { %v2365_v39 = vpop.xlane.xlu0 %2364 }
0x16de   : > { %v2359_v5 = vpop.xlane.xlu0 %2358  ;;  %v2368_v42 = vpop.xlane.xlu1 %2367 }
0x16df   : > { %3793 = vrcp.f32 %v2368_v42 }
0x16e0   : > { %3795 = vrcp.f32 %v2359_v5 }
0x16e1   : > { %3797 = vrcp.f32 %v2365_v39 }
0x16e2   : > { %v2382_v7 = vpop.permute.xlu0 %2381  ;;  %v2362_v13 = vpop.xlane.xlu1 %2361 }
0x16e3   : > { %3799 = vrcp.f32 %v2362_v13  ;;  %3422 = vmatprep.subr.bf16.mxu0 %v2382_v7 }
0x16e4   : > { %3423 = vmatpush3.bf16.msra.mxu0 %v2382_v7 }
0x16e6   : > { %v2380_v61 = vpop.permute.xlu1 %2379  ;;  %v3603_v28 = vpop.permute.xlu0 %3602 }
0x16e7   : > { %3424 = vmatprep.subr.bf16.mxu0 %v2380_v61  ;;  %v3604_v46 = vunpack.i.l.bf16 %v3603_v28 }
0x16e8   : > { %3425 = vmatpush3.bf16.msra.mxu0 %v2380_v61  ;;  %v2510_v61 = vrot.slane %v4462_v6, %v1243_v23 }
0x16e9   : > { %3430 = vmatprep.subr.bf16.mxu0 %v3637_v20 }
0x16ea   : > { %v3593_v53 = vpop.permute.xlu1 %3592 }
0x16eb   : > { %v3595_v31 = vunpack.i.h.bf16 %v3593_v53  ;;  %v3594_v55 = vunpack.i.l.bf16 %v3593_v53 }
0x16ec   : > { %v3794_v38 = vpop.eup %3793 }
0x16ed   : > { %v3796_v1 = vpop.eup %3795  ;;  %v2376_v0 = vmul.f32 %v3794_v38, %v3790_v4  ;;  %v2489_v15 = vsel %vm476_vm1, %v4567_v58, %v3595_v31  ;;  %v2488_v8 = vsel %vm476_vm1, %v4563_v48, %v3594_v55 }
0x16ee   : > { %v3798_v60 = vpop.eup %3797  ;;  %v2373_v14 = vmul.f32 %v3796_v1, %v3788_v2  ;;  %v3598_v59 = vpop.permute.xlu1 %3597  ;;  %v2492_v5 = vsel %vm1225_vm2, %v2488_v8, %v3604_v46  ;;  %v3639_v8 = vld [vmem:[#allocation5 + $0x18] sm:$0xff]   ;;  %v3643_v46 = vld [vmem:[%s4798_s6 + $0x68] sm:$0xff]  }
0x16ef   : > { %v2375_v41 = vmul.f32 %v3798_v60, %v3786_v45  ;;  %v3600_v29 = vunpack.i.h.bf16 %v3598_v59  ;;  %v3599_v30 = vunpack.i.l.bf16 %v3598_v59  ;;  %v3605_v45 = vunpack.i.h.bf16 %v3603_v28  ;;  %3438 = vmatprep.subr.bf16.mxu1 %v3639_v8 }
0x16f0   : > { %v3800_v63 = vpop.eup %3799  ;;  %3439 = vmatpush3.bf16.msra.mxu1 %v3639_v8 }
0x16f1   : > { %v2374_v16 = vmul.f32 %v3800_v63, %v3792_v9  ;;  %v2378_v35 = vpack.c.bf16 %v2376_v0, %v2375_v41  ;;  %v2491_v2 = vsel %vm476_vm1, %v4565_v50, %v3600_v29  ;;  %v2490_v4 = vsel %vm476_vm1, %v4561_v44, %v3599_v30 }
0x16f2   : > { %v3608_v62 = vpop.permute.xlu1 %3607  ;;  %v2493_v42 = vsel %vm1225_vm2, %v2489_v15, %v3605_v45  ;;  %v3642_v45 = vld [vmem:[%s4798_s6 + $0x70] sm:$0xff]  }
0x16f3   : > { %v2377_v17 = vpack.c.bf16 %v2374_v16, %v2373_v14  ;;  %v3610_v3 = vunpack.i.h.bf16 %v3608_v62  ;;  %v3609_v32 = vunpack.i.l.bf16 %v3608_v62 }
0x16f5   : > { %3426 = vmatprep.mubr.msk.bf16.mxu0 %vm321_vm0, %v2377_v17  ;;  %v2494_v40 = vsel %vm1225_vm2, %v2490_v4, %v3609_v32  ;;  %v2495_v9 = vsel %vm1225_vm2, %v2491_v2, %v3610_v3  ;;  %v3644_v2 = vld [vmem:[%s4798_s6 + $0x60] sm:$0xff]   ;;  %v3645_v4 = vld [vmem:[%s4798_s6 + $0x58] sm:$0xff]  }
0x16f6   : > { %3427 = vmatmul.mubr.msk.bf16.vlgmr.msra.gmra.mxu0 %vm321_vm0, %v2378_v35 }
0x16f7   : > { %3431 = vmatpush3.bf16.msra.mxu0 %v3637_v20 }
0x16f8   : > { %3432 = vmatprep.subr.bf16.mxu0 %v3638_v21 }
0x16fb   : > { %3433 = vmatpush3.bf16.msra.mxu0 %v3638_v21 }
0x17b6   : > { %v3428_v36 = vpop.f32.mrf.mxu0 }
0x17b8   : > { %v2425_v47 = vpop.f32.mrf.mxu0 }
0x17ba   : > { %v3429_v25 = vpop.f32.mrf.mxu0 }
0x17bb   : > { %v3616_v56 = vpack.i.bf16 %v3429_v25, %v3428_v36 }
0x17bc   : > { %v2428_v24 = vpop.f32.mrf.mxu0 }
0x17bd   : > { %v3611_v49 = vpack.i.bf16 %v2428_v24, %v2425_v47  ;;  %3617 = vrot.lane.b32.xlu1 %v3616_v56, %s4832_s15 }
0x17bf   : > { %3612 = vrot.lane.b32.xlu0 %v3611_v49, %s4832_s15  ;;  %s3961_s15 = smov [#allocation7]  }
0x17c0   : > { %s3875_s23 = sshll.u32 %s3961_s15, 4  ;;  %s3876_s23 = int_to_ptr.vmem [resolvable:$false] %s3875_s23 }
0x17c1   : > { %s3877_s8 = scalar_lea.vmem %s3876_s23, 1024  ;;  %p3878_p11 = scmp.lt.s32.totalorder %s4748_s9, %s3876_s23 }
0x17c2   : > { %p3879_p0 = scmp.lt.s32.totalorder %s3877_s8, %s3871_s17 }
0x17c4   : > { %p3880_p1 = por %p3879_p0, %p3878_p11 }
0x17c6   : > { %p3881_p3 = pnand %p3880_p1, %p3874_p8 }
0x182f   : > { %v3618_v33 = vpop.permute.xlu1 %3617 }
0x1830   : > { %v3620_v43 = vunpack.i.h.bf16 %v3618_v33  ;;  %v3619_v12 = vunpack.i.l.bf16 %v3618_v33 }
0x1831   : > { %v3613_v37 = vpop.permute.xlu0 %3612 }
0x1832   : > { %v3615_v10 = vunpack.i.h.bf16 %v3613_v37  ;;  %v3614_v58 = vunpack.i.l.bf16 %v3613_v37  ;;  %v2498_v39 = vsel %vm1230_vm3, %v2494_v40, %v3619_v12  ;;  %v2499_v48 = vsel %vm1230_vm3, %v2495_v9, %v3620_v43  ;;  %v3640_v43 = vld [vmem:[#allocation5 + $0x10] sm:$0xff]   ;;  %v3641_v12 = vld [vmem:[%s4798_s6 + $0x78] sm:$0xff]  }
0x1833   : > { %v2501_v13 = vpack.c.bf16 %v2499_v48, %v2498_v39  ;;  %3440 = vmatprep.subr.bf16.mxu1 %v3640_v43  ;;  %3446 = vmatprep.subr.bf16.mxu0 %v3641_v12 }
0x1834   : > { %v2496_v50 = vsel %vm1230_vm3, %v2492_v5, %v3614_v58  ;;  %v2497_v7 = vsel %vm1230_vm3, %v2493_v42, %v3615_v10  ;;  %3441 = vmatpush3.bf16.msra.mxu1 %v3640_v43 }
0x1835   : > { %v2500_v44 = vpack.c.bf16 %v2497_v7, %v2496_v50 }
0x1837   : > { %3434 = vmatprep.mubr.msk.bf16.mxu0 %vm321_vm0, %v2500_v44 }
0x1838   : > { %3435 = vmatmul.mubr.msk.bf16.vlgmr.msra.gmra.mxu0 %vm321_vm0, %v2501_v13 }
0x1839   : > { %3447 = vmatpush3.bf16.msra.mxu0 %v3641_v12 }
0x183a   : > { %3448 = vmatprep.subr.bf16.mxu0 %v3642_v45 }
0x183d   : > { %3449 = vmatpush3.bf16.msra.mxu0 %v3642_v45 }
0x183e   : > { %3450 = vmatprep.subr.bf16.mxu0 %v3643_v46 }
0x1841   : > { %3451 = vmatpush3.bf16.msra.mxu0 %v3643_v46 }
0x1842   : > { %3452 = vmatprep.subr.bf16.mxu0 %v3644_v2 }
0x1845   : > { %3453 = vmatpush3.bf16.msra.mxu0 %v3644_v2 }
0x1846   : > { %3454 = vmatprep.subr.bf16.mxu0 %v3645_v4 }
0x1849   : > { %3455 = vmatpush3.bf16.msra.mxu0 %v3645_v4 }
0x18f8   : > { %v3436_v38 = vpop.f32.mrf.mxu0 }
0x18f9   : > { %v2572_v60 = vadd.f32 %v3436_v38, %v2510_v61  ;;  %v3818_v38 = vld [vmem:[#allocation2 + $0x8] sm:$0xff] }
0x18fa   : > { %v2563_v1 = vpop.f32.mrf.mxu0  ;;  %v2754_v45 = vrot.slane %v3818_v38, %v1485_v11 }
0x18fb   : > { %v2564_v63 = vadd.f32 %v2563_v1, %v2510_v61  ;;  %v4666_v41 = vadd.f32 %v2572_v60, %v4432_v19  ;;  %v2637_v1 = vrot.slane %v3818_v38, %v1370_v22 }
0x18fc   : > { %v3437_v0 = vpop.f32.mrf.mxu0 }
0x18fd   : > { %v4663_v14 = vadd.f32 %v2564_v63, %v4429_v18  ;;  %v2575_v17 = vadd.f32 %v3437_v0, %v2510_v61  ;;  %v2588_v21 = vsel %vm321_vm0, %v4666_v41, 0.0 }
0x18fe   : > { %v2566_v16 = vpop.f32.mrf.mxu0 }
0x18ff   : > { %v2567_v35 = vadd.f32 %v2566_v16, %v2510_v61  ;;  %v2582_v20 = vsel %vm321_vm0, %v4663_v14, 0.0  ;;  %v4674_v6 = vadd.f32 %v2575_v17, %v4440_v26  ;;  %v2645_v17 = vrot.slane %v3818_v38, %v1378_v27  ;;  %v3646_v27 = vld [vmem:[%s4798_s6 + $0x50] sm:$0xff]  }
0x1900   : > { %2583 = vadd.xlane.f32.xlu0 %v2582_v20  ;;  %3456 = vmatprep.subr.bf16.mxu0 %v3646_v27 }
0x1901   : > { %v4671_v23 = vadd.f32 %v2567_v35, %v4437_v34  ;;  %v2591_v19 = vsel %vm321_vm0, %v4674_v6, 0.0  ;;  %3457 = vmatpush3.bf16.msra.mxu0 %v3646_v27 }
0x1903   : > { %v2585_v18 = vsel %vm321_vm0, %v4671_v23, 0.0 }
0x1904   : > { %2586 = vadd.xlane.f32.xlu1 %v2585_v18  ;;  %2589 = vadd.xlane.f32.xlu0 %v2588_v21 }
0x1908   : > { %2592 = vadd.xlane.f32.xlu0 %v2591_v19 }
0x1989   : > { %v2584_v36 = vpop.xlane.xlu0 %2583 }
0x198a   : > { %v2594_v47 = vmul.f32 0.03125, %v2584_v36 }
0x198c   : > { %v2598_v34 = vsub.f32 %v4663_v14, %v2594_v47 }
0x198d   : > { %v2587_v25 = vpop.xlane.xlu1 %2586  ;;  %v2590_v56 = vpop.xlane.xlu0 %2589 }
0x198e   : > { %v2595_v26 = vmul.f32 0.03125, %v2587_v25  ;;  %v2596_v24 = vmul.f32 0.03125, %v2590_v56  ;;  %v2602_v49 = vmul.f32 %v2598_v34, %v2598_v34 }
0x1990   : > { %v2599_v53 = vsub.f32 %v4671_v23, %v2595_v26  ;;  %v2600_v59 = vsub.f32 %v4666_v41, %v2596_v24  ;;  %v2606_v62 = vsel %vm321_vm0, %v2602_v49, 0.0  ;;  %v3647_v24 = vld [vmem:[%s4798_s6 + $0x48] sm:$0xff]   ;;  %v3648_v49 = vld [vmem:[%s4798_s6 + $0x40] sm:$0xff]  }
0x1991   : > { %2607 = vadd.xlane.f32.xlu0 %v2606_v62  ;;  %v2593_v31 = vpop.xlane.xlu0 %2592  ;;  %3458 = vmatprep.subr.bf16.mxu0 %v3647_v24 }
0x1992   : > { %v2597_v55 = vmul.f32 0.03125, %v2593_v31  ;;  %v2603_v28 = vmul.f32 %v2599_v53, %v2599_v53  ;;  %v2604_v29 = vmul.f32 %v2600_v59, %v2600_v59  ;;  %3459 = vmatpush3.bf16.msra.mxu0 %v3647_v24 }
0x1993   : > { %3460 = vmatprep.subr.bf16.mxu0 %v3648_v49 }
0x1994   : > { %v2601_v30 = vsub.f32 %v4674_v6, %v2597_v55  ;;  %v2609_v3 = vsel %vm321_vm0, %v2603_v28, 0.0  ;;  %v2612_v32 = vsel %vm321_vm0, %v2604_v29, 0.0 }
0x1995   : > { %2610 = vadd.xlane.f32.xlu1 %v2609_v3  ;;  %2613 = vadd.xlane.f32.xlu0 %v2612_v32 }
0x1996   : > { %v2605_v33 = vmul.f32 %v2601_v30, %v2601_v30  ;;  %3461 = vmatpush3.bf16.msra.mxu0 %v3648_v49 }
0x1998   : > { %v2615_v15 = vsel %vm321_vm0, %v2605_v33, 0.0 }
0x1999   : > { %2616 = vadd.xlane.f32.xlu1 %v2615_v15 }
0x1a1a   : > { %v2608_v37 = vpop.xlane.xlu0 %2607 }
0x1a1b   : > { %v2618_v40 = vmul.f32 0.03125, %v2608_v37 }
0x1a1d   : > { %v2622_v9 = vadd.f32 1e-06, %v2618_v40 }
0x1a1e   : > { %v2611_v10 = vpop.xlane.xlu1 %2610  ;;  %v2614_v58 = vpop.xlane.xlu0 %2613 }
0x1a1f   : > { %3801 = vrsqrt.f32 %v2622_v9  ;;  %v2619_v39 = vmul.f32 0.03125, %v2611_v10  ;;  %v2620_v48 = vmul.f32 0.03125, %v2614_v58 }
0x1a21   : > { %v2623_v5 = vadd.f32 1e-06, %v2619_v39  ;;  %v2624_v42 = vadd.f32 1e-06, %v2620_v48 }
0x1a22   : > { %v2617_v50 = vpop.xlane.xlu1 %2616 }
0x1a23   : > { %3803 = vrsqrt.f32 %v2623_v5  ;;  %v2621_v7 = vmul.f32 0.03125, %v2617_v50 }
0x1a24   : > { %3805 = vrsqrt.f32 %v2624_v42 }
0x1a25   : > { %v2625_v44 = vadd.f32 1e-06, %v2621_v7 }
0x1a27   : > { %3807 = vrsqrt.f32 %v2625_v44 }
0x1a2c   : > { %v3802_v13 = vpop.eup %3801 }
0x1a2d   : > { %v2630_v61 = vmul.f32 %v3802_v13, %v2598_v34 }
0x1a2f   : > { %v2638_v16 = vmul.f32 %v2637_v1, %v2630_v61 }
0x1a30   : > { %v3804_v60 = vpop.eup %3803 }
0x1a31   : > { %v3806_v63 = vpop.eup %3805  ;;  %v2631_v0 = vmul.f32 %v3804_v60, %v2599_v53  ;;  %v2646_v19 = vadd.f32 %v2645_v17, %v2638_v16 }
0x1a32   : > { %v2632_v35 = vmul.f32 %v3806_v63, %v2600_v59  ;;  %v2660_v59 = vrot.slane %v3818_v38, %v1392_v54 }
0x1a33   : > { %v2639_v20 = vmul.f32 %v2637_v1, %v2631_v0 }
0x1a34   : > { %v3808_v18 = vpop.eup %3807  ;;  %v2640_v47 = vmul.f32 %v2637_v1, %v2632_v35 }
0x1a35   : > { %v2633_v21 = vmul.f32 %v3808_v18, %v2601_v30  ;;  %v2647_v36 = vadd.f32 %v2645_v17, %v2639_v20 }
0x1a36   : > { %v2648_v56 = vadd.f32 %v2645_v17, %v2640_v47 }
0x1a37   : > { %v2650_v25 = vpack.c.bf16 %v2647_v36, %v2646_v19  ;;  %v2641_v34 = vmul.f32 %v2637_v1, %v2633_v21 }
0x1a39   : > { %3442 = vmatprep.mubr.msk.bf16.mxu1 %vm321_vm0, %v2650_v25  ;;  %v2649_v22 = vadd.f32 %v2645_v17, %v2641_v34 }
0x1a3b   : > { %v2651_v26 = vpack.c.bf16 %v2649_v22, %v2648_v56 }
0x1a3d   : > { %3443 = vmatmul.mubr.msk.bf16.vlgmr.msra.gmra.mxu1 %vm321_vm0, %v2651_v26 }
0x1afd   : > { %v3444_v53 = vpop.f32.mrf.mxu1 }
0x1afe   : > { %v2722_v29 = vadd.f32 %v3444_v53, %v2660_v59 }
0x1aff   : > { %v2713_v62 = vpop.f32.mrf.mxu1 }
0x1b00   : > { %v2714_v55 = vadd.f32 %v2713_v62, %v2660_v59  ;;  %v2730_v8 = vmax.f32 %v2722_v29, 0.0  ;;  %v2857_v62 = vld [vmem:[#allocation2 + $0x10] sm:$0xff] }
0x1b01   : > { %v3445_v31 = vpop.f32.mrf.mxu1 }
0x1b02   : > { %v2725_v28 = vadd.f32 %v3445_v31, %v2660_v59  ;;  %v2728_v33 = vmax.f32 %v2714_v55, 0.0  ;;  %v2913_v31 = vrot.slane %v2857_v62, %v4142_v52 }
0x1b03   : > { %v2716_v30 = vpop.f32.mrf.mxu1 }
0x1b04   : > { %v2717_v3 = vadd.f32 %v2716_v30, %v2660_v59  ;;  %v2731_v32 = vmax.f32 %v2725_v28, 0.0  ;;  %v2921_v28 = vrot.slane %v2857_v62, %v4149_v57 }
0x1b06   : > { %v2729_v15 = vmax.f32 %v2717_v3, 0.0  ;;  %v2733_v12 = vpack.c.bf16 %v2731_v32, %v2730_v8 }
0x1b08   : > { %v2732_v43 = vpack.c.bf16 %v2729_v15, %v2728_v33 }
0x1b0a   : > { %3462 = vmatprep.mubr.bf16.mxu0 %v2732_v43 }
0x1b0b   : > { %3463 = vmatmul.mubr.bf16.vlgmr.msra.gmra.mxu0 %v2733_v12 }
0x1bcb   : > { %v3464_v46 = vpop.f32.mrf.mxu0 }
0x1bcc   : > { %v2846_v2 = vadd.f32 %v3464_v46, %v2754_v45 }
0x1bcd   : > { %v2837_v54 = vpop.f32.mrf.mxu0 }
0x1bce   : > { %v2838_v4 = vadd.f32 %v2837_v54, %v2754_v45  ;;  %v2854_v10 = vadd.f32 %v2846_v2, %v4666_v41 }
0x1bcf   : > { %v3465_v37 = vpop.f32.mrf.mxu0 }
0x1bd0   : > { %v2852_v40 = vadd.f32 %v2838_v4, %v4663_v14  ;;  %v2849_v58 = vadd.f32 %v3465_v37, %v2754_v45  ;;  %v2864_v42 = vsel %vm321_vm0, %v2854_v10, 0.0 }
0x1bd1   : > { %v2840_v9 = vpop.f32.mrf.mxu0 }
0x1bd2   : > { %v2841_v39 = vadd.f32 %v2840_v9, %v2754_v45  ;;  %v2858_v48 = vsel %vm321_vm0, %v2852_v40, 0.0  ;;  %v2855_v51 = vadd.f32 %v2849_v58, %v4674_v6 }
0x1bd3   : > { %2859 = vadd.xlane.f32.xlu0 %v2858_v48 }
0x1bd4   : > { %v2853_v5 = vadd.f32 %v2841_v39, %v4671_v23  ;;  %v2867_v14 = vsel %vm321_vm0, %v2855_v51, 0.0 }
0x1bd6   : > { %v2861_v11 = vsel %vm321_vm0, %v2853_v5, 0.0 }
0x1bd7   : > { %2862 = vadd.xlane.f32.xlu1 %v2861_v11  ;;  %2865 = vadd.xlane.f32.xlu0 %v2864_v42 }
0x1bdb   : > { %2868 = vadd.xlane.f32.xlu1 %v2867_v14 }
0x1c5c   : > { %v2860_v50 = vpop.xlane.xlu0 %2859 }
0x1c5d   : > { %v2870_v41 = vmul.f32 0.03125, %v2860_v50 }
0x1c5f   : > { %v2874_v7 = vsub.f32 %v2852_v40, %v2870_v41 }
0x1c60   : > { %v2863_v44 = vpop.xlane.xlu1 %2862  ;;  %v2866_v13 = vpop.xlane.xlu0 %2865 }
0x1c61   : > { %v2871_v61 = vmul.f32 0.03125, %v2863_v44  ;;  %v2872_v38 = vmul.f32 0.03125, %v2866_v13  ;;  %v2878_v1 = vmul.f32 %v2874_v7, %v2874_v7 }
0x1c63   : > { %v2875_v23 = vsub.f32 %v2853_v5, %v2871_v61  ;;  %v2876_v60 = vsub.f32 %v2854_v10, %v2872_v38  ;;  %v2882_v6 = vsel %vm321_vm0, %v2878_v1, 0.0 }
0x1c64   : > { %v2869_v63 = vpop.xlane.xlu1 %2868  ;;  %2883 = vadd.xlane.f32.xlu0 %v2882_v6 }
0x1c65   : > { %v2873_v0 = vmul.f32 0.03125, %v2869_v63  ;;  %v2879_v16 = vmul.f32 %v2875_v23, %v2875_v23  ;;  %v2880_v17 = vmul.f32 %v2876_v60, %v2876_v60 }
0x1c67   : > { %v2877_v35 = vsub.f32 %v2855_v51, %v2873_v0  ;;  %v2885_v20 = vsel %vm321_vm0, %v2879_v16, 0.0  ;;  %v2888_v18 = vsel %vm321_vm0, %v2880_v17, 0.0 }
0x1c68   : > { %2886 = vadd.xlane.f32.xlu1 %v2885_v20  ;;  %2889 = vadd.xlane.f32.xlu0 %v2888_v18 }
0x1c69   : > { %v2881_v21 = vmul.f32 %v2877_v35, %v2877_v35 }
0x1c6b   : > { %v2891_v19 = vsel %vm321_vm0, %v2881_v21, 0.0 }
0x1c6c   : > { %2892 = vadd.xlane.f32.xlu1 %v2891_v19 }
0x1ced   : > { %v2884_v36 = vpop.xlane.xlu0 %2883 }
0x1cee   : > { %v2894_v47 = vmul.f32 0.03125, %v2884_v36 }
0x1cf0   : > { %v2898_v25 = vadd.f32 1e-06, %v2894_v47 }
0x1cf1   : > { %v2887_v34 = vpop.xlane.xlu1 %2886  ;;  %v2890_v56 = vpop.xlane.xlu0 %2889 }
0x1cf2   : > { %3809 = vrsqrt.f32 %v2898_v25  ;;  %v2895_v22 = vmul.f32 0.03125, %v2887_v34  ;;  %v2896_v26 = vmul.f32 0.03125, %v2890_v56 }
0x1cf4   : > { %v2899_v27 = vadd.f32 1e-06, %v2895_v22  ;;  %v2900_v24 = vadd.f32 1e-06, %v2896_v26 }
0x1cf5   : > { %v2893_v49 = vpop.xlane.xlu1 %2892 }
0x1cf6   : > { %3811 = vrsqrt.f32 %v2899_v27  ;;  %v2897_v53 = vmul.f32 0.03125, %v2893_v49 }
0x1cf7   : > { %3813 = vrsqrt.f32 %v2900_v24 }
0x1cf8   : > { %v2901_v59 = vadd.f32 1e-06, %v2897_v53 }
0x1cfa   : > { %3815 = vrsqrt.f32 %v2901_v59 }
0x1cff   : > { %v3810_v55 = vpop.eup %3809 }
0x1d00   : > { %v2906_v29 = vmul.f32 %v3810_v55, %v2874_v7 }
0x1d02   : > { %v2914_v30 = vmul.f32 %v2913_v31, %v2906_v29 }
0x1d03   : > { %v3812_v3 = vpop.eup %3811 }
0x1d04   : > { %v3814_v32 = vpop.eup %3813  ;;  %v2922_v33 = vadd.f32 %v2921_v28, %v2914_v30  ;;  %v2907_v15 = vmul.f32 %v3812_v3, %v2875_v23 }
0x1d05   : > { %v2908_v8 = vmul.f32 %v3814_v32, %v2876_v60 }
0x1d06   : > { %v2915_v43 = vmul.f32 %v2913_v31, %v2907_v15  ;;  %2926 = vst.msk [vmem:[%s301_s21] sm:$0xff] %vm321_vm0, %v2922_v33 }
0x1d07   : > { %v3816_v12 = vpop.eup %3815  ;;  %v2916_v45 = vmul.f32 %v2913_v31, %v2908_v8 }
0x1d08   : > { %v2923_v52 = vadd.f32 %v2921_v28, %v2915_v43  ;;  %v2909_v46 = vmul.f32 %v3816_v12, %v2877_v35 }
0x1d09   : > { %v2924_v57 = vadd.f32 %v2921_v28, %v2916_v45 }
0x1d0a   : > { %v2917_v54 = vmul.f32 %v2913_v31, %v2909_v46  ;;  %2927 = vst.msk [vmem:[%s301_s21 + $0x8] sm:$0xff] %vm321_vm0, %v2923_v52 }
0x1d0b   : > { %2928 = vst.msk [vmem:[%s301_s21 + $0x10] sm:$0xff] %vm321_vm0, %v2924_v57 }
0x1d0c   : > { %v2925_v2 = vadd.f32 %v2921_v28, %v2917_v54 }
0x1d0e   : > { %2929 = vst.msk [vmem:[%s301_s21 + $0x18] sm:$0xff] %vm321_vm0, %v2925_v2 }
0x1d0f   : > { %3884 = shalt.err (!%p3881_p3)
}
0x1d10   : > { %s3885_s13 = scalar_lea.hbm %s4746_s18, 512  ;;  %s3889_s21 = scalar_lea.hbm %s4799_s7, 1024 }
0x1d11   : > { %p3886_p2 = scmp.ne.s32.totalorder %s4746_s18, %s3885_s13  ;;  %p3890_p6 = scmp.lt.s32.totalorder %s4746_s18, %s4799_s7 }
0x1d12   : > { %p3891_p9 = scmp.lt.s32.totalorder %s3889_s21, %s3885_s13 }
0x1d13   : > { %p3887_p4 = pnand %p3886_p2, %p4041_p5 }
0x1d14   : > { %p3892_p7 = por %p3891_p9, %p3890_p6 }
0x1d15   : > { %p3888_p13 = pneg %p3887_p4 }
0x1d17   : > { %p3893_p10 = pnand %p3892_p7, %p3888_p13 }
0x1d19   : > { %3896 = shalt.err (!%p3893_p10)
}
0x1d1a   : > { %s3962_s16 = smov 128  }
0x1d1b   : > { %3490 = dma.vmem_to_hbm [thread:$0]  (%p4041_p5), %s4748_s9, 512, %s4746_s18, %s4751_s28, %s3962_s16, %s3962_s16, %s4830_s29  }
0x1d1c PF: > { %p3507_p12 = scmp.ge.s32.totalorder %s3939_s27, 2  ;;  %s2959_s17 = sand.u32 1, %s3927_s24  }
0x1d1d   : > { %p4833_p8 = scmp.ne.s32.totalorder %s4818_s12, 0  ;;  %s2960_s15 = scalar_lea.sflag [#allocation4], %s2959_s17 }
0x1d1f   : > { %p3500_p11 = pnand %p3507_p12, %p4833_p8 }
0x1d21   : > { %p3501_p0 = pneg %p3500_p11 }
0x1d23   : > { %3922 = dma.done.wait (%p3501_p0), %s2960_s15, 512  }
0x1d24   : > { %3924 = vsyncadd (%p3501_p0), %s2960_s15, 4294966784  ;;  %p19_p1 = scmp.ge.s32.totalorder %s4028_s30, 4   ;;  %s4834_s24 = smov %s3931_s25 }
0x1d25   : > { %s4835_s25 = smov %s3935_s26  ;;  %s4836_s26 = smov %s4039_s10 }
0x1d26   : > { %s4837_s27 = smov %s4028_s30  ;;  %21 = sbr.rel (!%p19_p1) target bundleno = 5 (0x5), region = 98 }
0x1d2b   :  { %2965 = vsyncpa [#allocation3], 1 }
0x1d2c   :  { %2967 = vsyncpa [#allocation3 + $0x1], 1 }
0x1d2d   :  { %2968 = vsyncpa [#allocation6], 1 }
0x1d2e   :  { %2969 = vsyncpa [#allocation4], 1 }
0x1d2f   :  { %2971 = vsyncpa [#allocation4 + $0x1], 1 }

</bundles_post_ra>
